<compile_context>
chip_gen: v7x
topology: tpu7x:2x2x1
jax: 0.10.0
libtpu: 0.0.40
codegen_flags: <defaults>
</compile_context>

<pallas_src>
import functools

import jax
import jax.numpy as jnp
from jax.experimental import pallas as pl
from jax.experimental.pallas import tpu as pltpu

F32 = jnp.float32

# ----------------------------- config (small) -----------------------------
VOCAB = 64
SEQ = 8
HIDDEN = 32          # bert hidden size (768 in the real model)
HEADS = 2
HEAD_DIM = HIDDEN // HEADS
FFN = 64
LAYERS = 2
MAX_POS = 16
CNN_C = 16           # resnet feature dim (2048 in the real model)
FUSION_H = 64        # 512 in the real model
NUM_CLASSES = 7
OUT_PAD = 128        # lane-dense logits slab, sliced to NUM_CLASSES in wrapper
STEM_K = 32          # stem im2col K (27) padded to a sublane multiple
LN_EPS = 1e-12
BN_EPS = 1e-5


# ----------------------------- in-kernel helpers -----------------------------
def _gelu(x):
    # TODO(synk): exact erf-GELU replaced with tanh approximation for TPU lowering.
    return 0.5 * x * (1.0 + jnp.tanh(0.7978845608028654 * (x + 0.044715 * x * x * x)))


def _layernorm(x, g, b, eps=LN_EPS):
    mu = jnp.mean(x, axis=-1, keepdims=True)
    var = jnp.mean((x - mu) ** 2, axis=-1, keepdims=True)
    return (x - mu) * jax.lax.rsqrt(var + eps) * g + b


# ----------------------------- Pallas kernels -----------------------------
def _bert_encoder_kernel(x_ref, mb_ref, eg_ref, eb_ref,
                         wqkv_ref, bqkv_ref, wo_ref, bo_ref,
                         l1g_ref, l1b_ref, win_ref, bin_ref,
                         wout_ref, bout_ref, l2g_ref, l2b_ref,
                         o_ref, *, num_layers, num_heads, head_dim):
    """Whole BERT encoder (all layers) for one batch element; outputs CLS features.

    Attention is batched over heads (no per-head lane slicing / concat):
      qkv  : (3*nh, S, hd)   via one batched matmul against broadcast x
      score: 'hqd,hkd->hqk'  batched dot_general
      ctx  : 'hqk,hkd->hqd'  batched dot_general
      attn : 'hqd,hdo->hqo' then sum over heads (== concat @ Wo)
    """
    hidden = num_heads * head_dim
    scale = 1.0 / (head_dim ** 0.5)
    x = _layernorm(x_ref[0], eg_ref[...], eb_ref[...])        # (S, H) embedding LN
    mb = mb_ref[0]                                            # (1, S) additive mask bias

    for l in range(num_layers):
        last = (l == num_layers - 1)
        # fused QKV, batched over (q/k/v, head): (3nh, S, H) x (3nh, H, hd)
        xb = jnp.broadcast_to(x[None], (3 * num_heads,) + x.shape)
        qkv = jax.lax.dot_general(xb, wqkv_ref[l], (((2,), (1,)), ((0,), (0,))),
                                  preferred_element_type=jnp.float32) + bqkv_ref[l]
        q = qkv[0:num_heads]                                  # (nh, S, hd)
        k = qkv[num_heads:2 * num_heads]
        v = qkv[2 * num_heads:3 * num_heads]
        if last:
            # only the CLS row is emitted -> last layer only needs the CLS query
            q = q[:, 0:1, :]
            x = x[0:1, :]
        s = jax.lax.dot_general(q, k, (((2,), (2,)), ((0,), (0,))),
                                preferred_element_type=jnp.float32)   # (nh, Sq, Sk)
        s = s * scale + mb[None]
        s = s - jnp.max(s, axis=-1, keepdims=True)
        p = jnp.exp(s)
        p = p * pl.reciprocal(jnp.sum(p, axis=-1, keepdims=True), approx=True)
        ctx = jax.lax.dot_general(p, v, (((2,), (1,)), ((0,), (0,))),
                                  preferred_element_type=jnp.float32)  # (nh, Sq, hd)
        attn_h = jax.lax.dot_general(ctx, wo_ref[l], (((2,), (1,)), ((0,), (0,))),
                                     preferred_element_type=jnp.float32)  # (nh, Sq, H)
        attn = jnp.sum(attn_h, axis=0) + bo_ref[l]            # (Sq, H)
        x = _layernorm(attn + x, l1g_ref[l], l1b_ref[l])
        ffn = _gelu(jnp.dot(x, win_ref[l], preferred_element_type=jnp.float32)
                    + bin_ref[l])
        ffn = jnp.dot(ffn, wout_ref[l], preferred_element_type=jnp.float32) + bout_ref[l]
        x = _layernorm(ffn + x, l2g_ref[l], l2b_ref[l])
        # TODO(synk): all BERT nn.Dropout layers run in eval mode (identity).
    o_ref[0] = x[0:1, :]                                      # last_hidden_state[:, 0, :]
    del hidden


def _resnet_fusion_kernel(pat_ref, txt_ref, ws_ref, bs_ref,
                          w1_ref, b1_ref, w2_ref, b2_ref,
                          w1t_ref, w1i_ref, bf1_ref, wf2_ref, bf2_ref,
                          o_ref, *, batch, hw, c):
    """Whole image path + fusion head, batch collapsed into the GEMM M dim.

    stem conv3x3 (pool-reordered im2col GEMM, BN folded) + ReLU + 2x2 maxpool,
    then two residual-block conv3x3 (in-kernel im2col via 9 shifted matmuls on
    a zero-padded VMEM-resident feature map, BN folded), residual add + ReLU,
    global average pool, and the fusion MLP.  Logits written lane-dense
    (OUT_PAD wide)."""
    rows = batch * hw * hw                                    # rows per pool quadrant

    # ---- stem: GEMM + ReLU; pool = max over the 4 contiguous quadrant chunks ----
    y0 = jnp.dot(pat_ref[...], ws_ref[...], preferred_element_type=jnp.float32) + bs_ref[...]
    y0 = jnp.maximum(y0, 0.0)                                 # (4*rows, C)
    pooled = jnp.maximum(jnp.maximum(y0[0 * rows:1 * rows], y0[1 * rows:2 * rows]),
                         jnp.maximum(y0[2 * rows:3 * rows], y0[3 * rows:4 * rows]))
    pooled4 = pooled.reshape(batch, hw, hw, c)                # rows ordered (b, ho, wo)

    def conv3x3(x4, w_ref_, b_ref_):
        # in-kernel im2col: zero-pad by 1 (pure-value concat, stays in VMEM) and
        # accumulate 9 shifted (rows, C) @ (C, C) matmuls.
        zc = jnp.zeros((batch, hw, 1, c), jnp.float32)
        zr = jnp.zeros((batch, 1, hw + 2, c), jnp.float32)
        xp = jnp.concatenate([zr, jnp.concatenate([zc, x4, zc], axis=2), zr], axis=1)
        acc = None
        for dh in range(3):
            for dw in range(3):
                sl = xp[:, dh:dh + hw, dw:dw + hw, :].reshape(rows, c)
                wk = w_ref_[(dh * 3 + dw) * c:(dh * 3 + dw + 1) * c, :]
                t = jnp.dot(sl, wk, preferred_element_type=jnp.float32)
                acc = t if acc is None else acc + t
        return acc + b_ref_[...]

    # ---- residual block: conv+BN+ReLU, conv+BN, +identity, ReLU ----
    y1 = jnp.maximum(conv3x3(pooled4, w1_ref, b1_ref), 0.0)    # (rows, C)
    y2 = conv3x3(y1.reshape(batch, hw, hw, c), w2_ref, b2_ref)
    z = jnp.maximum(y2 + pooled, 0.0)                          # residual add + ReLU

    # ---- global average pool -> (B, C) ----
    img = jnp.mean(z.reshape(batch, hw * hw, c), axis=1)

    # ---- fusion MLP: concat(text, image) @ W1 == text @ W1t + image @ W1i ----
    txt = txt_ref[...]                                         # (B, HIDDEN)
    h1 = (jnp.dot(txt, w1t_ref[...], preferred_element_type=jnp.float32)
          + jnp.dot(img, w1i_ref[...], preferred_element_type=jnp.float32)
          + bf1_ref[...])
    h1 = jnp.maximum(h1, 0.0)
    # TODO(synk): nn.Dropout(0.5) is identity in eval mode; train-mode dropout omitted.
    o_ref[...] = jnp.dot(h1, wf2_ref[...], preferred_element_type=jnp.float32) + bf2_ref[...]


# ----------------------------- pallas_call wrappers -----------------------------
def bert_encode(prep, x_emb, mask_bias):
    """grid=(B,) 'parallel' call (2-way sharding on v7x); shared weights are
    whole-array VMEM blocks (constant index_map -> fetched once)."""
    B, S, H = x_emb.shape
    batched = [x_emb, mask_bias]
    shared = [prep["emb_ln_g"], prep["emb_ln_b"],
              prep["wqkv"], prep["bqkv"], prep["wo"], prep["bo"],
              prep["l1g"], prep["l1b"], prep["win"], prep["bin"],
              prep["wout"], prep["bout"], prep["l2g"], prep["l2b"]]

    in_specs = []
    for a in batched:
        in_specs.append(pl.BlockSpec((1,) + tuple(a.shape[1:]),
                                     lambda b, nd=a.ndim: (b,) + (0,) * (nd - 1)))
    for a in shared:
        in_specs.append(pl.BlockSpec(tuple(a.shape),
                                     lambda b, nd=a.ndim: (0,) * nd))
    out_specs = pl.BlockSpec((1, 1, H), lambda b: (b, 0, 0))

    flops = 2 * B * LAYERS * (S * HIDDEN * 3 * HIDDEN
                              + 2 * HEADS * S * S * HEAD_DIM
                              + HEADS * S * HEAD_DIM * HIDDEN
                              + 2 * S * HIDDEN * FFN)
    trans = B * LAYERS * (HEADS * S * S + S * FFN)
    bytes_acc = 4 * (sum(int(a.size) for a in batched)
                     + sum(int(a.size) for a in shared) + B * HIDDEN)

    cls = pl.pallas_call(
        functools.partial(_bert_encoder_kernel, num_layers=LAYERS,
                          num_heads=HEADS, head_dim=HEAD_DIM),
        out_shape=jax.ShapeDtypeStruct((B, 1, H), F32),
        grid=(B,),
        in_specs=in_specs,
        out_specs=out_specs,
        compiler_params=pltpu.CompilerParams(dimension_semantics=("parallel",)),
        cost_estimate=pl.CostEstimate(flops=int(flops), transcendentals=int(trans),
                                      bytes_accessed=int(bytes_acc)),
    )(*batched, *shared)
    return cls.reshape(B, H)                                   # (B, HIDDEN)


def resnet_fusion(prep, pat, txt, batch, hw):
    """Single-step pallas_call (no grid): whole batch collapsed into the GEMM M
    dimension; all operands live as full arrays in VMEM."""
    rows = batch * hw * hw
    flops = 2 * (4 * rows * STEM_K * CNN_C
                 + 2 * 9 * rows * CNN_C * CNN_C
                 + batch * (HIDDEN * FUSION_H + CNN_C * FUSION_H + FUSION_H * OUT_PAD))
    bytes_acc = 4 * (int(pat.size) + int(txt.size) + batch * OUT_PAD
                     + STEM_K * CNN_C + 2 * 9 * CNN_C * CNN_C
                     + (HIDDEN + CNN_C) * FUSION_H + FUSION_H * OUT_PAD)
    out = pl.pallas_call(
        functools.partial(_resnet_fusion_kernel, batch=batch, hw=hw, c=CNN_C),
        out_shape=jax.ShapeDtypeStruct((batch, OUT_PAD), F32),
        cost_estimate=pl.CostEstimate(flops=int(flops), transcendentals=0,
                                      bytes_accessed=int(bytes_acc)),
    )(pat, txt,
      prep["stem_w"], prep["stem_b"],
      prep["b1_w"], prep["b1_b"], prep["b2_w"], prep["b2_b"],
      prep["w1t"], prep["w1i"], prep["bf1"], prep["wf2"], prep["bf2"])
    return out[:, :NUM_CLASSES]


# ----------------------------- glue (XLA) -----------------------------
def _im2col_3x3(x):
    """(B,H,W,C) NHWC, 3x3 kernel, stride 1, pad 1 -> (B,H,W,9C) patches. Glue."""
    B, H, W, C = x.shape
    xp = jnp.pad(x, ((0, 0), (1, 1), (1, 1), (0, 0)))
    cols = [xp[:, i:i + H, j:j + W, :] for i in range(3) for j in range(3)]
    return jnp.concatenate(cols, axis=-1)


def humanitarian_net_forward(prep, input_ids, attention_mask, image):
    B, S = input_ids.shape

    # --- text path: embedding gather + mask bias (glue), encoder in one kernel ---
    x_emb = (prep["word_emb"][input_ids]
             + prep["pos_emb"][:S][None, :, :]
             + prep["type_emb"][0][None, None, :]).astype(F32)
    mask_bias = ((1.0 - attention_mask.astype(F32)) * -10000.0).reshape(B, 1, S)
    text_feat = bert_encode(prep, x_emb, mask_bias)            # (B, HIDDEN)

    # --- image path glue: NCHW->NHWC, stem im2col on the tiny 3-channel input,
    #     K padded 27->32, rows pool-reordered to (ph, pw, b, ho, wo) so the
    #     in-kernel 2x2 maxpool is a max over 4 contiguous chunks ---
    x = jnp.transpose(image, (0, 2, 3, 1)).astype(F32)
    Bi, Hh, Ww, _ = x.shape
    Ho, Wo = Hh // 2, Ww // 2
    pat = _im2col_3x3(x)                                       # (B, H, W, 27)
    pat = jnp.pad(pat, ((0, 0), (0, 0), (0, 0), (0, STEM_K - pat.shape[-1])))
    pat = pat.reshape(Bi, Ho, 2, Wo, 2, STEM_K)
    pat = jnp.transpose(pat, (2, 4, 0, 1, 3, 5)).reshape(4 * Bi * Ho * Wo, STEM_K)

    # --- entire ResNet path + fusion MLP in one kernel ---
    logits = resnet_fusion(prep, pat, text_feat, Bi, Ho)       # (B, NUM_CLASSES)
    return logits


# ----------------------------- parameters -----------------------------
def init_params(key):
    ks = iter(jax.random.split(key, 128))

    def nrm(shape, scale=0.02):
        return scale * jax.random.normal(next(ks), shape, dtype=F32)

    H, F = HIDDEN, FFN
    p = {
        "word_emb": nrm((VOCAB, H)),
        "pos_emb": nrm((MAX_POS, H)),
        "type_emb": nrm((2, H)),
        "emb_ln_g": jnp.ones((H,), F32),
        "emb_ln_b": jnp.zeros((H,), F32),
        "layers": [],
    }
    for _ in range(LAYERS):
        p["layers"].append({
            "wq": nrm((H, H)), "bq": jnp.zeros((H,), F32),
            "wk": nrm((H, H)), "bk": jnp.zeros((H,), F32),
            "wv": nrm((H, H)), "bv": jnp.zeros((H,), F32),
            "wo": nrm((H, H)), "bo": jnp.zeros((H,), F32),
            "ln1_g": jnp.ones((H,), F32), "ln1_b": jnp.zeros((H,), F32),
            "w_in": nrm((H, F)), "b_in": jnp.zeros((F,), F32),
            "w_out": nrm((F, H)), "b_out": jnp.zeros((H,), F32),
            "ln2_g": jnp.ones((H,), F32), "ln2_b": jnp.zeros((H,), F32),
        })

    def conv_bn(cin, cout):
        return {
            "w": nrm((3, 3, cin, cout), scale=0.1),
            "b": jnp.zeros((cout,), F32),
            "gamma": jnp.ones((cout,), F32),
            "beta": jnp.zeros((cout,), F32),
            "mean": nrm((cout,), scale=0.01),
            "var": jnp.ones((cout,), F32) + jnp.abs(nrm((cout,), scale=0.01)),
        }

    p["stem"] = conv_bn(3, CNN_C)
    p["block1"] = conv_bn(CNN_C, CNN_C)
    p["block2"] = conv_bn(CNN_C, CNN_C)

    p["fusion_w1"] = nrm((HIDDEN + CNN_C, FUSION_H), scale=0.05)
    p["fusion_b1"] = jnp.zeros((FUSION_H,), F32)
    p["fusion_w2"] = nrm((FUSION_H, NUM_CLASSES), scale=0.05)
    p["fusion_b2"] = jnp.zeros((NUM_CLASSES,), F32)
    return p


def _fold_bn(cp):
    """Fold eval-mode BatchNorm into the conv GEMM weight/bias (one-time)."""
    scale = cp["gamma"] * jax.lax.rsqrt(cp["var"] + BN_EPS)
    shift = cp["beta"] - cp["mean"] * scale
    cout = cp["w"].shape[-1]
    w = cp["w"].reshape(-1, cout) * scale[None, :]
    b = (cp["b"] * scale + shift).reshape(1, cout)
    return w, b


def _head_split(w, nh, hd):
    """(H_in, H_out) -> (nh, H_in, hd): per-head column blocks."""
    return jnp.transpose(w.reshape(w.shape[0], nh, hd), (1, 0, 2))


def preprocess_params(p):
    """One-time weight restructuring (hoisted out of the jitted forward):
    per-layer stacking, per-head reshapes, BN folding, K/lane padding."""
    H, F, nh, hd = HIDDEN, FFN, HEADS, HEAD_DIM
    layers = p["layers"]
    prep = {
        "word_emb": p["word_emb"], "pos_emb": p["pos_emb"], "type_emb": p["type_emb"],
        "emb_ln_g": p["emb_ln_g"].reshape(1, H),
        "emb_ln_b": p["emb_ln_b"].reshape(1, H),
        # fused QKV, batched over (q/k/v, head): (L, 3nh, H, hd)
        "wqkv": jnp.stack([jnp.concatenate([_head_split(ly["wq"], nh, hd),
                                            _head_split(ly["wk"], nh, hd),
                                            _head_split(ly["wv"], nh, hd)], axis=0)
                           for ly in layers]),
        "bqkv": jnp.stack([jnp.concatenate([ly["bq"].reshape(nh, 1, hd),
                                            ly["bk"].reshape(nh, 1, hd),
                                            ly["bv"].reshape(nh, 1, hd)], axis=0)
                           for ly in layers]),
        "wo": jnp.stack([ly["wo"].reshape(nh, hd, H) for ly in layers]),
        "bo": jnp.stack([ly["bo"].reshape(1, H) for ly in layers]),
        "l1g": jnp.stack([ly["ln1_g"].reshape(1, H) for ly in layers]),
        "l1b": jnp.stack([ly["ln1_b"].reshape(1, H) for ly in layers]),
        "win": jnp.stack([ly["w_in"] for ly in layers]),
        "bin": jnp.stack([ly["b_in"].reshape(1, F) for ly in layers]),
        "wout": jnp.stack([ly["w_out"] for ly in layers]),
        "bout": jnp.stack([ly["b_out"].reshape(1, H) for ly in layers]),
        "l2g": jnp.stack([ly["ln2_g"].reshape(1, H) for ly in layers]),
        "l2b": jnp.stack([ly["ln2_b"].reshape(1, H) for ly in layers]),
    }
    # conv + BN (eval) folded; stem K padded 27 -> 32 (sublane multiple)
    ws, bs = _fold_bn(p["stem"])
    prep["stem_w"] = jnp.pad(ws, ((0, STEM_K - ws.shape[0]), (0, 0)))
    prep["stem_b"] = bs
    prep["b1_w"], prep["b1_b"] = _fold_bn(p["block1"])
    prep["b2_w"], prep["b2_b"] = _fold_bn(p["block2"])
    # fusion: concat split into two matmuls; logits weights padded lane-dense
    prep["w1t"] = p["fusion_w1"][:HIDDEN]
    prep["w1i"] = p["fusion_w1"][HIDDEN:]
    prep["bf1"] = p["fusion_b1"].reshape(1, FUSION_H)
    prep["wf2"] = jnp.pad(p["fusion_w2"], ((0, 0), (0, OUT_PAD - NUM_CLASSES)))
    prep["bf2"] = jnp.pad(p["fusion_b2"], (0, OUT_PAD - NUM_CLASSES)).reshape(1, OUT_PAD)
    return prep


# ----------------------------- main -----------------------------
if __name__ == "__main__":
    B = 2
    key = jax.random.PRNGKey(0)
    pkey, k_ids, k_img = jax.random.split(key, 3)

    params = init_params(pkey)
    prep = preprocess_params(params)          # one-time, outside the jitted forward

    input_ids = jax.random.randint(k_ids, (B, SEQ), 0, VOCAB)
    attention_mask = jnp.ones((B, SEQ), dtype=jnp.int32).at[1, 6:].set(0)
    image = jax.random.normal(k_img, (B, 3, 16, 16), dtype=F32)   # NCHW like PyTorch

    fwd = jax.jit(humanitarian_net_forward)
    out = fwd(prep, input_ids, attention_mask, image)
    out = jax.block_until_ready(out)

    assert out.shape == (B, NUM_CLASSES)
    assert bool(jnp.all(jnp.isfinite(out)))
    print("KERNEL_OK")
</pallas_src>

<mosaic_0001>
module attributes {stable_mosaic.version = 11 : i64} {
  func.func @_bert_encoder_kernel(%arg0: i32, %arg1: memref<1x8x32xf32, #tpu.memory_space<vmem>>, %arg2: memref<1x1x8xf32, #tpu.memory_space<vmem>>, %arg3: memref<1x32xf32, #tpu.memory_space<vmem>>, %arg4: memref<1x32xf32, #tpu.memory_space<vmem>>, %arg5: memref<2x6x32x16xf32, #tpu.memory_space<vmem>>, %arg6: memref<2x6x1x16xf32, #tpu.memory_space<vmem>>, %arg7: memref<2x2x16x32xf32, #tpu.memory_space<vmem>>, %arg8: memref<2x1x32xf32, #tpu.memory_space<vmem>>, %arg9: memref<2x1x32xf32, #tpu.memory_space<vmem>>, %arg10: memref<2x1x32xf32, #tpu.memory_space<vmem>>, %arg11: memref<2x32x64xf32, #tpu.memory_space<vmem>>, %arg12: memref<2x1x64xf32, #tpu.memory_space<vmem>>, %arg13: memref<2x64x32xf32, #tpu.memory_space<vmem>>, %arg14: memref<2x1x32xf32, #tpu.memory_space<vmem>>, %arg15: memref<2x1x32xf32, #tpu.memory_space<vmem>>, %arg16: memref<2x1x32xf32, #tpu.memory_space<vmem>>, %arg17: memref<1x1x32xf32, #tpu.memory_space<vmem>>) attributes {dimension_semantics = [#tpu.dimension_semantics<parallel>], iteration_bounds = array<i64: 2>, scalar_prefetch = 0 : i64, scratch_operands = 0 : i64, tpu.core_type = #tpu.core_type<tc>, window_params = [{transform_indices = @transform_0, window_bounds = array<i64: 1, 8, 32>}, {transform_indices = @transform_1, window_bounds = array<i64: 1, 1, 8>}, {pipeline_mode = #tpu.pipeline_mode<synchronous>, transform_indices = @transform_2, window_bounds = array<i64: 1, 32>}, {pipeline_mode = #tpu.pipeline_mode<synchronous>, transform_indices = @transform_3, window_bounds = array<i64: 1, 32>}, {pipeline_mode = #tpu.pipeline_mode<synchronous>, transform_indices = @transform_4, window_bounds = array<i64: 2, 6, 32, 16>}, {pipeline_mode = #tpu.pipeline_mode<synchronous>, transform_indices = @transform_5, window_bounds = array<i64: 2, 6, 1, 16>}, {pipeline_mode = #tpu.pipeline_mode<synchronous>, transform_indices = @transform_6, window_bounds = array<i64: 2, 2, 16, 32>}, {pipeline_mode = #tpu.pipeline_mode<synchronous>, transform_indices = @transform_7, window_bounds = array<i64: 2, 1, 32>}, {pipeline_mode = #tpu.pipeline_mode<synchronous>, transform_indices = @transform_8, window_bounds = array<i64: 2, 1, 32>}, {pipeline_mode = #tpu.pipeline_mode<synchronous>, transform_indices = @transform_9, window_bounds = array<i64: 2, 1, 32>}, {pipeline_mode = #tpu.pipeline_mode<synchronous>, transform_indices = @transform_10, window_bounds = array<i64: 2, 32, 64>}, {pipeline_mode = #tpu.pipeline_mode<synchronous>, transform_indices = @transform_11, window_bounds = array<i64: 2, 1, 64>}, {pipeline_mode = #tpu.pipeline_mode<synchronous>, transform_indices = @transform_12, window_bounds = array<i64: 2, 64, 32>}, {pipeline_mode = #tpu.pipeline_mode<synchronous>, transform_indices = @transform_13, window_bounds = array<i64: 2, 1, 32>}, {pipeline_mode = #tpu.pipeline_mode<synchronous>, transform_indices = @transform_14, window_bounds = array<i64: 2, 1, 32>}, {pipeline_mode = #tpu.pipeline_mode<synchronous>, transform_indices = @transform_15, window_bounds = array<i64: 2, 1, 32>}, {transform_indices = @transform_16, window_bounds = array<i64: 1, 1, 32>}]} {
    %c0 = arith.constant 0 : index
    %c0_0 = arith.constant 0 : index
    %c0_1 = arith.constant 0 : index
    %0 = vector.load %arg1[%c0, %c0_0, %c0_1] : memref<1x8x32xf32, #tpu.memory_space<vmem>>, vector<1x8x32xf32>
    %1 = vector.shape_cast %0 : vector<1x8x32xf32> to vector<8x32xf32>
    %c0_2 = arith.constant 0 : index
    %c0_3 = arith.constant 0 : index
    %2 = vector.load %arg3[%c0_2, %c0_3] : memref<1x32xf32, #tpu.memory_space<vmem>>, vector<1x32xf32>
    %c0_4 = arith.constant 0 : index
    %c0_5 = arith.constant 0 : index
    %3 = vector.load %arg4[%c0_4, %c0_5] : memref<1x32xf32, #tpu.memory_space<vmem>>, vector<1x32xf32>
    %cst = arith.constant dense<0.000000e+00> : vector<8xf32>
    %4 = vector.multi_reduction <add>, %1, %cst [1] : vector<8x32xf32> to vector<8xf32>
    %5 = vector.shape_cast %4 : vector<8xf32> to vector<8x1xf32>
    %cst_6 = arith.constant 3.200000e+01 : f32
    %6 = vector.broadcast %cst_6 : f32 to vector<8x1xf32>
    %7 = arith.divf %5, %6 : vector<8x1xf32>
    %8 = vector.broadcast %7 : vector<8x1xf32> to vector<8x32xf32>
    %9 = arith.subf %1, %8 : vector<8x32xf32>
    %10 = arith.mulf %9, %9 : vector<8x32xf32>
    %cst_7 = arith.constant dense<0.000000e+00> : vector<8xf32>
    %11 = vector.multi_reduction <add>, %10, %cst_7 [1] : vector<8x32xf32> to vector<8xf32>
    %12 = vector.shape_cast %11 : vector<8xf32> to vector<8x1xf32>
    %cst_8 = arith.constant 3.200000e+01 : f32
    %13 = vector.broadcast %cst_8 : f32 to vector<8x1xf32>
    %14 = arith.divf %12, %13 : vector<8x1xf32>
    %15 = vector.broadcast %7 : vector<8x1xf32> to vector<8x32xf32>
    %16 = arith.subf %1, %15 : vector<8x32xf32>
    %cst_9 = arith.constant 9.99999996E-13 : f32
    %17 = vector.broadcast %cst_9 : f32 to vector<8x1xf32>
    %18 = arith.addf %14, %17 : vector<8x1xf32>
    %19 = math.rsqrt %18 : vector<8x1xf32>
    %20 = vector.broadcast %19 : vector<8x1xf32> to vector<8x32xf32>
    %21 = arith.mulf %16, %20 : vector<8x32xf32>
    %22 = vector.broadcast %2 : vector<1x32xf32> to vector<8x32xf32>
    %23 = arith.mulf %21, %22 : vector<8x32xf32>
    %24 = vector.broadcast %3 : vector<1x32xf32> to vector<8x32xf32>
    %25 = arith.addf %23, %24 : vector<8x32xf32>
    %c0_10 = arith.constant 0 : index
    %c0_11 = arith.constant 0 : index
    %c0_12 = arith.constant 0 : index
    %26 = vector.load %arg2[%c0_10, %c0_11, %c0_12] : memref<1x1x8xf32, #tpu.memory_space<vmem>>, vector<1x1x8xf32>
    %27 = vector.shape_cast %26 : vector<1x1x8xf32> to vector<1x8xf32>
    %28 = vector.shape_cast %25 : vector<8x32xf32> to vector<1x8x32xf32>
    %29 = vector.shape_cast %28 : vector<1x8x32xf32> to vector<1x8x32xf32>
    %30 = vector.broadcast %29 : vector<1x8x32xf32> to vector<6x8x32xf32>
    %c0_13 = arith.constant 0 : index
    %c0_14 = arith.constant 0 : index
    %c0_15 = arith.constant 0 : index
    %c0_16 = arith.constant 0 : index
    %31 = vector.load %arg5[%c0_13, %c0_14, %c0_15, %c0_16] : memref<2x6x32x16xf32, #tpu.memory_space<vmem>>, vector<1x6x32x16xf32>
    %32 = vector.shape_cast %31 : vector<1x6x32x16xf32> to vector<6x32x16xf32>
    %cst_17 = arith.constant dense<0.000000e+00> : vector<6x8x16xf32>
    %33 = tpu.matmul %30, %32, %cst_17 {dimension_numbers = #tpu.dot_dimension_numbers<[2], [1], [1], [2], [0, 0, 0, 1, 1, 2], [0], [0]>} : vector<6x8x32xf32>, vector<6x32x16xf32>, vector<6x8x16xf32> -> vector<6x8x16xf32>
    %c0_18 = arith.constant 0 : index
    %c0_19 = arith.constant 0 : index
    %c0_20 = arith.constant 0 : index
    %c0_21 = arith.constant 0 : index
    %34 = vector.load %arg6[%c0_18, %c0_19, %c0_20, %c0_21] : memref<2x6x1x16xf32, #tpu.memory_space<vmem>>, vector<1x6x1x16xf32>
    %35 = vector.shape_cast %34 : vector<1x6x1x16xf32> to vector<6x1x16xf32>
    %36 = vector.broadcast %35 : vector<6x1x16xf32> to vector<6x8x16xf32>
    %37 = arith.addf %33, %36 : vector<6x8x16xf32>
    %38 = vector.extract_strided_slice %37 {offsets = [0, 0, 0], sizes = [2, 8, 16], strides = [1, 1, 1]} : vector<6x8x16xf32> to vector<2x8x16xf32>
    %39 = vector.extract_strided_slice %37 {offsets = [2, 0, 0], sizes = [2, 8, 16], strides = [1, 1, 1]} : vector<6x8x16xf32> to vector<2x8x16xf32>
    %40 = vector.extract_strided_slice %37 {offsets = [4, 0, 0], sizes = [2, 8, 16], strides = [1, 1, 1]} : vector<6x8x16xf32> to vector<2x8x16xf32>
    %cst_22 = arith.constant dense<0.000000e+00> : vector<2x8x8xf32>
    %41 = tpu.matmul %38, %39, %cst_22 {dimension_numbers = #tpu.dot_dimension_numbers<[2], [2], [1], [1], [0, 0, 0, 1, 1, 1], [0], [0]>} : vector<2x8x16xf32>, vector<2x8x16xf32>, vector<2x8x8xf32> -> vector<2x8x8xf32>
    %cst_23 = arith.constant 2.500000e-01 : f32
    %42 = vector.broadcast %cst_23 : f32 to vector<2x8x8xf32>
    %43 = arith.mulf %41, %42 : vector<2x8x8xf32>
    %44 = vector.shape_cast %27 : vector<1x8xf32> to vector<1x1x8xf32>
    %45 = vector.broadcast %44 : vector<1x1x8xf32> to vector<2x8x8xf32>
    %46 = arith.addf %43, %45 : vector<2x8x8xf32>
    %cst_24 = arith.constant dense<0xFF800000> : vector<2x8xf32>
    %47 = vector.multi_reduction <maximumf>, %46, %cst_24 [2] : vector<2x8x8xf32> to vector<2x8xf32>
    %48 = vector.shape_cast %47 : vector<2x8xf32> to vector<2x8x1xf32>
    %49 = vector.broadcast %48 : vector<2x8x1xf32> to vector<2x8x8xf32>
    %50 = arith.subf %46, %49 : vector<2x8x8xf32>
    %51 = math.exp %50 : vector<2x8x8xf32>
    %cst_25 = arith.constant dense<0.000000e+00> : vector<2x8xf32>
    %52 = vector.multi_reduction <add>, %51, %cst_25 [2] : vector<2x8x8xf32> to vector<2x8xf32>
    %53 = vector.shape_cast %52 : vector<2x8xf32> to vector<2x8x1xf32>
    %54 = tpu.reciprocal %53 {approx = true} : vector<2x8x1xf32> -> vector<2x8x1xf32>
    %55 = vector.broadcast %54 : vector<2x8x1xf32> to vector<2x8x8xf32>
    %56 = arith.mulf %51, %55 : vector<2x8x8xf32>
    %cst_26 = arith.constant dense<0.000000e+00> : vector<2x8x16xf32>
    %57 = tpu.matmul %56, %40, %cst_26 {dimension_numbers = #tpu.dot_dimension_numbers<[2], [1], [1], [2], [0, 0, 0, 1, 1, 2], [0], [0]>} : vector<2x8x8xf32>, vector<2x8x16xf32>, vector<2x8x16xf32> -> vector<2x8x16xf32>
    %c0_27 = arith.constant 0 : index
    %c0_28 = arith.constant 0 : index
    %c0_29 = arith.constant 0 : index
    %c0_30 = arith.constant 0 : index
    %58 = vector.load %arg7[%c0_27, %c0_28, %c0_29, %c0_30] : memref<2x2x16x32xf32, #tpu.memory_space<vmem>>, vector<1x2x16x32xf32>
    %59 = vector.shape_cast %58 : vector<1x2x16x32xf32> to vector<2x16x32xf32>
    %cst_31 = arith.constant dense<0.000000e+00> : vector<2x8x32xf32>
    %60 = tpu.matmul %57, %59, %cst_31 {dimension_numbers = #tpu.dot_dimension_numbers<[2], [1], [1], [2], [0, 0, 0, 1, 1, 2], [0], [0]>} : vector<2x8x16xf32>, vector<2x16x32xf32>, vector<2x8x32xf32> -> vector<2x8x32xf32>
    %cst_32 = arith.constant dense<0.000000e+00> : vector<8x32xf32>
    %61 = vector.multi_reduction <add>, %60, %cst_32 [0] : vector<2x8x32xf32> to vector<8x32xf32>
    %c0_33 = arith.constant 0 : index
    %c0_34 = arith.constant 0 : index
    %c0_35 = arith.constant 0 : index
    %62 = vector.load %arg8[%c0_33, %c0_34, %c0_35] : memref<2x1x32xf32, #tpu.memory_space<vmem>>, vector<1x1x32xf32>
    %63 = vector.shape_cast %62 : vector<1x1x32xf32> to vector<1x32xf32>
    %64 = vector.broadcast %63 : vector<1x32xf32> to vector<8x32xf32>
    %65 = arith.addf %61, %64 : vector<8x32xf32>
    %66 = arith.addf %65, %25 : vector<8x32xf32>
    %c0_36 = arith.constant 0 : index
    %c0_37 = arith.constant 0 : index
    %c0_38 = arith.constant 0 : index
    %67 = vector.load %arg9[%c0_36, %c0_37, %c0_38] : memref<2x1x32xf32, #tpu.memory_space<vmem>>, vector<1x1x32xf32>
    %68 = vector.shape_cast %67 : vector<1x1x32xf32> to vector<1x32xf32>
    %c0_39 = arith.constant 0 : index
    %c0_40 = arith.constant 0 : index
    %c0_41 = arith.constant 0 : index
    %69 = vector.load %arg10[%c0_39, %c0_40, %c0_41] : memref<2x1x32xf32, #tpu.memory_space<vmem>>, vector<1x1x32xf32>
    %70 = vector.shape_cast %69 : vector<1x1x32xf32> to vector<1x32xf32>
    %cst_42 = arith.constant dense<0.000000e+00> : vector<8xf32>
    %71 = vector.multi_reduction <add>, %66, %cst_42 [1] : vector<8x32xf32> to vector<8xf32>
    %72 = vector.shape_cast %71 : vector<8xf32> to vector<8x1xf32>
    %cst_43 = arith.constant 3.200000e+01 : f32
    %73 = vector.broadcast %cst_43 : f32 to vector<8x1xf32>
    %74 = arith.divf %72, %73 : vector<8x1xf32>
    %75 = vector.broadcast %74 : vector<8x1xf32> to vector<8x32xf32>
    %76 = arith.subf %66, %75 : vector<8x32xf32>
    %77 = arith.mulf %76, %76 : vector<8x32xf32>
    %cst_44 = arith.constant dense<0.000000e+00> : vector<8xf32>
    %78 = vector.multi_reduction <add>, %77, %cst_44 [1] : vector<8x32xf32> to vector<8xf32>
    %79 = vector.shape_cast %78 : vector<8xf32> to vector<8x1xf32>
    %cst_45 = arith.constant 3.200000e+01 : f32
    %80 = vector.broadcast %cst_45 : f32 to vector<8x1xf32>
    %81 = arith.divf %79, %80 : vector<8x1xf32>
    %82 = vector.broadcast %74 : vector<8x1xf32> to vector<8x32xf32>
    %83 = arith.subf %66, %82 : vector<8x32xf32>
    %cst_46 = arith.constant 9.99999996E-13 : f32
    %84 = vector.broadcast %cst_46 : f32 to vector<8x1xf32>
    %85 = arith.addf %81, %84 : vector<8x1xf32>
    %86 = math.rsqrt %85 : vector<8x1xf32>
    %87 = vector.broadcast %86 : vector<8x1xf32> to vector<8x32xf32>
    %88 = arith.mulf %83, %87 : vector<8x32xf32>
    %89 = vector.broadcast %68 : vector<1x32xf32> to vector<8x32xf32>
    %90 = arith.mulf %88, %89 : vector<8x32xf32>
    %91 = vector.broadcast %70 : vector<1x32xf32> to vector<8x32xf32>
    %92 = arith.addf %90, %91 : vector<8x32xf32>
    %c0_47 = arith.constant 0 : index
    %c0_48 = arith.constant 0 : index
    %c0_49 = arith.constant 0 : index
    %93 = vector.load %arg11[%c0_47, %c0_48, %c0_49] : memref<2x32x64xf32, #tpu.memory_space<vmem>>, vector<1x32x64xf32>
    %94 = vector.shape_cast %93 : vector<1x32x64xf32> to vector<32x64xf32>
    %cst_50 = arith.constant dense<0.000000e+00> : vector<8x64xf32>
    %95 = tpu.matmul %92, %94, %cst_50 {dimension_numbers = #tpu.dot_dimension_numbers<[1], [0], [0], [1], [0, 0, 1, 1], [], []>} : vector<8x32xf32>, vector<32x64xf32>, vector<8x64xf32> -> vector<8x64xf32>
    %c0_51 = arith.constant 0 : index
    %c0_52 = arith.constant 0 : index
    %c0_53 = arith.constant 0 : index
    %96 = vector.load %arg12[%c0_51, %c0_52, %c0_53] : memref<2x1x64xf32, #tpu.memory_space<vmem>>, vector<1x1x64xf32>
    %97 = vector.shape_cast %96 : vector<1x1x64xf32> to vector<1x64xf32>
    %98 = vector.broadcast %97 : vector<1x64xf32> to vector<8x64xf32>
    %99 = arith.addf %95, %98 : vector<8x64xf32>
    %cst_54 = arith.constant 5.000000e-01 : f32
    %100 = vector.broadcast %cst_54 : f32 to vector<8x64xf32>
    %101 = arith.mulf %100, %99 : vector<8x64xf32>
    %cst_55 = arith.constant 4.471500e-02 : f32
    %102 = vector.broadcast %cst_55 : f32 to vector<8x64xf32>
    %103 = arith.mulf %102, %99 : vector<8x64xf32>
    %104 = arith.mulf %103, %99 : vector<8x64xf32>
    %105 = arith.mulf %104, %99 : vector<8x64xf32>
    %106 = arith.addf %99, %105 : vector<8x64xf32>
    %cst_56 = arith.constant 0.797884583 : f32
    %107 = vector.broadcast %cst_56 : f32 to vector<8x64xf32>
    %108 = arith.mulf %107, %106 : vector<8x64xf32>
    %109 = math.tanh %108 : vector<8x64xf32>
    %cst_57 = arith.constant 1.000000e+00 : f32
    %110 = vector.broadcast %cst_57 : f32 to vector<8x64xf32>
    %111 = arith.addf %110, %109 : vector<8x64xf32>
    %112 = arith.mulf %101, %111 : vector<8x64xf32>
    %c0_58 = arith.constant 0 : index
    %c0_59 = arith.constant 0 : index
    %c0_60 = arith.constant 0 : index
    %113 = vector.load %arg13[%c0_58, %c0_59, %c0_60] : memref<2x64x32xf32, #tpu.memory_space<vmem>>, vector<1x64x32xf32>
    %114 = vector.shape_cast %113 : vector<1x64x32xf32> to vector<64x32xf32>
    %cst_61 = arith.constant dense<0.000000e+00> : vector<8x32xf32>
    %115 = tpu.matmul %112, %114, %cst_61 {dimension_numbers = #tpu.dot_dimension_numbers<[1], [0], [0], [1], [0, 0, 1, 1], [], []>} : vector<8x64xf32>, vector<64x32xf32>, vector<8x32xf32> -> vector<8x32xf32>
    %c0_62 = arith.constant 0 : index
    %c0_63 = arith.constant 0 : index
    %c0_64 = arith.constant 0 : index
    %116 = vector.load %arg14[%c0_62, %c0_63, %c0_64] : memref<2x1x32xf32, #tpu.memory_space<vmem>>, vector<1x1x32xf32>
    %117 = vector.shape_cast %116 : vector<1x1x32xf32> to vector<1x32xf32>
    %118 = vector.broadcast %117 : vector<1x32xf32> to vector<8x32xf32>
    %119 = arith.addf %115, %118 : vector<8x32xf32>
    %120 = arith.addf %119, %92 : vector<8x32xf32>
    %c0_65 = arith.constant 0 : index
    %c0_66 = arith.constant 0 : index
    %c0_67 = arith.constant 0 : index
    %121 = vector.load %arg15[%c0_65, %c0_66, %c0_67] : memref<2x1x32xf32, #tpu.memory_space<vmem>>, vector<1x1x32xf32>
    %122 = vector.shape_cast %121 : vector<1x1x32xf32> to vector<1x32xf32>
    %c0_68 = arith.constant 0 : index
    %c0_69 = arith.constant 0 : index
    %c0_70 = arith.constant 0 : index
    %123 = vector.load %arg16[%c0_68, %c0_69, %c0_70] : memref<2x1x32xf32, #tpu.memory_space<vmem>>, vector<1x1x32xf32>
    %124 = vector.shape_cast %123 : vector<1x1x32xf32> to vector<1x32xf32>
    %cst_71 = arith.constant dense<0.000000e+00> : vector<8xf32>
    %125 = vector.multi_reduction <add>, %120, %cst_71 [1] : vector<8x32xf32> to vector<8xf32>
    %126 = vector.shape_cast %125 : vector<8xf32> to vector<8x1xf32>
    %cst_72 = arith.constant 3.200000e+01 : f32
    %127 = vector.broadcast %cst_72 : f32 to vector<8x1xf32>
    %128 = arith.divf %126, %127 : vector<8x1xf32>
    %129 = vector.broadcast %128 : vector<8x1xf32> to vector<8x32xf32>
    %130 = arith.subf %120, %129 : vector<8x32xf32>
    %131 = arith.mulf %130, %130 : vector<8x32xf32>
    %cst_73 = arith.constant dense<0.000000e+00> : vector<8xf32>
    %132 = vector.multi_reduction <add>, %131, %cst_73 [1] : vector<8x32xf32> to vector<8xf32>
    %133 = vector.shape_cast %132 : vector<8xf32> to vector<8x1xf32>
    %cst_74 = arith.constant 3.200000e+01 : f32
    %134 = vector.broadcast %cst_74 : f32 to vector<8x1xf32>
    %135 = arith.divf %133, %134 : vector<8x1xf32>
    %136 = vector.broadcast %128 : vector<8x1xf32> to vector<8x32xf32>
    %137 = arith.subf %120, %136 : vector<8x32xf32>
    %cst_75 = arith.constant 9.99999996E-13 : f32
    %138 = vector.broadcast %cst_75 : f32 to vector<8x1xf32>
    %139 = arith.addf %135, %138 : vector<8x1xf32>
    %140 = math.rsqrt %139 : vector<8x1xf32>
    %141 = vector.broadcast %140 : vector<8x1xf32> to vector<8x32xf32>
    %142 = arith.mulf %137, %141 : vector<8x32xf32>
    %143 = vector.broadcast %122 : vector<1x32xf32> to vector<8x32xf32>
    %144 = arith.mulf %142, %143 : vector<8x32xf32>
    %145 = vector.broadcast %124 : vector<1x32xf32> to vector<8x32xf32>
    %146 = arith.addf %144, %145 : vector<8x32xf32>
    %147 = vector.shape_cast %146 : vector<8x32xf32> to vector<1x8x32xf32>
    %148 = vector.shape_cast %147 : vector<1x8x32xf32> to vector<1x8x32xf32>
    %149 = vector.broadcast %148 : vector<1x8x32xf32> to vector<6x8x32xf32>
    %c1 = arith.constant 1 : index
    %c0_76 = arith.constant 0 : index
    %c0_77 = arith.constant 0 : index
    %c0_78 = arith.constant 0 : index
    %150 = vector.load %arg5[%c1, %c0_76, %c0_77, %c0_78] : memref<2x6x32x16xf32, #tpu.memory_space<vmem>>, vector<1x6x32x16xf32>
    %151 = vector.shape_cast %150 : vector<1x6x32x16xf32> to vector<6x32x16xf32>
    %cst_79 = arith.constant dense<0.000000e+00> : vector<6x8x16xf32>
    %152 = tpu.matmul %149, %151, %cst_79 {dimension_numbers = #tpu.dot_dimension_numbers<[2], [1], [1], [2], [0, 0, 0, 1, 1, 2], [0], [0]>} : vector<6x8x32xf32>, vector<6x32x16xf32>, vector<6x8x16xf32> -> vector<6x8x16xf32>
    %c1_80 = arith.constant 1 : index
    %c0_81 = arith.constant 0 : index
    %c0_82 = arith.constant 0 : index
    %c0_83 = arith.constant 0 : index
    %153 = vector.load %arg6[%c1_80, %c0_81, %c0_82, %c0_83] : memref<2x6x1x16xf32, #tpu.memory_space<vmem>>, vector<1x6x1x16xf32>
    %154 = vector.shape_cast %153 : vector<1x6x1x16xf32> to vector<6x1x16xf32>
    %155 = vector.broadcast %154 : vector<6x1x16xf32> to vector<6x8x16xf32>
    %156 = arith.addf %152, %155 : vector<6x8x16xf32>
    %157 = vector.extract_strided_slice %156 {offsets = [0, 0, 0], sizes = [2, 8, 16], strides = [1, 1, 1]} : vector<6x8x16xf32> to vector<2x8x16xf32>
    %158 = vector.extract_strided_slice %156 {offsets = [2, 0, 0], sizes = [2, 8, 16], strides = [1, 1, 1]} : vector<6x8x16xf32> to vector<2x8x16xf32>
    %159 = vector.extract_strided_slice %156 {offsets = [4, 0, 0], sizes = [2, 8, 16], strides = [1, 1, 1]} : vector<6x8x16xf32> to vector<2x8x16xf32>
    %160 = vector.extract_strided_slice %157 {offsets = [0, 0, 0], sizes = [2, 1, 16], strides = [1, 1, 1]} : vector<2x8x16xf32> to vector<2x1x16xf32>
    %161 = vector.extract_strided_slice %146 {offsets = [0, 0], sizes = [1, 32], strides = [1, 1]} : vector<8x32xf32> to vector<1x32xf32>
    %cst_84 = arith.constant dense<0.000000e+00> : vector<2x1x8xf32>
    %162 = tpu.matmul %160, %158, %cst_84 {dimension_numbers = #tpu.dot_dimension_numbers<[2], [2], [1], [1], [0, 0, 0, 1, 1, 1], [0], [0]>} : vector<2x1x16xf32>, vector<2x8x16xf32>, vector<2x1x8xf32> -> vector<2x1x8xf32>
    %cst_85 = arith.constant 2.500000e-01 : f32
    %163 = vector.broadcast %cst_85 : f32 to vector<2x1x8xf32>
    %164 = arith.mulf %162, %163 : vector<2x1x8xf32>
    %165 = vector.shape_cast %27 : vector<1x8xf32> to vector<1x1x8xf32>
    %166 = vector.broadcast %165 : vector<1x1x8xf32> to vector<2x1x8xf32>
    %167 = arith.addf %164, %166 : vector<2x1x8xf32>
    %cst_86 = arith.constant dense<0xFF800000> : vector<2x1xf32>
    %168 = vector.multi_reduction <maximumf>, %167, %cst_86 [2] : vector<2x1x8xf32> to vector<2x1xf32>
    %169 = vector.shape_cast %168 : vector<2x1xf32> to vector<2x1x1xf32>
    %170 = vector.broadcast %169 : vector<2x1x1xf32> to vector<2x1x8xf32>
    %171 = arith.subf %167, %170 : vector<2x1x8xf32>
    %172 = math.exp %171 : vector<2x1x8xf32>
    %cst_87 = arith.constant dense<0.000000e+00> : vector<2x1xf32>
    %173 = vector.multi_reduction <add>, %172, %cst_87 [2] : vector<2x1x8xf32> to vector<2x1xf32>
    %174 = vector.shape_cast %173 : vector<2x1xf32> to vector<2x1x1xf32>
    %175 = tpu.reciprocal %174 {approx = true} : vector<2x1x1xf32> -> vector<2x1x1xf32>
    %176 = vector.broadcast %175 : vector<2x1x1xf32> to vector<2x1x8xf32>
    %177 = arith.mulf %172, %176 : vector<2x1x8xf32>
    %cst_88 = arith.constant dense<0.000000e+00> : vector<2x1x16xf32>
    %178 = tpu.matmul %177, %159, %cst_88 {dimension_numbers = #tpu.dot_dimension_numbers<[2], [1], [1], [2], [0, 0, 0, 1, 1, 2], [0], [0]>} : vector<2x1x8xf32>, vector<2x8x16xf32>, vector<2x1x16xf32> -> vector<2x1x16xf32>
    %c1_89 = arith.constant 1 : index
    %c0_90 = arith.constant 0 : index
    %c0_91 = arith.constant 0 : index
    %c0_92 = arith.constant 0 : index
    %179 = vector.load %arg7[%c1_89, %c0_90, %c0_91, %c0_92] : memref<2x2x16x32xf32, #tpu.memory_space<vmem>>, vector<1x2x16x32xf32>
    %180 = vector.shape_cast %179 : vector<1x2x16x32xf32> to vector<2x16x32xf32>
    %cst_93 = arith.constant dense<0.000000e+00> : vector<2x1x32xf32>
    %181 = tpu.matmul %178, %180, %cst_93 {dimension_numbers = #tpu.dot_dimension_numbers<[2], [1], [1], [2], [0, 0, 0, 1, 1, 2], [0], [0]>} : vector<2x1x16xf32>, vector<2x16x32xf32>, vector<2x1x32xf32> -> vector<2x1x32xf32>
    %cst_94 = arith.constant dense<0.000000e+00> : vector<1x32xf32>
    %182 = vector.multi_reduction <add>, %181, %cst_94 [0] : vector<2x1x32xf32> to vector<1x32xf32>
    %c1_95 = arith.constant 1 : index
    %c0_96 = arith.constant 0 : index
    %c0_97 = arith.constant 0 : index
    %183 = vector.load %arg8[%c1_95, %c0_96, %c0_97] : memref<2x1x32xf32, #tpu.memory_space<vmem>>, vector<1x1x32xf32>
    %184 = vector.shape_cast %183 : vector<1x1x32xf32> to vector<1x32xf32>
    %185 = arith.addf %182, %184 : vector<1x32xf32>
    %186 = arith.addf %185, %161 : vector<1x32xf32>
    %c1_98 = arith.constant 1 : index
    %c0_99 = arith.constant 0 : index
    %c0_100 = arith.constant 0 : index
    %187 = vector.load %arg9[%c1_98, %c0_99, %c0_100] : memref<2x1x32xf32, #tpu.memory_space<vmem>>, vector<1x1x32xf32>
    %188 = vector.shape_cast %187 : vector<1x1x32xf32> to vector<1x32xf32>
    %c1_101 = arith.constant 1 : index
    %c0_102 = arith.constant 0 : index
    %c0_103 = arith.constant 0 : index
    %189 = vector.load %arg10[%c1_101, %c0_102, %c0_103] : memref<2x1x32xf32, #tpu.memory_space<vmem>>, vector<1x1x32xf32>
    %190 = vector.shape_cast %189 : vector<1x1x32xf32> to vector<1x32xf32>
    %cst_104 = arith.constant dense<0.000000e+00> : vector<1xf32>
    %191 = vector.multi_reduction <add>, %186, %cst_104 [1] : vector<1x32xf32> to vector<1xf32>
    %192 = vector.shape_cast %191 : vector<1xf32> to vector<1x1xf32>
    %cst_105 = arith.constant 3.200000e+01 : f32
    %193 = vector.broadcast %cst_105 : f32 to vector<1x1xf32>
    %194 = arith.divf %192, %193 : vector<1x1xf32>
    %195 = vector.broadcast %194 : vector<1x1xf32> to vector<1x32xf32>
    %196 = arith.subf %186, %195 : vector<1x32xf32>
    %197 = arith.mulf %196, %196 : vector<1x32xf32>
    %cst_106 = arith.constant dense<0.000000e+00> : vector<1xf32>
    %198 = vector.multi_reduction <add>, %197, %cst_106 [1] : vector<1x32xf32> to vector<1xf32>
    %199 = vector.shape_cast %198 : vector<1xf32> to vector<1x1xf32>
    %cst_107 = arith.constant 3.200000e+01 : f32
    %200 = vector.broadcast %cst_107 : f32 to vector<1x1xf32>
    %201 = arith.divf %199, %200 : vector<1x1xf32>
    %202 = vector.broadcast %194 : vector<1x1xf32> to vector<1x32xf32>
    %203 = arith.subf %186, %202 : vector<1x32xf32>
    %cst_108 = arith.constant 9.99999996E-13 : f32
    %204 = vector.broadcast %cst_108 : f32 to vector<1x1xf32>
    %205 = arith.addf %201, %204 : vector<1x1xf32>
    %206 = math.rsqrt %205 : vector<1x1xf32>
    %207 = vector.broadcast %206 : vector<1x1xf32> to vector<1x32xf32>
    %208 = arith.mulf %203, %207 : vector<1x32xf32>
    %209 = arith.mulf %208, %188 : vector<1x32xf32>
    %210 = arith.addf %209, %190 : vector<1x32xf32>
    %c1_109 = arith.constant 1 : index
    %c0_110 = arith.constant 0 : index
    %c0_111 = arith.constant 0 : index
    %211 = vector.load %arg11[%c1_109, %c0_110, %c0_111] : memref<2x32x64xf32, #tpu.memory_space<vmem>>, vector<1x32x64xf32>
    %212 = vector.shape_cast %211 : vector<1x32x64xf32> to vector<32x64xf32>
    %cst_112 = arith.constant dense<0.000000e+00> : vector<1x64xf32>
    %213 = tpu.matmul %210, %212, %cst_112 {dimension_numbers = #tpu.dot_dimension_numbers<[1], [0], [0], [1], [0, 0, 1, 1], [], []>} : vector<1x32xf32>, vector<32x64xf32>, vector<1x64xf32> -> vector<1x64xf32>
    %c1_113 = arith.constant 1 : index
    %c0_114 = arith.constant 0 : index
    %c0_115 = arith.constant 0 : index
    %214 = vector.load %arg12[%c1_113, %c0_114, %c0_115] : memref<2x1x64xf32, #tpu.memory_space<vmem>>, vector<1x1x64xf32>
    %215 = vector.shape_cast %214 : vector<1x1x64xf32> to vector<1x64xf32>
    %216 = arith.addf %213, %215 : vector<1x64xf32>
    %cst_116 = arith.constant 5.000000e-01 : f32
    %217 = vector.broadcast %cst_116 : f32 to vector<1x64xf32>
    %218 = arith.mulf %217, %216 : vector<1x64xf32>
    %cst_117 = arith.constant 4.471500e-02 : f32
    %219 = vector.broadcast %cst_117 : f32 to vector<1x64xf32>
    %220 = arith.mulf %219, %216 : vector<1x64xf32>
    %221 = arith.mulf %220, %216 : vector<1x64xf32>
    %222 = arith.mulf %221, %216 : vector<1x64xf32>
    %223 = arith.addf %216, %222 : vector<1x64xf32>
    %cst_118 = arith.constant 0.797884583 : f32
    %224 = vector.broadcast %cst_118 : f32 to vector<1x64xf32>
    %225 = arith.mulf %224, %223 : vector<1x64xf32>
    %226 = math.tanh %225 : vector<1x64xf32>
    %cst_119 = arith.constant 1.000000e+00 : f32
    %227 = vector.broadcast %cst_119 : f32 to vector<1x64xf32>
    %228 = arith.addf %227, %226 : vector<1x64xf32>
    %229 = arith.mulf %218, %228 : vector<1x64xf32>
    %c1_120 = arith.constant 1 : index
    %c0_121 = arith.constant 0 : index
    %c0_122 = arith.constant 0 : index
    %230 = vector.load %arg13[%c1_120, %c0_121, %c0_122] : memref<2x64x32xf32, #tpu.memory_space<vmem>>, vector<1x64x32xf32>
    %231 = vector.shape_cast %230 : vector<1x64x32xf32> to vector<64x32xf32>
    %cst_123 = arith.constant dense<0.000000e+00> : vector<1x32xf32>
    %232 = tpu.matmul %229, %231, %cst_123 {dimension_numbers = #tpu.dot_dimension_numbers<[1], [0], [0], [1], [0, 0, 1, 1], [], []>} : vector<1x64xf32>, vector<64x32xf32>, vector<1x32xf32> -> vector<1x32xf32>
    %c1_124 = arith.constant 1 : index
    %c0_125 = arith.constant 0 : index
    %c0_126 = arith.constant 0 : index
    %233 = vector.load %arg14[%c1_124, %c0_125, %c0_126] : memref<2x1x32xf32, #tpu.memory_space<vmem>>, vector<1x1x32xf32>
    %234 = vector.shape_cast %233 : vector<1x1x32xf32> to vector<1x32xf32>
    %235 = arith.addf %232, %234 : vector<1x32xf32>
    %236 = arith.addf %235, %210 : vector<1x32xf32>
    %c1_127 = arith.constant 1 : index
    %c0_128 = arith.constant 0 : index
    %c0_129 = arith.constant 0 : index
    %237 = vector.load %arg15[%c1_127, %c0_128, %c0_129] : memref<2x1x32xf32, #tpu.memory_space<vmem>>, vector<1x1x32xf32>
    %238 = vector.shape_cast %237 : vector<1x1x32xf32> to vector<1x32xf32>
    %c1_130 = arith.constant 1 : index
    %c0_131 = arith.constant 0 : index
    %c0_132 = arith.constant 0 : index
    %239 = vector.load %arg16[%c1_130, %c0_131, %c0_132] : memref<2x1x32xf32, #tpu.memory_space<vmem>>, vector<1x1x32xf32>
    %240 = vector.shape_cast %239 : vector<1x1x32xf32> to vector<1x32xf32>
    %cst_133 = arith.constant dense<0.000000e+00> : vector<1xf32>
    %241 = vector.multi_reduction <add>, %236, %cst_133 [1] : vector<1x32xf32> to vector<1xf32>
    %242 = vector.shape_cast %241 : vector<1xf32> to vector<1x1xf32>
    %cst_134 = arith.constant 3.200000e+01 : f32
    %243 = vector.broadcast %cst_134 : f32 to vector<1x1xf32>
    %244 = arith.divf %242, %243 : vector<1x1xf32>
    %245 = vector.broadcast %244 : vector<1x1xf32> to vector<1x32xf32>
    %246 = arith.subf %236, %245 : vector<1x32xf32>
    %247 = arith.mulf %246, %246 : vector<1x32xf32>
    %cst_135 = arith.constant dense<0.000000e+00> : vector<1xf32>
    %248 = vector.multi_reduction <add>, %247, %cst_135 [1] : vector<1x32xf32> to vector<1xf32>
    %249 = vector.shape_cast %248 : vector<1xf32> to vector<1x1xf32>
    %cst_136 = arith.constant 3.200000e+01 : f32
    %250 = vector.broadcast %cst_136 : f32 to vector<1x1xf32>
    %251 = arith.divf %249, %250 : vector<1x1xf32>
    %252 = vector.broadcast %244 : vector<1x1xf32> to vector<1x32xf32>
    %253 = arith.subf %236, %252 : vector<1x32xf32>
    %cst_137 = arith.constant 9.99999996E-13 : f32
    %254 = vector.broadcast %cst_137 : f32 to vector<1x1xf32>
    %255 = arith.addf %251, %254 : vector<1x1xf32>
    %256 = math.rsqrt %255 : vector<1x1xf32>
    %257 = vector.broadcast %256 : vector<1x1xf32> to vector<1x32xf32>
    %258 = arith.mulf %253, %257 : vector<1x32xf32>
    %259 = arith.mulf %258, %238 : vector<1x32xf32>
    %260 = arith.addf %259, %240 : vector<1x32xf32>
    %c0_138 = arith.constant 0 : index
    %c0_139 = arith.constant 0 : index
    %c0_140 = arith.constant 0 : index
    %261 = vector.load %arg17[%c0_138, %c0_139, %c0_140] : memref<1x1x32xf32, #tpu.memory_space<vmem>>, vector<1x1x32xf32>
    %262 = vector.shape_cast %261 : vector<1x1x32xf32> to vector<1x32xf32>
    %263 = vector.shape_cast %260 : vector<1x32xf32> to vector<1x1x32xf32>
    tpu.vector_store %arg17[%c0_138, %c0_139, %c0_140], %263 {strides = array<i32>} : memref<1x1x32xf32, #tpu.memory_space<vmem>>, vector<1x1x32xf32>,
    return
  }
  func.func @transform_0(%arg0: i32) -> (i32, i32, i32) {
    %c0_i32 = arith.constant 0 : i32
    %c0_i32_0 = arith.constant 0 : i32
    %c0_i32_1 = arith.constant 0 : i32
    return %arg0, %c0_i32, %c0_i32_0 : i32, i32, i32
  }
  func.func @transform_1(%arg0: i32) -> (i32, i32, i32) {
    %c0_i32 = arith.constant 0 : i32
    %c0_i32_0 = arith.constant 0 : i32
    %c0_i32_1 = arith.constant 0 : i32
    return %arg0, %c0_i32, %c0_i32_0 : i32, i32, i32
  }
  func.func @transform_2(%arg0: i32) -> (i32, i32) {
    %c0_i32 = arith.constant 0 : i32
    %c0_i32_0 = arith.constant 0 : i32
    %c0_i32_1 = arith.constant 0 : i32
    return %c0_i32, %c0_i32_0 : i32, i32
  }
  func.func @transform_3(%arg0: i32) -> (i32, i32) {
    %c0_i32 = arith.constant 0 : i32
    %c0_i32_0 = arith.constant 0 : i32
    %c0_i32_1 = arith.constant 0 : i32
    return %c0_i32, %c0_i32_0 : i32, i32
  }
  func.func @transform_4(%arg0: i32) -> (i32, i32, i32, i32) {
    %c0_i32 = arith.constant 0 : i32
    %c0_i32_0 = arith.constant 0 : i32
    %c0_i32_1 = arith.constant 0 : i32
    %c0_i32_2 = arith.constant 0 : i32
    %c0_i32_3 = arith.constant 0 : i32
    return %c0_i32, %c0_i32_0, %c0_i32_1, %c0_i32_2 : i32, i32, i32, i32
  }
  func.func @transform_5(%arg0: i32) -> (i32, i32, i32, i32) {
    %c0_i32 = arith.constant 0 : i32
    %c0_i32_0 = arith.constant 0 : i32
    %c0_i32_1 = arith.constant 0 : i32
    %c0_i32_2 = arith.constant 0 : i32
    %c0_i32_3 = arith.constant 0 : i32
    return %c0_i32, %c0_i32_0, %c0_i32_1, %c0_i32_2 : i32, i32, i32, i32
  }
  func.func @transform_6(%arg0: i32) -> (i32, i32, i32, i32) {
    %c0_i32 = arith.constant 0 : i32
    %c0_i32_0 = arith.constant 0 : i32
    %c0_i32_1 = arith.constant 0 : i32
    %c0_i32_2 = arith.constant 0 : i32
    %c0_i32_3 = arith.constant 0 : i32
    return %c0_i32, %c0_i32_0, %c0_i32_1, %c0_i32_2 : i32, i32, i32, i32
  }
  func.func @transform_7(%arg0: i32) -> (i32, i32, i32) {
    %c0_i32 = arith.constant 0 : i32
    %c0_i32_0 = arith.constant 0 : i32
    %c0_i32_1 = arith.constant 0 : i32
    %c0_i32_2 = arith.constant 0 : i32
    return %c0_i32, %c0_i32_0, %c0_i32_1 : i32, i32, i32
  }
  func.func @transform_8(%arg0: i32) -> (i32, i32, i32) {
    %c0_i32 = arith.constant 0 : i32
    %c0_i32_0 = arith.constant 0 : i32
    %c0_i32_1 = arith.constant 0 : i32
    %c0_i32_2 = arith.constant 0 : i32
    return %c0_i32, %c0_i32_0, %c0_i32_1 : i32, i32, i32
  }
  func.func @transform_9(%arg0: i32) -> (i32, i32, i32) {
    %c0_i32 = arith.constant 0 : i32
    %c0_i32_0 = arith.constant 0 : i32
    %c0_i32_1 = arith.constant 0 : i32
    %c0_i32_2 = arith.constant 0 : i32
    return %c0_i32, %c0_i32_0, %c0_i32_1 : i32, i32, i32
  }
  func.func @transform_10(%arg0: i32) -> (i32, i32, i32) {
    %c0_i32 = arith.constant 0 : i32
    %c0_i32_0 = arith.constant 0 : i32
    %c0_i32_1 = arith.constant 0 : i32
    %c0_i32_2 = arith.constant 0 : i32
    return %c0_i32, %c0_i32_0, %c0_i32_1 : i32, i32, i32
  }
  func.func @transform_11(%arg0: i32) -> (i32, i32, i32) {
    %c0_i32 = arith.constant 0 : i32
    %c0_i32_0 = arith.constant 0 : i32
    %c0_i32_1 = arith.constant 0 : i32
    %c0_i32_2 = arith.constant 0 : i32
    return %c0_i32, %c0_i32_0, %c0_i32_1 : i32, i32, i32
  }
  func.func @transform_12(%arg0: i32) -> (i32, i32, i32) {
    %c0_i32 = arith.constant 0 : i32
    %c0_i32_0 = arith.constant 0 : i32
    %c0_i32_1 = arith.constant 0 : i32
    %c0_i32_2 = arith.constant 0 : i32
    return %c0_i32, %c0_i32_0, %c0_i32_1 : i32, i32, i32
  }
  func.func @transform_13(%arg0: i32) -> (i32, i32, i32) {
    %c0_i32 = arith.constant 0 : i32
    %c0_i32_0 = arith.constant 0 : i32
    %c0_i32_1 = arith.constant 0 : i32
    %c0_i32_2 = arith.constant 0 : i32
    return %c0_i32, %c0_i32_0, %c0_i32_1 : i32, i32, i32
  }
  func.func @transform_14(%arg0: i32) -> (i32, i32, i32) {
    %c0_i32 = arith.constant 0 : i32
    %c0_i32_0 = arith.constant 0 : i32
    %c0_i32_1 = arith.constant 0 : i32
    %c0_i32_2 = arith.constant 0 : i32
    return %c0_i32, %c0_i32_0, %c0_i32_1 : i32, i32, i32
  }
  func.func @transform_15(%arg0: i32) -> (i32, i32, i32) {
    %c0_i32 = arith.constant 0 : i32
    %c0_i32_0 = arith.constant 0 : i32
    %c0_i32_1 = arith.constant 0 : i32
    %c0_i32_2 = arith.constant 0 : i32
    return %c0_i32, %c0_i32_0, %c0_i32_1 : i32, i32, i32
  }
  func.func @transform_16(%arg0: i32) -> (i32, i32, i32) {
    %c0_i32 = arith.constant 0 : i32
    %c0_i32_0 = arith.constant 0 : i32
    %c0_i32_1 = arith.constant 0 : i32
    return %arg0, %c0_i32, %c0_i32_0 : i32, i32, i32
  }
}

module attributes {stable_mosaic.version = 11 : i64} {
  func.func @_resnet_fusion_kernel(%arg0: memref<512x32xf32, #tpu.memory_space<vmem>>, %arg1: memref<2x32xf32, #tpu.memory_space<vmem>>, %arg2: memref<32x16xf32, #tpu.memory_space<vmem>>, %arg3: memref<1x16xf32, #tpu.memory_space<vmem>>, %arg4: memref<144x16xf32, #tpu.memory_space<vmem>>, %arg5: memref<1x16xf32, #tpu.memory_space<vmem>>, %arg6: memref<144x16xf32, #tpu.memory_space<vmem>>, %arg7: memref<1x16xf32, #tpu.memory_space<vmem>>, %arg8: memref<32x64xf32, #tpu.memory_space<vmem>>, %arg9: memref<16x64xf32, #tpu.memory_space<vmem>>, %arg10: memref<1x64xf32, #tpu.memory_space<vmem>>, %arg11: memref<64x128xf32, #tpu.memory_space<vmem>>, %arg12: memref<1x128xf32, #tpu.memory_space<vmem>>, %arg13: memref<2x128xf32, #tpu.memory_space<vmem>>) attributes {dimension_semantics = [], scalar_prefetch = 0 : i64, scratch_operands = 0 : i64, tpu.core_type = #tpu.core_type<tc>} {
    %c0 = arith.constant 0 : index
    %c0_0 = arith.constant 0 : index
    %0 = vector.load %arg0[%c0, %c0_0] : memref<512x32xf32, #tpu.memory_space<vmem>>, vector<512x32xf32>
    %c0_1 = arith.constant 0 : index
    %c0_2 = arith.constant 0 : index
    %1 = vector.load %arg2[%c0_1, %c0_2] : memref<32x16xf32, #tpu.memory_space<vmem>>, vector<32x16xf32>
    %cst = arith.constant dense<0.000000e+00> : vector<512x16xf32>
    %2 = tpu.matmul %0, %1, %cst {dimension_numbers = #tpu.dot_dimension_numbers<[1], [0], [0], [1], [0, 0, 1, 1], [], []>} : vector<512x32xf32>, vector<32x16xf32>, vector<512x16xf32> -> vector<512x16xf32>
    %c0_3 = arith.constant 0 : index
    %c0_4 = arith.constant 0 : index
    %3 = vector.load %arg3[%c0_3, %c0_4] : memref<1x16xf32, #tpu.memory_space<vmem>>, vector<1x16xf32>
    %4 = vector.broadcast %3 : vector<1x16xf32> to vector<512x16xf32>
    %5 = arith.addf %2, %4 : vector<512x16xf32>
    %cst_5 = arith.constant 0.000000e+00 : f32
    %6 = vector.broadcast %cst_5 : f32 to vector<512x16xf32>
    %7 = arith.maximumf %5, %6 : vector<512x16xf32>
    %8 = vector.extract_strided_slice %7 {offsets = [0, 0], sizes = [128, 16], strides = [1, 1]} : vector<512x16xf32> to vector<128x16xf32>
    %9 = vector.extract_strided_slice %7 {offsets = [128, 0], sizes = [128, 16], strides = [1, 1]} : vector<512x16xf32> to vector<128x16xf32>
    %10 = arith.maximumf %8, %9 : vector<128x16xf32>
    %11 = vector.extract_strided_slice %7 {offsets = [256, 0], sizes = [128, 16], strides = [1, 1]} : vector<512x16xf32> to vector<128x16xf32>
    %12 = vector.extract_strided_slice %7 {offsets = [384, 0], sizes = [128, 16], strides = [1, 1]} : vector<512x16xf32> to vector<128x16xf32>
    %13 = arith.maximumf %11, %12 : vector<128x16xf32>
    %14 = arith.maximumf %10, %13 : vector<128x16xf32>
    %15 = vector.shape_cast %14 : vector<128x16xf32> to vector<2x8x8x16xf32>
    %cst_6 = arith.constant 0.000000e+00 : f32
    %16 = vector.broadcast %cst_6 : f32 to vector<2x8x1x16xf32>
    %cst_7 = arith.constant 0.000000e+00 : f32
    %17 = vector.broadcast %cst_7 : f32 to vector<2x1x10x16xf32>
    %18 = tpu.concatenate %16, %15, %16 in 2 : vector<2x8x1x16xf32>, vector<2x8x8x16xf32>, vector<2x8x1x16xf32> -> vector<2x8x10x16xf32>
    %19 = tpu.concatenate %17, %18, %17 in 1 : vector<2x1x10x16xf32>, vector<2x8x10x16xf32>, vector<2x1x10x16xf32> -> vector<2x10x10x16xf32>
    %20 = vector.extract_strided_slice %19 {offsets = [0, 0, 0, 0], sizes = [2, 8, 8, 16], strides = [1, 1, 1, 1]} : vector<2x10x10x16xf32> to vector<2x8x8x16xf32>
    %21 = vector.shape_cast %20 : vector<2x8x8x16xf32> to vector<128x16xf32>
    %c0_8 = arith.constant 0 : index
    %c0_9 = arith.constant 0 : index
    %22 = vector.load %arg4[%c0_8, %c0_9] : memref<144x16xf32, #tpu.memory_space<vmem>>, vector<16x16xf32>
    %cst_10 = arith.constant dense<0.000000e+00> : vector<128x16xf32>
    %23 = tpu.matmul %21, %22, %cst_10 {dimension_numbers = #tpu.dot_dimension_numbers<[1], [0], [0], [1], [0, 0, 1, 1], [], []>} : vector<128x16xf32>, vector<16x16xf32>, vector<128x16xf32> -> vector<128x16xf32>
    %24 = vector.extract_strided_slice %19 {offsets = [0, 0, 1, 0], sizes = [2, 8, 8, 16], strides = [1, 1, 1, 1]} : vector<2x10x10x16xf32> to vector<2x8x8x16xf32>
    %25 = vector.shape_cast %24 : vector<2x8x8x16xf32> to vector<128x16xf32>
    %c16 = arith.constant 16 : index
    %c0_11 = arith.constant 0 : index
    %26 = vector.load %arg4[%c16, %c0_11] : memref<144x16xf32, #tpu.memory_space<vmem>>, vector<16x16xf32>
    %cst_12 = arith.constant dense<0.000000e+00> : vector<128x16xf32>
    %27 = tpu.matmul %25, %26, %cst_12 {dimension_numbers = #tpu.dot_dimension_numbers<[1], [0], [0], [1], [0, 0, 1, 1], [], []>} : vector<128x16xf32>, vector<16x16xf32>, vector<128x16xf32> -> vector<128x16xf32>
    %28 = arith.addf %23, %27 : vector<128x16xf32>
    %29 = vector.extract_strided_slice %19 {offsets = [0, 0, 2, 0], sizes = [2, 8, 8, 16], strides = [1, 1, 1, 1]} : vector<2x10x10x16xf32> to vector<2x8x8x16xf32>
    %30 = vector.shape_cast %29 : vector<2x8x8x16xf32> to vector<128x16xf32>
    %c32 = arith.constant 32 : index
    %c0_13 = arith.constant 0 : index
    %31 = vector.load %arg4[%c32, %c0_13] : memref<144x16xf32, #tpu.memory_space<vmem>>, vector<16x16xf32>
    %cst_14 = arith.constant dense<0.000000e+00> : vector<128x16xf32>
    %32 = tpu.matmul %30, %31, %cst_14 {dimension_numbers = #tpu.dot_dimension_numbers<[1], [0], [0], [1], [0, 0, 1, 1], [], []>} : vector<128x16xf32>, vector<16x16xf32>, vector<128x16xf32> -> vector<128x16xf32>
    %33 = arith.addf %28, %32 : vector<128x16xf32>
    %34 = vector.extract_strided_slice %19 {offsets = [0, 1, 0, 0], sizes = [2, 8, 8, 16], strides = [1, 1, 1, 1]} : vector<2x10x10x16xf32> to vector<2x8x8x16xf32>
    %35 = vector.shape_cast %34 : vector<2x8x8x16xf32> to vector<128x16xf32>
    %c48 = arith.constant 48 : index
    %c0_15 = arith.constant 0 : index
    %36 = vector.load %arg4[%c48, %c0_15] : memref<144x16xf32, #tpu.memory_space<vmem>>, vector<16x16xf32>
    %cst_16 = arith.constant dense<0.000000e+00> : vector<128x16xf32>
    %37 = tpu.matmul %35, %36, %cst_16 {dimension_numbers = #tpu.dot_dimension_numbers<[1], [0], [0], [1], [0, 0, 1, 1], [], []>} : vector<128x16xf32>, vector<16x16xf32>, vector<128x16xf32> -> vector<128x16xf32>
    %38 = arith.addf %33, %37 : vector<128x16xf32>
    %39 = vector.extract_strided_slice %19 {offsets = [0, 1, 1, 0], sizes = [2, 8, 8, 16], strides = [1, 1, 1, 1]} : vector<2x10x10x16xf32> to vector<2x8x8x16xf32>
    %40 = vector.shape_cast %39 : vector<2x8x8x16xf32> to vector<128x16xf32>
    %c64 = arith.constant 64 : index
    %c0_17 = arith.constant 0 : index
    %41 = vector.load %arg4[%c64, %c0_17] : memref<144x16xf32, #tpu.memory_space<vmem>>, vector<16x16xf32>
    %cst_18 = arith.constant dense<0.000000e+00> : vector<128x16xf32>
    %42 = tpu.matmul %40, %41, %cst_18 {dimension_numbers = #tpu.dot_dimension_numbers<[1], [0], [0], [1], [0, 0, 1, 1], [], []>} : vector<128x16xf32>, vector<16x16xf32>, vector<128x16xf32> -> vector<128x16xf32>
    %43 = arith.addf %38, %42 : vector<128x16xf32>
    %44 = vector.extract_strided_slice %19 {offsets = [0, 1, 2, 0], sizes = [2, 8, 8, 16], strides = [1, 1, 1, 1]} : vector<2x10x10x16xf32> to vector<2x8x8x16xf32>
    %45 = vector.shape_cast %44 : vector<2x8x8x16xf32> to vector<128x16xf32>
    %c80 = arith.constant 80 : index
    %c0_19 = arith.constant 0 : index
    %46 = vector.load %arg4[%c80, %c0_19] : memref<144x16xf32, #tpu.memory_space<vmem>>, vector<16x16xf32>
    %cst_20 = arith.constant dense<0.000000e+00> : vector<128x16xf32>
    %47 = tpu.matmul %45, %46, %cst_20 {dimension_numbers = #tpu.dot_dimension_numbers<[1], [0], [0], [1], [0, 0, 1, 1], [], []>} : vector<128x16xf32>, vector<16x16xf32>, vector<128x16xf32> -> vector<128x16xf32>
    %48 = arith.addf %43, %47 : vector<128x16xf32>
    %49 = vector.extract_strided_slice %19 {offsets = [0, 2, 0, 0], sizes = [2, 8, 8, 16], strides = [1, 1, 1, 1]} : vector<2x10x10x16xf32> to vector<2x8x8x16xf32>
    %50 = vector.shape_cast %49 : vector<2x8x8x16xf32> to vector<128x16xf32>
    %c96 = arith.constant 96 : index
    %c0_21 = arith.constant 0 : index
    %51 = vector.load %arg4[%c96, %c0_21] : memref<144x16xf32, #tpu.memory_space<vmem>>, vector<16x16xf32>
    %cst_22 = arith.constant dense<0.000000e+00> : vector<128x16xf32>
    %52 = tpu.matmul %50, %51, %cst_22 {dimension_numbers = #tpu.dot_dimension_numbers<[1], [0], [0], [1], [0, 0, 1, 1], [], []>} : vector<128x16xf32>, vector<16x16xf32>, vector<128x16xf32> -> vector<128x16xf32>
    %53 = arith.addf %48, %52 : vector<128x16xf32>
    %54 = vector.extract_strided_slice %19 {offsets = [0, 2, 1, 0], sizes = [2, 8, 8, 16], strides = [1, 1, 1, 1]} : vector<2x10x10x16xf32> to vector<2x8x8x16xf32>
    %55 = vector.shape_cast %54 : vector<2x8x8x16xf32> to vector<128x16xf32>
    %c112 = arith.constant 112 : index
    %c0_23 = arith.constant 0 : index
    %56 = vector.load %arg4[%c112, %c0_23] : memref<144x16xf32, #tpu.memory_space<vmem>>, vector<16x16xf32>
    %cst_24 = arith.constant dense<0.000000e+00> : vector<128x16xf32>
    %57 = tpu.matmul %55, %56, %cst_24 {dimension_numbers = #tpu.dot_dimension_numbers<[1], [0], [0], [1], [0, 0, 1, 1], [], []>} : vector<128x16xf32>, vector<16x16xf32>, vector<128x16xf32> -> vector<128x16xf32>
    %58 = arith.addf %53, %57 : vector<128x16xf32>
    %59 = vector.extract_strided_slice %19 {offsets = [0, 2, 2, 0], sizes = [2, 8, 8, 16], strides = [1, 1, 1, 1]} : vector<2x10x10x16xf32> to vector<2x8x8x16xf32>
    %60 = vector.shape_cast %59 : vector<2x8x8x16xf32> to vector<128x16xf32>
    %c128 = arith.constant 128 : index
    %c0_25 = arith.constant 0 : index
    %61 = vector.load %arg4[%c128, %c0_25] : memref<144x16xf32, #tpu.memory_space<vmem>>, vector<16x16xf32>
    %cst_26 = arith.constant dense<0.000000e+00> : vector<128x16xf32>
    %62 = tpu.matmul %60, %61, %cst_26 {dimension_numbers = #tpu.dot_dimension_numbers<[1], [0], [0], [1], [0, 0, 1, 1], [], []>} : vector<128x16xf32>, vector<16x16xf32>, vector<128x16xf32> -> vector<128x16xf32>
    %63 = arith.addf %58, %62 : vector<128x16xf32>
    %c0_27 = arith.constant 0 : index
    %c0_28 = arith.constant 0 : index
    %64 = vector.load %arg5[%c0_27, %c0_28] : memref<1x16xf32, #tpu.memory_space<vmem>>, vector<1x16xf32>
    %65 = vector.broadcast %64 : vector<1x16xf32> to vector<128x16xf32>
    %66 = arith.addf %63, %65 : vector<128x16xf32>
    %cst_29 = arith.constant 0.000000e+00 : f32
    %67 = vector.broadcast %cst_29 : f32 to vector<128x16xf32>
    %68 = arith.maximumf %66, %67 : vector<128x16xf32>
    %69 = vector.shape_cast %68 : vector<128x16xf32> to vector<2x8x8x16xf32>
    %cst_30 = arith.constant 0.000000e+00 : f32
    %70 = vector.broadcast %cst_30 : f32 to vector<2x8x1x16xf32>
    %cst_31 = arith.constant 0.000000e+00 : f32
    %71 = vector.broadcast %cst_31 : f32 to vector<2x1x10x16xf32>
    %72 = tpu.concatenate %70, %69, %70 in 2 : vector<2x8x1x16xf32>, vector<2x8x8x16xf32>, vector<2x8x1x16xf32> -> vector<2x8x10x16xf32>
    %73 = tpu.concatenate %71, %72, %71 in 1 : vector<2x1x10x16xf32>, vector<2x8x10x16xf32>, vector<2x1x10x16xf32> -> vector<2x10x10x16xf32>
    %74 = vector.extract_strided_slice %73 {offsets = [0, 0, 0, 0], sizes = [2, 8, 8, 16], strides = [1, 1, 1, 1]} : vector<2x10x10x16xf32> to vector<2x8x8x16xf32>
    %75 = vector.shape_cast %74 : vector<2x8x8x16xf32> to vector<128x16xf32>
    %c0_32 = arith.constant 0 : index
    %c0_33 = arith.constant 0 : index
    %76 = vector.load %arg6[%c0_32, %c0_33] : memref<144x16xf32, #tpu.memory_space<vmem>>, vector<16x16xf32>
    %cst_34 = arith.constant dense<0.000000e+00> : vector<128x16xf32>
    %77 = tpu.matmul %75, %76, %cst_34 {dimension_numbers = #tpu.dot_dimension_numbers<[1], [0], [0], [1], [0, 0, 1, 1], [], []>} : vector<128x16xf32>, vector<16x16xf32>, vector<128x16xf32> -> vector<128x16xf32>
    %78 = vector.extract_strided_slice %73 {offsets = [0, 0, 1, 0], sizes = [2, 8, 8, 16], strides = [1, 1, 1, 1]} : vector<2x10x10x16xf32> to vector<2x8x8x16xf32>
    %79 = vector.shape_cast %78 : vector<2x8x8x16xf32> to vector<128x16xf32>
    %c16_35 = arith.constant 16 : index
    %c0_36 = arith.constant 0 : index
    %80 = vector.load %arg6[%c16_35, %c0_36] : memref<144x16xf32, #tpu.memory_space<vmem>>, vector<16x16xf32>
    %cst_37 = arith.constant dense<0.000000e+00> : vector<128x16xf32>
    %81 = tpu.matmul %79, %80, %cst_37 {dimension_numbers = #tpu.dot_dimension_numbers<[1], [0], [0], [1], [0, 0, 1, 1], [], []>} : vector<128x16xf32>, vector<16x16xf32>, vector<128x16xf32> -> vector<128x16xf32>
    %82 = arith.addf %77, %81 : vector<128x16xf32>
    %83 = vector.extract_strided_slice %73 {offsets = [0, 0, 2, 0], sizes = [2, 8, 8, 16], strides = [1, 1, 1, 1]} : vector<2x10x10x16xf32> to vector<2x8x8x16xf32>
    %84 = vector.shape_cast %83 : vector<2x8x8x16xf32> to vector<128x16xf32>
    %c32_38 = arith.constant 32 : index
    %c0_39 = arith.constant 0 : index
    %85 = vector.load %arg6[%c32_38, %c0_39] : memref<144x16xf32, #tpu.memory_space<vmem>>, vector<16x16xf32>
    %cst_40 = arith.constant dense<0.000000e+00> : vector<128x16xf32>
    %86 = tpu.matmul %84, %85, %cst_40 {dimension_numbers = #tpu.dot_dimension_numbers<[1], [0], [0], [1], [0, 0, 1, 1], [], []>} : vector<128x16xf32>, vector<16x16xf32>, vector<128x16xf32> -> vector<128x16xf32>
    %87 = arith.addf %82, %86 : vector<128x16xf32>
    %88 = vector.extract_strided_slice %73 {offsets = [0, 1, 0, 0], sizes = [2, 8, 8, 16], strides = [1, 1, 1, 1]} : vector<2x10x10x16xf32> to vector<2x8x8x16xf32>
    %89 = vector.shape_cast %88 : vector<2x8x8x16xf32> to vector<128x16xf32>
    %c48_41 = arith.constant 48 : index
    %c0_42 = arith.constant 0 : index
    %90 = vector.load %arg6[%c48_41, %c0_42] : memref<144x16xf32, #tpu.memory_space<vmem>>, vector<16x16xf32>
    %cst_43 = arith.constant dense<0.000000e+00> : vector<128x16xf32>
    %91 = tpu.matmul %89, %90, %cst_43 {dimension_numbers = #tpu.dot_dimension_numbers<[1], [0], [0], [1], [0, 0, 1, 1], [], []>} : vector<128x16xf32>, vector<16x16xf32>, vector<128x16xf32> -> vector<128x16xf32>
    %92 = arith.addf %87, %91 : vector<128x16xf32>
    %93 = vector.extract_strided_slice %73 {offsets = [0, 1, 1, 0], sizes = [2, 8, 8, 16], strides = [1, 1, 1, 1]} : vector<2x10x10x16xf32> to vector<2x8x8x16xf32>
    %94 = vector.shape_cast %93 : vector<2x8x8x16xf32> to vector<128x16xf32>
    %c64_44 = arith.constant 64 : index
    %c0_45 = arith.constant 0 : index
    %95 = vector.load %arg6[%c64_44, %c0_45] : memref<144x16xf32, #tpu.memory_space<vmem>>, vector<16x16xf32>
    %cst_46 = arith.constant dense<0.000000e+00> : vector<128x16xf32>
    %96 = tpu.matmul %94, %95, %cst_46 {dimension_numbers = #tpu.dot_dimension_numbers<[1], [0], [0], [1], [0, 0, 1, 1], [], []>} : vector<128x16xf32>, vector<16x16xf32>, vector<128x16xf32> -> vector<128x16xf32>
    %97 = arith.addf %92, %96 : vector<128x16xf32>
    %98 = vector.extract_strided_slice %73 {offsets = [0, 1, 2, 0], sizes = [2, 8, 8, 16], strides = [1, 1, 1, 1]} : vector<2x10x10x16xf32> to vector<2x8x8x16xf32>
    %99 = vector.shape_cast %98 : vector<2x8x8x16xf32> to vector<128x16xf32>
    %c80_47 = arith.constant 80 : index
    %c0_48 = arith.constant 0 : index
    %100 = vector.load %arg6[%c80_47, %c0_48] : memref<144x16xf32, #tpu.memory_space<vmem>>, vector<16x16xf32>
    %cst_49 = arith.constant dense<0.000000e+00> : vector<128x16xf32>
    %101 = tpu.matmul %99, %100, %cst_49 {dimension_numbers = #tpu.dot_dimension_numbers<[1], [0], [0], [1], [0, 0, 1, 1], [], []>} : vector<128x16xf32>, vector<16x16xf32>, vector<128x16xf32> -> vector<128x16xf32>
    %102 = arith.addf %97, %101 : vector<128x16xf32>
    %103 = vector.extract_strided_slice %73 {offsets = [0, 2, 0, 0], sizes = [2, 8, 8, 16], strides = [1, 1, 1, 1]} : vector<2x10x10x16xf32> to vector<2x8x8x16xf32>
    %104 = vector.shape_cast %103 : vector<2x8x8x16xf32> to vector<128x16xf32>
    %c96_50 = arith.constant 96 : index
    %c0_51 = arith.constant 0 : index
    %105 = vector.load %arg6[%c96_50, %c0_51] : memref<144x16xf32, #tpu.memory_space<vmem>>, vector<16x16xf32>
    %cst_52 = arith.constant dense<0.000000e+00> : vector<128x16xf32>
    %106 = tpu.matmul %104, %105, %cst_52 {dimension_numbers = #tpu.dot_dimension_numbers<[1], [0], [0], [1], [0, 0, 1, 1], [], []>} : vector<128x16xf32>, vector<16x16xf32>, vector<128x16xf32> -> vector<128x16xf32>
    %107 = arith.addf %102, %106 : vector<128x16xf32>
    %108 = vector.extract_strided_slice %73 {offsets = [0, 2, 1, 0], sizes = [2, 8, 8, 16], strides = [1, 1, 1, 1]} : vector<2x10x10x16xf32> to vector<2x8x8x16xf32>
    %109 = vector.shape_cast %108 : vector<2x8x8x16xf32> to vector<128x16xf32>
    %c112_53 = arith.constant 112 : index
    %c0_54 = arith.constant 0 : index
    %110 = vector.load %arg6[%c112_53, %c0_54] : memref<144x16xf32, #tpu.memory_space<vmem>>, vector<16x16xf32>
    %cst_55 = arith.constant dense<0.000000e+00> : vector<128x16xf32>
    %111 = tpu.matmul %109, %110, %cst_55 {dimension_numbers = #tpu.dot_dimension_numbers<[1], [0], [0], [1], [0, 0, 1, 1], [], []>} : vector<128x16xf32>, vector<16x16xf32>, vector<128x16xf32> -> vector<128x16xf32>
    %112 = arith.addf %107, %111 : vector<128x16xf32>
    %113 = vector.extract_strided_slice %73 {offsets = [0, 2, 2, 0], sizes = [2, 8, 8, 16], strides = [1, 1, 1, 1]} : vector<2x10x10x16xf32> to vector<2x8x8x16xf32>
    %114 = vector.shape_cast %113 : vector<2x8x8x16xf32> to vector<128x16xf32>
    %c128_56 = arith.constant 128 : index
    %c0_57 = arith.constant 0 : index
    %115 = vector.load %arg6[%c128_56, %c0_57] : memref<144x16xf32, #tpu.memory_space<vmem>>, vector<16x16xf32>
    %cst_58 = arith.constant dense<0.000000e+00> : vector<128x16xf32>
    %116 = tpu.matmul %114, %115, %cst_58 {dimension_numbers = #tpu.dot_dimension_numbers<[1], [0], [0], [1], [0, 0, 1, 1], [], []>} : vector<128x16xf32>, vector<16x16xf32>, vector<128x16xf32> -> vector<128x16xf32>
    %117 = arith.addf %112, %116 : vector<128x16xf32>
    %c0_59 = arith.constant 0 : index
    %c0_60 = arith.constant 0 : index
    %118 = vector.load %arg7[%c0_59, %c0_60] : memref<1x16xf32, #tpu.memory_space<vmem>>, vector<1x16xf32>
    %119 = vector.broadcast %118 : vector<1x16xf32> to vector<128x16xf32>
    %120 = arith.addf %117, %119 : vector<128x16xf32>
    %121 = arith.addf %120, %14 : vector<128x16xf32>
    %cst_61 = arith.constant 0.000000e+00 : f32
    %122 = vector.broadcast %cst_61 : f32 to vector<128x16xf32>
    %123 = arith.maximumf %121, %122 : vector<128x16xf32>
    %124 = vector.shape_cast %123 : vector<128x16xf32> to vector<2x64x16xf32>
    %cst_62 = arith.constant dense<0.000000e+00> : vector<2x16xf32>
    %125 = vector.multi_reduction <add>, %124, %cst_62 [1] : vector<2x64x16xf32> to vector<2x16xf32>
    %cst_63 = arith.constant 6.400000e+01 : f32
    %126 = vector.broadcast %cst_63 : f32 to vector<2x16xf32>
    %127 = arith.divf %125, %126 : vector<2x16xf32>
    %c0_64 = arith.constant 0 : index
    %c0_65 = arith.constant 0 : index
    %128 = vector.load %arg1[%c0_64, %c0_65] : memref<2x32xf32, #tpu.memory_space<vmem>>, vector<2x32xf32>
    %c0_66 = arith.constant 0 : index
    %c0_67 = arith.constant 0 : index
    %129 = vector.load %arg8[%c0_66, %c0_67] : memref<32x64xf32, #tpu.memory_space<vmem>>, vector<32x64xf32>
    %cst_68 = arith.constant dense<0.000000e+00> : vector<2x64xf32>
    %130 = tpu.matmul %128, %129, %cst_68 {dimension_numbers = #tpu.dot_dimension_numbers<[1], [0], [0], [1], [0, 0, 1, 1], [], []>} : vector<2x32xf32>, vector<32x64xf32>, vector<2x64xf32> -> vector<2x64xf32>
    %c0_69 = arith.constant 0 : index
    %c0_70 = arith.constant 0 : index
    %131 = vector.load %arg9[%c0_69, %c0_70] : memref<16x64xf32, #tpu.memory_space<vmem>>, vector<16x64xf32>
    %cst_71 = arith.constant dense<0.000000e+00> : vector<2x64xf32>
    %132 = tpu.matmul %127, %131, %cst_71 {dimension_numbers = #tpu.dot_dimension_numbers<[1], [0], [0], [1], [0, 0, 1, 1], [], []>} : vector<2x16xf32>, vector<16x64xf32>, vector<2x64xf32> -> vector<2x64xf32>
    %133 = arith.addf %130, %132 : vector<2x64xf32>
    %c0_72 = arith.constant 0 : index
    %c0_73 = arith.constant 0 : index
    %134 = vector.load %arg10[%c0_72, %c0_73] : memref<1x64xf32, #tpu.memory_space<vmem>>, vector<1x64xf32>
    %135 = vector.broadcast %134 : vector<1x64xf32> to vector<2x64xf32>
    %136 = arith.addf %133, %135 : vector<2x64xf32>
    %cst_74 = arith.constant 0.000000e+00 : f32
    %137 = vector.broadcast %cst_74 : f32 to vector<2x64xf32>
    %138 = arith.maximumf %136, %137 : vector<2x64xf32>
    %c0_75 = arith.constant 0 : index
    %c0_76 = arith.constant 0 : index
    %139 = vector.load %arg11[%c0_75, %c0_76] : memref<64x128xf32, #tpu.memory_space<vmem>>, vector<64x128xf32>
    %cst_77 = arith.constant dense<0.000000e+00> : vector<2x128xf32>
    %140 = tpu.matmul %138, %139, %cst_77 {dimension_numbers = #tpu.dot_dimension_numbers<[1], [0], [0], [1], [0, 0, 1, 1], [], []>} : vector<2x64xf32>, vector<64x128xf32>, vector<2x128xf32> -> vector<2x128xf32>
    %c0_78 = arith.constant 0 : index
    %c0_79 = arith.constant 0 : index
    %141 = vector.load %arg12[%c0_78, %c0_79] : memref<1x128xf32, #tpu.memory_space<vmem>>, vector<1x128xf32>
    %142 = vector.broadcast %141 : vector<1x128xf32> to vector<2x128xf32>
    %143 = arith.addf %140, %142 : vector<2x128xf32>
    %c0_80 = arith.constant 0 : index
    %c0_81 = arith.constant 0 : index
    %144 = vector.load %arg13[%c0_80, %c0_81] : memref<2x128xf32, #tpu.memory_space<vmem>>, vector<2x128xf32>
    tpu.vector_store %arg13[%c0_80, %c0_81], %143 {strides = array<i32>} : memref<2x128xf32, #tpu.memory_space<vmem>>, vector<2x128xf32>,
    return
  }
}

</mosaic_0001>

<bundles_post_ra>
// kernel: humanitarian_net_forward.2
= control target key start
LH: loop header
LB: loop body
LE: loop exit
PB: predicated region body
PF: predicated region fallthrough
CT: control target
= control target key end

     0   :  { %s3777_s21 = smov 0   ;;  %s4308_s0 = inlined_call_operand.vmem [shape: f32[2,8,32], index: 0, kind: input, shape index: {}]   ;;  %s4309_s1 = inlined_call_operand.vmem [shape: f32[2,1,8], index: 1, kind: input, shape index: {}]   ;;  %s4310_s2 = inlined_call_operand.vmem [shape: f32[1,32], index: 2, kind: input, shape index: {}]   ;;  %s4311_s3 = inlined_call_operand.vmem [shape: f32[1,32], index: 3, kind: input, shape index: {}]   ;;  %s4312_s4 = inlined_call_operand.vmem [shape: f32[2,6,32,16], index: 4, kind: input, shape index: {}]   ;;  %s4313_s5 = inlined_call_operand.vmem [shape: f32[2,6,1,16], index: 5, kind: input, shape index: {}]   ;;  %s4314_s6 = inlined_call_operand.vmem [shape: f32[2,2,16,32], index: 6, kind: input, shape index: {}]   ;;  %s4315_s7 = inlined_call_operand.vmem [shape: f32[2,1,32], index: 7, kind: input, shape index: {}]   ;;  %s4316_s8 = inlined_call_operand.vmem [shape: f32[2,1,32], index: 8, kind: input, shape index: {}]   ;;  %s4317_s9 = inlined_call_operand.vmem [shape: f32[2,1,32], index: 9, kind: input, shape index: {}]   ;;  %s4318_s10 = inlined_call_operand.vmem [shape: f32[2,32,64], index: 10, kind: input, shape index: {}]   ;;  %s4319_s11 = inlined_call_operand.vmem [shape: f32[2,1,64], index: 11, kind: input, shape index: {}]   ;;  %s4320_s12 = inlined_call_operand.vmem [shape: f32[2,64,32], index: 12, kind: input, shape index: {}]   ;;  %s4321_s13 = inlined_call_operand.vmem [shape: f32[2,1,32], index: 13, kind: input, shape index: {}]   ;;  %s4322_s14 = inlined_call_operand.vmem [shape: f32[2,1,32], index: 14, kind: input, shape index: {}]   ;;  %s4323_s15 = inlined_call_operand.vmem [shape: f32[2,1,32], index: 15, kind: input, shape index: {}]   ;;  %s4324_s16 = inlined_call_operand.vmem [shape: f32[2,1,32], index: 16, kind: output, shape index: {}]  }
   0x1   :  { %4325 = sst [smem:[#allocation2_spill]] %s4308_s0 }
   0x2 LB: > { %s3030_s22 = sadd.s32 4294967295, %s3687_s21   ;;  %p3034_p0 = scmp.ge.s32.totalorder %s3687_s21, 1  ;;  %s3687_s21 = sphi %s3777_s21, %s26_s21  }
   0x3   : > { %p469_p1 = scmp.lt.s32.totalorder %s3687_s21, 3 }
   0x5   : > { %p470_p2 = pnand %p3034_p0, %p469_p1 }
   0x6   : > { %p519_p3 = scmp.lt.s32.totalorder (!%p470_p2), %s3030_s22, 1  ;;  %vm532_vm0 = vcmask (!%p470_p2), 261120   ;;  %s4326_s26 = sld [smem:[#allocation2_spill]] (!%p470_p2)  ;;  %v562_v7 = vld [vmem:[%s4312_s4] sm:$0xff] (!%p470_p2)  ;;  %v563_v8 = vld [vmem:[%s4312_s4 + $0x8] sm:$0xff] (!%p470_p2)  ;;  %v3689_v12 = vmov (!%p470_p2), 0.0|0.0  }
   0x7   : > { %473 = sbr.rel (%p470_p2) target bundleno = 4878 (0x130e), region = 84  ;;  %v566_v9 = vld [vmem:[%s4312_s4 + $0x20] sm:$0xff] (!%p470_p2)  ;;  %v3521_v10 = vpack.c.bf16 (!%p470_p2), %v563_v8, %v562_v7  ;;  %v567_v11 = vld [vmem:[%s4312_s4 + $0x28] sm:$0xff] (!%p470_p2)  ;;  %3520 = vmatprep.subr.bf16.mxu0 (!%p470_p2), %v3689_v12  ;;  %3526 = vmatprep.subr.bf16.mxu1 (!%p470_p2), %v3689_v12  ;;  %v564_v14 = vld [vmem:[%s4312_s4 + $0x10] sm:$0xff] (!%p470_p2)  ;;  %vm3690_vm1 = vmmov (!%p470_p2), 0   ;;  %v3691_v20 = vmov (!%p470_p2), 0.0  }
   0x8   : > { %v3527_v13 = vpack.c.bf16 (!%p470_p2), %v567_v11, %v566_v9  ;;  %v565_v15 = vld [vmem:[%s4312_s4 + $0x18] sm:$0xff] (!%p470_p2)  ;;  %v568_v16 = vld [vmem:[%s4312_s4 + $0x30] sm:$0xff] (!%p470_p2)  ;;  %3268 = vmatprep.mubr.msk.f32.mxu0 (!%p470_p2), %vm3690_vm1, %v3691_v20  ;;  %3279 = vmatprep.mubr.msk.f32.mxu1 (!%p470_p2), %vm3690_vm1, %v3691_v20  ;;  %v3036_v25 = vld [vmem:[%s4310_s2] ss:$0 sm:$0xff] (!%p470_p2)  ;;  %vm1051_vm2 = vcmask (!%p470_p2), 130048   ;;  %vm1214_vm3 = vcmask (!%p470_p2), 64512  }
   0x9   : > { %3522 = vmatpush3.bf16.msra.mxu0 (!%p470_p2), %v3521_v10  ;;  %v3524_v17 = vpack.c.bf16 (!%p470_p2), %v565_v15, %v564_v14  ;;  %v569_v18 = vld [vmem:[%s4312_s4 + $0x38] sm:$0xff] (!%p470_p2)  ;;  %v570_v26 = vld [vmem:[%s4312_s4 + $0x40] sm:$0xff] (!%p470_p2)  ;;  %v571_v28 = vld [vmem:[%s4312_s4 + $0x48] sm:$0xff] (!%p470_p2)  ;;  %v1207_v15 = vlaneseq (!%p470_p2)  ;;  %vm1682_vm4 = vcmask (!%p470_p2), 523264   ;;  %vm2433_vm5 = vcmask (!%p470_p2), 57344  }
   0xa   : > { %3528 = vmatpush3.bf16.msra.mxu1 (!%p470_p2), %v3527_v13  ;;  %3523 = vmatprep.subr.bf16.mxu0 (!%p470_p2), %v3689_v12  ;;  %v3530_v19 = vpack.c.bf16 (!%p470_p2), %v569_v18, %v568_v16  ;;  %v574_v29 = vld [vmem:[%s4312_s4 + $0x60] sm:$0xff] (!%p470_p2)  ;;  %v575_v30 = vld [vmem:[%s4312_s4 + $0x68] sm:$0xff] (!%p470_p2)  ;;  %v3533_v33 = vpack.c.bf16 (!%p470_p2), %v571_v28, %v570_v26  ;;  %v572_v35 = vld [vmem:[%s4312_s4 + $0x50] sm:$0xff] (!%p470_p2)  ;;  %vm2753_vm6 = vcmask (!%p470_p2), 253952  }
   0xb   : > { %3529 = vmatprep.subr.bf16.mxu1 (!%p470_p2), %v3689_v12  ;;  %v3037_v31 = vld [vmem:[%s4311_s3] ss:$0 sm:$0xff] (!%p470_p2)  ;;  %v3539_v34 = vpack.c.bf16 (!%p470_p2), %v575_v30, %v574_v29  ;;  %v573_v37 = vld [vmem:[%s4312_s4 + $0x58] sm:$0xff] (!%p470_p2)  ;;  %v576_v38 = vld [vmem:[%s4312_s4 + $0x70] sm:$0xff] (!%p470_p2)  ;;  %v1208_v16 = vshrl.u32 (!%p470_p2), %v1207_v15, 7 }
   0xc   : > { %v577_v39 = vld [vmem:[%s4312_s4 + $0x78] sm:$0xff] (!%p470_p2)  ;;  %v3536_v40 = vpack.c.bf16 (!%p470_p2), %v573_v37, %v572_v35  ;;  %v578_v42 = vld [vmem:[%s4312_s4 + $0x80] sm:$0xff] (!%p470_p2)  ;;  %v579_v43 = vld [vmem:[%s4312_s4 + $0x88] sm:$0xff] (!%p470_p2) }
   0xd   : > { %3525 = vmatpush3.bf16.msra.mxu0 (!%p470_p2), %v3524_v17  ;;  %v3542_v41 = vpack.c.bf16 (!%p470_p2), %v577_v39, %v576_v38  ;;  %v582_v44 = vld [vmem:[%s4312_s4 + $0xa0] sm:$0xff] (!%p470_p2)  ;;  %v583_v45 = vld [vmem:[%s4312_s4 + $0xa8] sm:$0xff] (!%p470_p2)  ;;  %v3545_v46 = vpack.c.bf16 (!%p470_p2), %v579_v43, %v578_v42  ;;  %v580_v48 = vld [vmem:[%s4312_s4 + $0x90] sm:$0xff] (!%p470_p2)  ;;  %v1209_v17 = vsub.s32 (!%p470_p2), 0, %v1208_v16 }
   0xe   : > { %s4328_s22 = smov (!%p519_p3, %s3030_s22), 1  ;;  %3531 = vmatpush3.bf16.msra.mxu1 %v3530_v19  ;;  %3532 = vmatprep.subr.bf16.mxu0 %v3689_v12  ;;  %v3551_v47 = vpack.c.bf16 %v583_v45, %v582_v44  ;;  %v581_v49 = vld [vmem:[%s4312_s4 + $0x98] sm:$0xff]  ;;  %v584_v50 = vld [vmem:[%s4312_s4 + $0xb0] sm:$0xff]  ;;  %v3040_v58 = vld [vmem:[%s4313_s5 + $0x2] ss:$0 sm:$0xff] }
   0xf   : > { %s3035_s23 = sshll.u32 %s4328_s22, 3  ;;  %3538 = vmatprep.subr.bf16.mxu1 %v3689_v12  ;;  %v585_v51 = vld [vmem:[%s4312_s4 + $0xb8] sm:$0xff]  ;;  %v3548_v52 = vpack.c.bf16 %v581_v49, %v580_v48  ;;  %v3038_v61 = vld [vmem:[%s4313_s5] ss:$0 sm:$0xff]  ;;  %s525_s29 = scalar_lea.vmem %s4309_s1, %s4328_s22  ;;  %v1384_v45 = vld [vmem:[%s4314_s6 + $0x8] sm:$0xff] }
  0x10   : > { %s522_s27 = scalar_lea.vmem %s4326_s26, %s3035_s23  ;;  %v3554_v53 = vpack.c.bf16 %v585_v51, %v584_v50  ;;  %v3949_v18 = vld [vmem:[%s525_s29] sm:$0x1]  ;;  %v1385_v51 = vld [vmem:[%s4314_s6 + $0x10] sm:$0xff]  ;;  %s528_s28 = scalar_lea.vmem %s4324_s16, %s4328_s22 }
  0x11   : > { %v529_v0 = vld [vmem:[%s522_s27] sm:$0xff]  ;;  %v1210_v19 = vrot.slane %v3949_v18, %v1209_v17 }
  0x12   : > { %v533_v1 = vsel %vm532_vm0, %v529_v0, 0.0  ;;  %v1383_v44 = vld [vmem:[%s4314_s6] sm:$0xff] }
  0x13   : > { %534 = vadd.xlane.f32.xlu0 %v533_v1  ;;  %v3041_v1 = vld [vmem:[%s4313_s5 + $0x3] ss:$0 sm:$0xff] }
  0xa0   : > { %v535_v2 = vpop.xlane.xlu0 %534 }
  0xa1   : > { %v537_v3 = vmul.f32 0.03125, %v535_v2 }
  0xa3   : > { %v538_v4 = vsub.f32 %v529_v0, %v537_v3  ;;  %v3039_v3 = vld [vmem:[%s4313_s5 + $0x1] ss:$0 sm:$0xff] }
  0xa5   : > { %v539_v5 = vmul.f32 %v538_v4, %v538_v4 }
  0xa7   : > { %v540_v6 = vsel %vm532_vm0, %v539_v5, 0.0  ;;  %v3042_v5 = vld [vmem:[%s4313_s5 + $0x4] ss:$0 sm:$0xff] }
  0xa8   : > { %541 = vadd.xlane.f32.xlu0 %v540_v6  ;;  %v3043_v6 = vld [vmem:[%s4313_s5 + $0x5] ss:$0 sm:$0xff] }
 0x135   : > { %v542_v21 = vpop.xlane.xlu0 %541 }
 0x136   : > { %v543_v22 = vmul.f32 0.03125, %v542_v21 }
 0x138   : > { %v544_v23 = vadd.f32 1e-12, %v543_v22 }
 0x13a   : > { %3651 = vrsqrt.f32 %v544_v23 }
 0x144   : > { %v3652_v24 = vpop.eup %3651 }
 0x145   : > { %v546_v27 = vmul.f32 %v3652_v24, %v538_v4 }
 0x147   : > { %v553_v32 = vmul.f32 %v3036_v25, %v546_v27 }
 0x149   : > { %v3848_v36 = vadd.f32 %v3037_v31, %v553_v32 }
 0x14b   : > { %3269 = vmatmul.mubr.msk.f32.vlgmr.msra.gmra.mrb[0].mxu0 %vm532_vm0, %v3848_v36  ;;  %3280 = vmatmul.mubr.msk.f32.vlgmr.msra.gmra.mrb[0].mxu1 %vm532_vm0, %v3848_v36 }
 0x14c   : > { %3534 = vmatpush3.bf16.msra.mxu0 %v3533_v33  ;;  %3540 = vmatpush3.bf16.msra.mxu1 %v3539_v34 }
 0x14d   : > { %3535 = vmatprep.subr.bf16.mxu0 %v3689_v12  ;;  %3541 = vmatprep.subr.bf16.mxu1 %v3689_v12 }
 0x14e   : > { %3290 = vmatprep.mubr.msk.f32.mxu0 %vm3690_vm1, %v3691_v20  ;;  %3301 = vmatprep.mubr.msk.f32.mxu1 %vm3690_vm1, %v3691_v20 }
 0x150   : > { %3537 = vmatpush3.bf16.msra.mxu0 %v3536_v40  ;;  %3543 = vmatpush3.bf16.msra.mxu1 %v3542_v41 }
 0x151   : > { %3544 = vmatprep.subr.bf16.mxu0 %v3689_v12  ;;  %3550 = vmatprep.subr.bf16.mxu1 %v3689_v12 }
 0x153   : > { %3291 = vmatmul.mubr.msk.f32.vlgmr.msra.gmra.mrb[2].mxu0 %vm532_vm0, %v3848_v36  ;;  %3302 = vmatmul.mubr.msk.f32.vlgmr.msra.gmra.mrb[2].mxu1 %vm532_vm0, %v3848_v36 }
 0x154   : > { %3546 = vmatpush3.bf16.msra.mxu0 %v3545_v46  ;;  %3552 = vmatpush3.bf16.msra.mxu1 %v3551_v47  ;;  %v3557_v47 = vpack.c.bf16 %v1384_v45, %v1383_v44 }
 0x155   : > { %3547 = vmatprep.subr.bf16.mxu0 %v3689_v12  ;;  %3553 = vmatprep.subr.bf16.mxu1 %v3689_v12 }
 0x156   : > { %3312 = vmatprep.mubr.msk.f32.mxu0 %vm3690_vm1, %v3691_v20  ;;  %3323 = vmatprep.mubr.msk.f32.mxu1 %vm3690_vm1, %v3691_v20 }
 0x158   : > { %3549 = vmatpush3.bf16.msra.mxu0 %v3548_v52  ;;  %3555 = vmatpush3.bf16.msra.mxu1 %v3554_v53  ;;  %v1386_v52 = vld [vmem:[%s4314_s6 + $0x18] sm:$0xff] }
 0x159   : > { %3326 = vmatprep.subr.mxu0 %v3691_v20  ;;  %3341 = vmatprep.subr.mxu1 %v3691_v20  ;;  %v3560_v53 = vpack.c.bf16 %v1386_v52, %v1385_v51 }
 0x15b   : > { %3313 = vmatmul.mubr.msk.f32.vlgmr.msra.gmra.mrb[4].mxu0 %vm532_vm0, %v3848_v36  ;;  %3324 = vmatmul.mubr.msk.f32.vlgmr.msra.gmra.mrb[4].mxu1 %vm532_vm0, %v3848_v36 }
 0x15c   : > { %3328 = vmatprep.mubr.msk.f32.mxu0 %vm3690_vm1, %v3691_v20  ;;  %3343 = vmatprep.mubr.msk.f32.mxu1 %vm3690_vm1, %v3691_v20 }
 0x21e   : > { %v697_v54 = vpop.f32.mrb[0].mxu0  ;;  %v767_v55 = vpop.f32.mrb[0].mxu1 }
 0x21f   : > { %v3270_v56 = vpop.f32.mrb[1].mxu0  ;;  %v3281_v57 = vpop.f32.mrb[1].mxu1  ;;  %v698_v2 = vadd.f32 %v3038_v61, %v697_v54  ;;  %v768_v7 = vadd.f32 %v3039_v3, %v767_v55 }
 0x226   : > { %v837_v59 = vpop.f32.mrb[2].mxu0  ;;  %v907_v60 = vpop.f32.mrb[2].mxu1 }
 0x227   : > { %v838_v62 = vadd.f32 %v3040_v58, %v837_v59  ;;  %v3292_v63 = vpop.f32.mrb[3].mxu0  ;;  %v3303_v0 = vpop.f32.mrb[3].mxu1  ;;  %v908_v4 = vadd.f32 %v3041_v1, %v907_v60 }
 0x228   : > { %v3058_v63 = vld [vmem:[%s4315_s7] ss:$0 sm:$0xff] }
 0x229   : > { %3327 = vmatpush3.xpose.msk.msra.mxu0 %vm1051_vm2, %v838_v62 }
 0x22a   : > { %3331 = vmatprep.subr.mxu0 %v3691_v20 }
 0x22c   : > { %3329 = vmatmul.mubr.msk.f32.vlgmr.msra.gmra.mrb[6].mxu0 %vm1051_vm2, %v698_v2 }
 0x22d   : > { %3332 = vmatpush3.xpose.msk.msra.mxu0 %vm1051_vm2, %v908_v4  ;;  %3333 = vmatprep.mubr.msk.f32.mxu0 %vm3690_vm1, %v3691_v20 }
 0x22e   : > { %v977_v8 = vpop.f32.mrb[4].mxu0  ;;  %v1047_v9 = vpop.f32.mrb[4].mxu1  ;;  %3336 = vmatprep.subr.mxu0 %v3691_v20 }
 0x22f   : > { %v978_v10 = vadd.f32 %v3042_v5, %v977_v8  ;;  %v1048_v11 = vadd.f32 %v3043_v6, %v1047_v9  ;;  %v3314_v13 = vpop.f32.mrb[5].mxu0  ;;  %v3325_v14 = vpop.f32.mrb[5].mxu1 }
 0x230   : > { %3334 = vmatmul.mubr.msk.f32.vlgmr.msra.gmra.mrb[8].mxu0 %vm1051_vm2, %v768_v7  ;;  %v1577_v14 = vld [vmem:[%s4318_s10 + $0x18] sm:$0xff] }
 0x231   : > { %3337 = vmatpush3.msra.mxu0 %v978_v10  ;;  %3342 = vmatpush3.msra.mxu1 %v1048_v11  ;;  %v1574_v10 = vld [vmem:[%s4318_s10] sm:$0xff]  ;;  %v1575_v11 = vld [vmem:[%s4318_s10 + $0x8] sm:$0xff] }
 0x232   : > { %3338 = vmatprep.mubr.msk.f32.mxu0 %vm3690_vm1, %v3691_v20  ;;  %3556 = vmatprep.subr.bf16.mxu0 %v3689_v12  ;;  %v3563_v13 = vpack.c.bf16 %v1575_v11, %v1574_v10  ;;  %v3078_v10 = vld [vmem:[%s4312_s4 + $0x118] sm:$0xff] }
 0x233   : > { %3559 = vmatprep.subr.bf16.mxu1 %v3689_v12 }
 0x2ff   : > { %v1124_v21 = vpop.f32.mrb[6].mxu0 }
 0x300   : > { %v1204_v22 = vmul.f32 0.25, %v1124_v21  ;;  %v3330_v23 = vpop.f32.mrb[7].mxu0 }
 0x302   : > { %v1212_v24 = vadd.f32 %v1210_v19, %v1204_v22  ;;  %v3059_v22 = vld [vmem:[%s4316_s8] ss:$0 sm:$0xff] }
 0x303   : > { %v1200_v25 = vpop.f32.mrb[8].mxu0 }
 0x304   : > { %v1205_v26 = vmul.f32 0.25, %v1200_v25  ;;  %v3335_v27 = vpop.f32.mrb[9].mxu0  ;;  %v1215_v28 = vsel %vm1214_vm3, %v1212_v24, -inf }
 0x305   : > { %1216 = vmax.xlane.f32.xlu1 %v1215_v28  ;;  %v1667_v27 = vld [vmem:[%s4320_s12] sm:$0xff]  ;;  %v1668_v28 = vld [vmem:[%s4320_s12 + $0x8] sm:$0xff] }
 0x306   : > { %v1213_v29 = vadd.f32 %v1210_v19, %v1205_v26 }
 0x308   : > { %v1218_v30 = vsel %vm1214_vm3, %v1213_v29, -inf }
 0x309   : > { %1219 = vmax.xlane.f32.xlu1 %v1218_v30  ;;  %v1669_v30 = vld [vmem:[%s4320_s12 + $0x10] sm:$0xff] }
 0x392   : > { %v1217_v31 = vpop.xlane.xlu1 %1216 }
 0x393   : > { %v1221_v32 = vsub.f32 %v1212_v24, %v1217_v31  ;;  %v3060_v24 = vld [vmem:[%s4317_s9] ss:$0 sm:$0xff]  ;;  %v1670_v31 = vld [vmem:[%s4320_s12 + $0x18] sm:$0xff] }
 0x395   : > { %v1223_v33 = vmul.f32 1.442695, %v1221_v32  ;;  %v3572_v32 = vpack.c.bf16 %v1670_v31, %v1669_v30  ;;  %v3074_v30 = vld [vmem:[%s4312_s4 + $0xf8] sm:$0xff]  ;;  %v3085_v31 = vld [vmem:[%s4312_s4 + $0x150] sm:$0xff] }
 0x396   : > { %v1220_v34 = vpop.xlane.xlu1 %1219 }
 0x397   : > { %3653 = vpow2.f32 %v1223_v33  ;;  %v1222_v35 = vsub.f32 %v1213_v29, %v1220_v34  ;;  %v3569_v29 = vpack.c.bf16 %v1668_v28, %v1667_v27  ;;  %v1671_v33 = vld [vmem:[%s4320_s12 + $0x20] sm:$0xff]  ;;  %v1672_v34 = vld [vmem:[%s4320_s12 + $0x28] sm:$0xff]  ;;  %v3073_v28 = vld [vmem:[%s4312_s4 + $0xf0] sm:$0xff] }
 0x399   : > { %v1225_v37 = vmul.f32 1.442695, %v1222_v35  ;;  %v3575_v35 = vpack.c.bf16 %v1672_v34, %v1671_v33  ;;  %v3590_v33 = vpack.c.bf16 %v3074_v30, %v3073_v28 }
 0x39b   : > { %3655 = vpow2.f32 %v1225_v37  ;;  %v1673_v37 = vld [vmem:[%s4320_s12 + $0x30] sm:$0xff] }
 0x3a1   : > { %v3654_v38 = vpop.eup %3653 }
 0x3a2   : > { %v1227_v39 = vsel %vm1214_vm3, %v3654_v38, 0.0 }
 0x3a3   : > { %1228 = vadd.xlane.f32.xlu0 %v1227_v39 }
 0x3a5   : > { %v3656_v40 = vpop.eup %3655 }
 0x3a6   : > { %v1230_v41 = vsel %vm1214_vm3, %v3656_v40, 0.0 }
 0x3a7   : > { %1231 = vadd.xlane.f32.xlu1 %v1230_v41 }
 0x430   : > { %v1229_v42 = vpop.xlane.xlu0 %1228 }
 0x431   : > { %3657 = vrcp.f32 %v1229_v42 }
 0x434   : > { %v1232_v43 = vpop.xlane.xlu1 %1231 }
 0x435   : > { %3659 = vrcp.f32 %v1232_v43 }
 0x43b   : > { %v3658_v46 = vpop.eup %3657 }
 0x43c   : > { %v1235_v48 = vmul.f32 %v3658_v46, %v3654_v38  ;;  %v1674_v38 = vld [vmem:[%s4320_s12 + $0x38] sm:$0xff] }
 0x43d   : > { %v3578_v39 = vpack.c.bf16 %v1674_v38, %v1673_v37  ;;  %v3080_v37 = vld [vmem:[%s4312_s4 + $0x128] sm:$0xff] }
 0x43e   : > { %3339 = vmatmul.mubr.msk.f32.vlgmr.msra.gmra.mrb[10].mxu0 %vm1214_vm3, %v1235_v48 }
 0x43f   : > { %v3660_v49 = vpop.eup %3659  ;;  %3558 = vmatpush3.bf16.msra.mxu0 %v3557_v47  ;;  %3350 = vmatprep.mubr.msk.f32.mxu0 %vm3690_vm1, %v3691_v20 }
 0x440   : > { %v1236_v50 = vmul.f32 %v3660_v49, %v3656_v40  ;;  %3562 = vmatprep.subr.bf16.mxu0 %v3689_v12  ;;  %v3061_v40 = vld [vmem:[%s4319_s11] ss:$0 sm:$0xff] }
 0x442   : > { %3344 = vmatmul.mubr.msk.f32.vlgmr.msra.gmra.mrb[6].mxu1 %vm1214_vm3, %v1236_v50 }
 0x443   : > { %3357 = vmatprep.mubr.msk.f32.mxu1 %vm3690_vm1, %v3691_v20  ;;  %3561 = vmatpush3.bf16.msra.mxu1 %v3560_v53  ;;  %v3063_v53 = vld [vmem:[%s4321_s13] ss:$0 sm:$0xff] }
 0x444   : > { %3568 = vmatprep.subr.bf16.mxu1 %v3689_v12 }
 0x511   : > { %v1306_v54 = vpop.f32.mrb[10].mxu0 }
 0x512   : > { %v3340_v55 = vpop.f32.mrb[11].mxu0  ;;  %3351 = vmatmul.mubr.msk.f32.vlgmr.msra.gmra.mrb[12].mxu0 %vm1051_vm2, %v1306_v54 }
 0x513   : > { %3368 = vmatprep.mubr.msk.f32.mxu0 %vm3690_vm1, %v3691_v20  ;;  %3564 = vmatpush3.bf16.msra.mxu0 %v3563_v13 }
 0x514   : > { %3565 = vmatprep.subr.bf16.mxu0 %v3689_v12 }
 0x515   : > { %v1379_v56 = vpop.f32.mrb[6].mxu1 }
 0x516   : > { %v3345_v57 = vpop.f32.mrb[7].mxu1  ;;  %3358 = vmatmul.mubr.msk.f32.vlgmr.msra.gmra.mrb[8].mxu1 %vm1051_vm2, %v1379_v56 }
 0x517   : > { %3387 = vmatprep.mubr.msk.f32.mxu1 %vm3690_vm1, %v3691_v20  ;;  %3570 = vmatpush3.bf16.msra.mxu1 %v3569_v29 }
 0x518   : > { %3571 = vmatprep.subr.bf16.mxu1 %v3689_v12 }
 0x51b   : > { %3573 = vmatpush3.bf16.msra.mxu1 %v3572_v32  ;;  %v3086_v32 = vld [vmem:[%s4312_s4 + $0x158] sm:$0xff] }
 0x51c   : > { %3574 = vmatprep.subr.bf16.mxu1 %v3689_v12  ;;  %v3608_v34 = vpack.c.bf16 %v3086_v32, %v3085_v31  ;;  %v3115_v31 = vld [vmem:[%s4314_s6 + $0x20] sm:$0xff]  ;;  %v3116_v32 = vld [vmem:[%s4314_s6 + $0x28] sm:$0xff] }
 0x51f   : > { %3576 = vmatpush3.bf16.msra.mxu1 %v3575_v35  ;;  %v3079_v35 = vld [vmem:[%s4312_s4 + $0x120] sm:$0xff] }
 0x520   : > { %3577 = vmatprep.subr.bf16.mxu1 %v3689_v12  ;;  %v3599_v38 = vpack.c.bf16 %v3080_v37, %v3079_v35 }
 0x523   : > { %3579 = vmatpush3.bf16.msra.mxu1 %v3578_v39  ;;  %v3081_v39 = vld [vmem:[%s4312_s4 + $0x130] sm:$0xff] }
 0x524   : > { %3592 = vmatprep.subr.bf16.mxu1 %v3689_v12 }
 0x5e5   : > { %v1456_v58 = vpop.f32.mrb[12].mxu0 }
 0x5e6   : > { %v3352_v59 = vpop.f32.mrb[13].mxu0  ;;  %v1533_v61 = vsel %vm532_vm0, %v1456_v58, 0.0 }
 0x5e9   : > { %v1529_v60 = vpop.f32.mrb[8].mxu1 }
 0x5ea   : > { %v1534_v62 = vsel %vm532_vm0, %v1529_v60, 0.0  ;;  %v3359_v0 = vpop.f32.mrb[9].mxu1 }
 0x5eb   : > { %v1535_v1 = vadd.f32 %v1534_v62, %v1533_v61  ;;  %v3067_v0 = vld [vmem:[%s4312_s4 + $0xc0] sm:$0xff] }
 0x5ed   : > { %v1543_v2 = vadd.f32 %v3058_v63, %v1535_v1  ;;  %v3068_v1 = vld [vmem:[%s4312_s4 + $0xc8] sm:$0xff] }
 0x5ef   : > { %v1544_v3 = vadd.f32 %v1543_v2, %v3848_v36  ;;  %v1576_v36 = vld [vmem:[%s4318_s10 + $0x10] sm:$0xff]  ;;  %v3075_v2 = vld [vmem:[%s4312_s4 + $0x100] sm:$0xff] }
 0x5f0   : > { %v3566_v15 = vpack.c.bf16 %v1577_v14, %v1576_v36 }
 0x5f1   : > { %v1547_v4 = vsel %vm532_vm0, %v1544_v3, 0.0 }
 0x5f2   : > { %1548 = vadd.xlane.f32.xlu0 %v1547_v4  ;;  %3567 = vmatpush3.bf16.msra.mxu0 %v3566_v15  ;;  %v3076_v4 = vld [vmem:[%s4312_s4 + $0x108] sm:$0xff] }
 0x5f3   : > { %3580 = vmatprep.subr.bf16.mxu0 %v3689_v12 }
 0x67f   : > { %v1549_v5 = vpop.xlane.xlu0 %1548 }
 0x680   : > { %v1550_v6 = vmul.f32 0.03125, %v1549_v5  ;;  %v3593_v5 = vpack.c.bf16 %v3076_v4, %v3075_v2  ;;  %v3102_v4 = vld [vmem:[%s4313_s5 + $0xb] ss:$0 sm:$0xff] }
 0x682   : > { %v1551_v7 = vsub.f32 %v1544_v3, %v1550_v6  ;;  %v3581_v3 = vpack.c.bf16 %v3068_v1, %v3067_v0  ;;  %v3069_v6 = vld [vmem:[%s4312_s4 + $0xd0] sm:$0xff]  ;;  %v3098_v0 = vld [vmem:[%s4313_s5 + $0x7] ss:$0 sm:$0xff] }
 0x684   : > { %v1552_v8 = vmul.f32 %v1551_v7, %v1551_v7 }
 0x686   : > { %v1553_v9 = vsel %vm532_vm0, %v1552_v8, 0.0  ;;  %v3077_v8 = vld [vmem:[%s4312_s4 + $0x110] sm:$0xff] }
 0x687   : > { %1554 = vadd.xlane.f32.xlu1 %v1553_v9  ;;  %v3596_v11 = vpack.c.bf16 %v3078_v10, %v3077_v8 }
 0x714   : > { %v1555_v16 = vpop.xlane.xlu1 %1554 }
 0x715   : > { %v1556_v17 = vmul.f32 0.03125, %v1555_v16  ;;  %v3065_v16 = vld [vmem:[%s4322_s14] ss:$0 sm:$0xff] }
 0x717   : > { %v1557_v19 = vadd.f32 1e-12, %v1556_v17  ;;  %v3071_v17 = vld [vmem:[%s4312_s4 + $0xe0] sm:$0xff] }
 0x719   : > { %3661 = vrsqrt.f32 %v1557_v19 }
 0x723   : > { %v3662_v21 = vpop.eup %3661 }
 0x724   : > { %v1559_v23 = vmul.f32 %v3662_v21, %v1551_v7  ;;  %v3070_v7 = vld [vmem:[%s4312_s4 + $0xd8] sm:$0xff]  ;;  %v3072_v21 = vld [vmem:[%s4312_s4 + $0xe8] sm:$0xff] }
 0x725   : > { %v3584_v9 = vpack.c.bf16 %v3070_v7, %v3069_v6 }
 0x726   : > { %v1566_v25 = vmul.f32 %v3059_v22, %v1559_v23  ;;  %v3083_v22 = vld [vmem:[%s4312_s4 + $0x140] sm:$0xff]  ;;  %v3084_v23 = vld [vmem:[%s4312_s4 + $0x148] sm:$0xff] }
 0x727   : > { %v3605_v27 = vpack.c.bf16 %v3084_v23, %v3083_v22 }
 0x728   : > { %v1573_v26 = vadd.f32 %v3060_v24, %v1566_v25  ;;  %v3066_v24 = vld [vmem:[%s4323_s15] ss:$0 sm:$0xff] }
 0x72a   : > { %3369 = vmatmul.mubr.msk.f32.vlgmr.msra.gmra.mrb[14].mxu0 %vm532_vm0, %v1573_v26 }
 0x72b   : > { %3398 = vmatprep.mubr.msk.f32.mxu0 %vm3690_vm1, %v3691_v20  ;;  %3582 = vmatpush3.bf16.msra.mxu0 %v3581_v3 }
 0x72c   : > { %3583 = vmatprep.subr.bf16.mxu0 %v3689_v12 }
 0x72f   : > { %3585 = vmatpush3.bf16.msra.mxu0 %v3584_v9 }
 0x730   : > { %3586 = vmatprep.subr.bf16.mxu0 %v3689_v12 }
 0x7fd   : > { %v1654_v41 = vpop.f32.mrb[14].mxu0 }
 0x7fe   : > { %v1655_v42 = vadd.f32 %v3061_v40, %v1654_v41  ;;  %v3370_v43 = vpop.f32.mrb[15].mxu0  ;;  %v3082_v40 = vld [vmem:[%s4312_s4 + $0x138] sm:$0xff] }
 0x7ff   : > { %v3602_v41 = vpack.c.bf16 %v3082_v40, %v3081_v39  ;;  %v3088_v43 = vld [vmem:[%s4312_s4 + $0x168] sm:$0xff]  ;;  %v3117_v40 = vld [vmem:[%s4314_s6 + $0x30] sm:$0xff] }
 0x800   : > { %v1659_v44 = vmul.f32 0.044715, %v1655_v42  ;;  %v1658_v50 = vmul.f32 0.5, %v1655_v42 }
 0x802   : > { %v1660_v45 = vmul.f32 %v1659_v44, %v1655_v42 }
 0x804   : > { %v1661_v46 = vmul.f32 %v1660_v45, %v1655_v42  ;;  %v3089_v45 = vld [vmem:[%s4312_s4 + $0x170] sm:$0xff] }
 0x806   : > { %v1662_v47 = vadd.f32 %v1661_v46, %v1655_v42  ;;  %v3087_v42 = vld [vmem:[%s4312_s4 + $0x160] sm:$0xff]  ;;  %v3090_v46 = vld [vmem:[%s4312_s4 + $0x178] sm:$0xff] }
 0x807   : > { %v3611_v44 = vpack.c.bf16 %v3088_v43, %v3087_v42 }
 0x808   : > { %v1663_v48 = vmul.f32 0.7978846, %v1662_v47  ;;  %v3614_v47 = vpack.c.bf16 %v3090_v46, %v3089_v45 }
 0x80a   : > { %3663 = vtanh.f32 %v1663_v48  ;;  %v3099_v48 = vld [vmem:[%s4313_s5 + $0x8] ss:$0 sm:$0xff] }
 0x814   : > { %v3664_v49 = vpop.eup %3663 }
 0x815   : > { %v1665_v51 = vadd.f32 1.0, %v3664_v49 }
 0x817   : > { %v1666_v52 = vmul.f32 %v1665_v51, %v1658_v50  ;;  %v3097_v51 = vld [vmem:[%s4313_s5 + $0x6] ss:$0 sm:$0xff] }
 0x819   : > { %3388 = vmatmul.mubr.msk.f32.vlgmr.msra.gmra.mrb[10].mxu1 %vm1682_vm4, %v1666_v52 }
 0x81a   : > { %3420 = vmatprep.mubr.msk.f32.mxu1 %vm3690_vm1, %v3691_v20  ;;  %3594 = vmatpush3.bf16.msra.mxu1 %v3593_v5 }
 0x81b   : > { %3595 = vmatprep.subr.bf16.mxu1 %v3689_v12 }
 0x81e   : > { %3597 = vmatpush3.bf16.msra.mxu1 %v3596_v11 }
 0x81f   : > { %3604 = vmatprep.subr.bf16.mxu1 %v3689_v12 }
 0x8ec   : > { %v1752_v54 = vpop.f32.mrb[10].mxu1 }
 0x8ed   : > { %v1753_v55 = vadd.f32 %v3063_v53, %v1752_v54  ;;  %v3389_v56 = vpop.f32.mrb[11].mxu1 }
 0x8ee   : > { %v3101_v56 = vld [vmem:[%s4313_s5 + $0xa] ss:$0 sm:$0xff] }
 0x8ef   : > { %v1756_v57 = vadd.f32 %v1753_v55, %v1573_v26  ;;  %v3587_v26 = vpack.c.bf16 %v3072_v21, %v3071_v17 }
 0x8f1   : > { %v1759_v58 = vsel %vm532_vm0, %v1756_v57, 0.0 }
 0x8f2   : > { %1760 = vadd.xlane.f32.xlu0 %v1759_v58 }
 0x97f   : > { %v1761_v59 = vpop.xlane.xlu0 %1760 }
 0x980   : > { %v1762_v60 = vmul.f32 0.03125, %v1761_v59 }
 0x982   : > { %v1763_v61 = vsub.f32 %v1756_v57, %v1762_v60 }
 0x984   : > { %v1764_v62 = vmul.f32 %v1763_v61, %v1763_v61 }
 0x986   : > { %v1765_v63 = vsel %vm532_vm0, %v1764_v62, 0.0  ;;  %v3100_v62 = vld [vmem:[%s4313_s5 + $0x9] ss:$0 sm:$0xff] }
 0x987   : > { %1766 = vadd.xlane.f32.xlu1 %v1765_v63 }
 0xa14   : > { %v1767_v13 = vpop.xlane.xlu1 %1766 }
 0xa15   : > { %v1768_v36 = vmul.f32 0.03125, %v1767_v13 }
 0xa17   : > { %v1769_v14 = vadd.f32 1e-12, %v1768_v36 }
 0xa19   : > { %3665 = vrsqrt.f32 %v1769_v14 }
 0xa23   : > { %v3666_v15 = vpop.eup %3665 }
 0xa24   : > { %v1771_v19 = vmul.f32 %v3666_v15, %v1763_v61 }
 0xa26   : > { %v1778_v25 = vmul.f32 %v3065_v16, %v1771_v19 }
 0xa28   : > { %v4101_v29 = vadd.f32 %v3066_v24, %v1778_v25 }
 0xa2a   : > { %3399 = vmatmul.mubr.msk.f32.vlgmr.msra.gmra.mrb[16].mxu0 %vm532_vm0, %v4101_v29  ;;  %3421 = vmatmul.mubr.msk.f32.vlgmr.msra.gmra.mrb[12].mxu1 %vm532_vm0, %v4101_v29 }
 0xa2b   : > { %3588 = vmatpush3.bf16.msra.mxu0 %v3587_v26  ;;  %3606 = vmatpush3.bf16.msra.mxu1 %v3605_v27 }
 0xa2c   : > { %3589 = vmatprep.subr.bf16.mxu0 %v3689_v12  ;;  %3607 = vmatprep.subr.bf16.mxu1 %v3689_v12 }
 0xa2d   : > { %3409 = vmatprep.mubr.msk.f32.mxu0 %vm3690_vm1, %v3691_v20  ;;  %3442 = vmatprep.mubr.msk.f32.mxu1 %vm3690_vm1, %v3691_v20 }
 0xa2f   : > { %3591 = vmatpush3.bf16.msra.mxu0 %v3590_v33  ;;  %3609 = vmatpush3.bf16.msra.mxu1 %v3608_v34  ;;  %v3617_v34 = vpack.c.bf16 %v3116_v32, %v3115_v31 }
 0xa30   : > { %3598 = vmatprep.subr.bf16.mxu0 %v3689_v12  ;;  %3456 = vmatprep.subr.mxu1 %v3691_v20 }
 0xa32   : > { %3410 = vmatmul.mubr.msk.f32.vlgmr.msra.gmra.mrb[18].mxu0 %vm532_vm0, %v4101_v29  ;;  %3443 = vmatmul.mubr.msk.f32.vlgmr.msra.gmra.mrb[14].mxu1 %vm532_vm0, %v4101_v29 }
 0xa33   : > { %3600 = vmatpush3.bf16.msra.mxu0 %v3599_v38  ;;  %3431 = vmatprep.mubr.msk.f32.mxu0 %vm3690_vm1, %v3691_v20 }
 0xa34   : > { %3601 = vmatprep.subr.bf16.mxu0 %v3689_v12  ;;  %3458 = vmatprep.mubr.msk.f32.mxu1 %vm3690_vm1, %v3691_v20 }
 0xa37   : > { %3603 = vmatpush3.bf16.msra.mxu0 %v3602_v41  ;;  %v3118_v41 = vld [vmem:[%s4314_s6 + $0x38] sm:$0xff] }
 0xa38   : > { %3610 = vmatprep.subr.bf16.mxu0 %v3689_v12  ;;  %v3620_v42 = vpack.c.bf16 %v3118_v41, %v3117_v40 }
 0xa3a   : > { %3432 = vmatmul.mubr.msk.f32.vlgmr.msra.gmra.mrb[20].mxu0 %vm532_vm0, %v4101_v29 }
 0xa3b   : > { %3612 = vmatpush3.bf16.msra.mxu0 %v3611_v44  ;;  %3453 = vmatprep.mubr.msk.f32.mxu0 %vm3690_vm1, %v3691_v20 }
 0xa3c   : > { %3613 = vmatprep.subr.bf16.mxu0 %v3689_v12 }
 0xa3f   : > { %3615 = vmatpush3.bf16.msra.mxu0 %v3614_v47 }
 0xa40   : > { %3466 = vmatprep.subr.mxu0 %v3691_v20 }
 0xa42   : > { %3454 = vmatmul.mubr.msk.f32.vlgmr.msra.gmra.mrb[22].mxu0 %vm532_vm0, %v4101_v29 }
 0xa43   : > { %3468 = vmatprep.mubr.msk.f32.mxu0 %vm3690_vm1, %v3691_v20 }
 0xafd   : > { %v1923_v49 = vpop.f32.mrb[16].mxu0  ;;  %v2063_v50 = vpop.f32.mrb[12].mxu1 }
 0xafe   : > { %v2064_v52 = vadd.f32 %v3099_v48, %v2063_v50  ;;  %v3400_v53 = vpop.f32.mrb[17].mxu0  ;;  %v3422_v54 = vpop.f32.mrb[13].mxu1  ;;  %v1924_v55 = vadd.f32 %v3097_v51, %v1923_v49 }
 0xb00   : > { %3457 = vmatpush3.xpose.msk.msra.mxu1 %vm1051_vm2, %v2064_v52  ;;  %v3121_v52 = vld [vmem:[%s4315_s7 + $0x1] sm:$0x1] }
 0xb01   : > { %3461 = vmatprep.subr.mxu1 %v3691_v20 }
 0xb03   : > { %3459 = vmatmul.mubr.msk.f32.vlgmr.msra.gmra.mrb[16].mxu1 %vm1051_vm2, %v1924_v55 }
 0xb04   : > { %3463 = vmatprep.mubr.msk.f32.mxu1 %vm3690_vm1, %v3691_v20 }
 0xb05   : > { %v1993_v57 = vpop.f32.mrb[18].mxu0  ;;  %v2203_v58 = vpop.f32.mrb[14].mxu1 }
 0xb06   : > { %v2204_v59 = vadd.f32 %v3101_v56, %v2203_v58  ;;  %v3411_v60 = vpop.f32.mrb[19].mxu0  ;;  %v3444_v61 = vpop.f32.mrb[15].mxu1  ;;  %v1994_v3 = vadd.f32 %v3098_v0, %v1993_v57 }
 0xb08   : > { %3467 = vmatpush3.msra.mxu0 %v2204_v59 }
 0xb09   : > { %3616 = vmatprep.subr.bf16.mxu0 %v3689_v12 }
 0xb0d   : > { %v2133_v63 = vpop.f32.mrb[20].mxu0 }
 0xb0e   : > { %v2134_v1 = vadd.f32 %v3100_v62, %v2133_v63  ;;  %v3433_v2 = vpop.f32.mrb[21].mxu0  ;;  %v3124_v62 = vld [vmem:[%s4318_s10 + $0x20] sm:$0xff]  ;;  %v3125_v63 = vld [vmem:[%s4318_s10 + $0x28] sm:$0xff] }
 0xb0f   : > { %v3623_v0 = vpack.c.bf16 %v3125_v63, %v3124_v62 }
 0xb10   : > { %3462 = vmatpush3.xpose.msk.msra.mxu1 %vm1051_vm2, %v2134_v1  ;;  %v3127_v1 = vld [vmem:[%s4318_s10 + $0x38] sm:$0xff] }
 0xb11   : > { %3471 = vmatprep.subr.mxu1 %v3691_v20 }
 0xb13   : > { %3464 = vmatmul.mubr.msk.f32.vlgmr.msra.gmra.mrb[18].mxu1 %vm1051_vm2, %v1994_v3 }
 0xb14   : > { %3473 = vmatprep.mubr.msk.f32.mxu1 %vm3690_vm1, %v3691_v20 }
 0xb15   : > { %v2273_v5 = vpop.f32.mrb[22].mxu0 }
 0xb16   : > { %v2274_v6 = vadd.f32 %v3102_v4, %v2273_v5  ;;  %v3455_v7 = vpop.f32.mrb[23].mxu0 }
 0xb17   : > { %v3122_v7 = vld [vmem:[%s4316_s8 + $0x1] sm:$0x1] }
 0xb18   : > { %3472 = vmatpush3.msra.mxu1 %v2274_v6 }
 0xb19   : > { %3619 = vmatprep.subr.bf16.mxu1 %v3689_v12 }
 0xbd6   : > { %v2349_v8 = vpop.f32.mrb[16].mxu1 }
 0xbd7   : > { %v2429_v9 = vmul.f32 0.25, %v2349_v8  ;;  %v3460_v10 = vpop.f32.mrb[17].mxu1 }
 0xbd9   : > { %v2431_v11 = vadd.f32 %v2429_v9, %v3949_v18  ;;  %v3123_v9 = vld [vmem:[%s4317_s9 + $0x1] sm:$0x1] }
 0xbdb   : > { %v2434_v13 = vsel %vm2433_vm5, %v2431_v11, -inf }
 0xbdc   : > { %2435 = vmax.xlane.f32.xlu0 %v2434_v13  ;;  %v3130_v13 = vld [vmem:[%s4320_s12 + $0x40] sm:$0xff] }
 0xbe6   : > { %v2425_v36 = vpop.f32.mrb[18].mxu1 }
 0xbe7   : > { %v2430_v14 = vmul.f32 0.25, %v2425_v36  ;;  %v3465_v15 = vpop.f32.mrb[19].mxu1  ;;  %v3131_v36 = vld [vmem:[%s4320_s12 + $0x48] sm:$0xff] }
 0xbe8   : > { %v3132_v15 = vld [vmem:[%s4320_s12 + $0x50] sm:$0xff] }
 0xbe9   : > { %v2432_v16 = vadd.f32 %v2430_v14, %v3949_v18  ;;  %v3629_v14 = vpack.c.bf16 %v3131_v36, %v3130_v13 }
 0xbeb   : > { %v2437_v17 = vsel %vm2433_vm5, %v2432_v16, -inf }
 0xbec   : > { %2438 = vmax.xlane.f32.xlu1 %v2437_v17 }
 0xc69   : > { %v2436_v19 = vpop.xlane.xlu0 %2435 }
 0xc6a   : > { %v2440_v21 = vsub.f32 %v2431_v11, %v2436_v19  ;;  %v3134_v19 = vld [vmem:[%s4320_s12 + $0x60] sm:$0xff] }
 0xc6c   : > { %v2442_v22 = vmul.f32 1.442695, %v2440_v21  ;;  %v3135_v21 = vld [vmem:[%s4320_s12 + $0x68] sm:$0xff] }
 0xc6e   : > { %3667 = vpow2.f32 %v2442_v22  ;;  %v3635_v22 = vpack.c.bf16 %v3135_v21, %v3134_v19 }
 0xc78   : > { %v3668_v23 = vpop.eup %3667 }
 0xc79   : > { %v2439_v24 = vpop.xlane.xlu1 %2438  ;;  %v2446_v25 = vsel %vm2433_vm5, %v3668_v23, 0.0 }
 0xc7a   : > { %v2441_v26 = vsub.f32 %v2432_v16, %v2439_v24  ;;  %2447 = vadd.xlane.f32.xlu0 %v2446_v25  ;;  %v3133_v16 = vld [vmem:[%s4320_s12 + $0x58] sm:$0xff] }
 0xc7b   : > { %v3632_v17 = vpack.c.bf16 %v3133_v16, %v3132_v15  ;;  %v3137_v24 = vld [vmem:[%s4320_s12 + $0x78] sm:$0xff] }
 0xc7c   : > { %v2444_v27 = vmul.f32 1.442695, %v2441_v26  ;;  %v3128_v26 = vld [vmem:[%s4319_s11 + $0x1] sm:$0x1] }
 0xc7e   : > { %3669 = vpow2.f32 %v2444_v27 }
 0xc88   : > { %v3670_v28 = vpop.eup %3669 }
 0xc89   : > { %v2449_v30 = vsel %vm2433_vm5, %v3670_v28, 0.0 }
 0xc8a   : > { %2450 = vadd.xlane.f32.xlu1 %v2449_v30 }
 0xd07   : > { %v2448_v18 = vpop.xlane.xlu0 %2447 }
 0xd08   : > { %3671 = vrcp.f32 %v2448_v18 }
 0xd12   : > { %v3672_v33 = vpop.eup %3671 }
 0xd13   : > { %v2454_v35 = vmul.f32 %v3672_v33, %v3668_v23  ;;  %v3136_v23 = vld [vmem:[%s4320_s12 + $0x70] sm:$0xff] }
 0xd14   : > { %v3638_v25 = vpack.c.bf16 %v3137_v24, %v3136_v23 }
 0xd15   : > { %3469 = vmatmul.mubr.msk.f32.vlgmr.msra.gmra.mrb[24].mxu0 %vm1214_vm3, %v2454_v35 }
 0xd16   : > { %3618 = vmatpush3.bf16.msra.mxu0 %v3617_v34  ;;  %3480 = vmatprep.mubr.msk.f32.mxu0 %vm3690_vm1, %v3691_v20 }
 0xd17   : > { %v2451_v37 = vpop.xlane.xlu1 %2450  ;;  %3622 = vmatprep.subr.bf16.mxu0 %v3689_v12 }
 0xd18   : > { %3673 = vrcp.f32 %v2451_v37 }
 0xd22   : > { %v3674_v38 = vpop.eup %3673 }
 0xd23   : > { %v2455_v39 = vmul.f32 %v3674_v38, %v3670_v28 }
 0xd25   : > { %3474 = vmatmul.mubr.msk.f32.vlgmr.msra.gmra.mrb[20].mxu1 %vm1214_vm3, %v2455_v39 }
 0xd26   : > { %3487 = vmatprep.mubr.msk.f32.mxu1 %vm3690_vm1, %v3691_v20  ;;  %3621 = vmatpush3.bf16.msra.mxu1 %v3620_v42 }
 0xd27   : > { %3628 = vmatprep.subr.bf16.mxu1 %v3689_v12 }
 0xde8   : > { %v2525_v43 = vpop.f32.mrb[24].mxu0 }
 0xde9   : > { %v3470_v44 = vpop.f32.mrb[25].mxu0  ;;  %3481 = vmatmul.mubr.msk.f32.vlgmr.msra.gmra.mrb[26].mxu0 %vm1051_vm2, %v2525_v43 }
 0xdea   : > { %3498 = vmatprep.mubr.msk.f32.mxu0 %vm3690_vm1, %v3691_v20  ;;  %3624 = vmatpush3.bf16.msra.mxu0 %v3623_v0 }
 0xdeb   : > { %3625 = vmatprep.subr.bf16.mxu0 %v3689_v12 }
 0xdf8   : > { %v2598_v45 = vpop.f32.mrb[20].mxu1 }
 0xdf9   : > { %v3475_v46 = vpop.f32.mrb[21].mxu1  ;;  %3488 = vmatmul.mubr.msk.f32.vlgmr.msra.gmra.mrb[22].mxu1 %vm1051_vm2, %v2598_v45 }
 0xdfa   : > { %3517 = vmatprep.mubr.msk.f32.mxu1 %vm3690_vm1, %v3691_v20  ;;  %3630 = vmatpush3.bf16.msra.mxu1 %v3629_v14 }
 0xdfb   : > { %3631 = vmatprep.subr.bf16.mxu1 %v3689_v12 }
 0xdfe   : > { %3633 = vmatpush3.bf16.msra.mxu1 %v3632_v17 }
 0xdff   : > { %3634 = vmatprep.subr.bf16.mxu1 %v3689_v12 }
 0xe02   : > { %3636 = vmatpush3.bf16.msra.mxu1 %v3635_v22 }
 0xe03   : > { %3637 = vmatprep.subr.bf16.mxu1 %v3689_v12  ;;  %v3138_v12 = vld [vmem:[%s4321_s13 + $0x1] sm:$0x1] }
 0xe06   : > { %3639 = vmatpush3.bf16.msra.mxu1 %v3638_v25 }
 0xebc   : > { %v2676_v47 = vpop.f32.mrb[26].mxu0 }
 0xebd   : > { %v3482_v48 = vpop.f32.mrb[27].mxu0  ;;  %v2754_v50 = vsel %vm2753_vm6, %v2676_v47, 0.0 }
 0xecc   : > { %v2749_v49 = vpop.f32.mrb[22].mxu1 }
 0xecd   : > { %v2755_v51 = vsel %vm2753_vm6, %v2749_v49, 0.0  ;;  %v3489_v53 = vpop.f32.mrb[23].mxu1 }
 0xece   : > { %v2756_v54 = vadd.f32 %v2755_v51, %v2754_v50 }
 0xed0   : > { %v2759_v55 = vadd.f32 %v3121_v52, %v2756_v54  ;;  %v3140_v54 = vld [vmem:[%s4322_s14 + $0x1] sm:$0x1] }
 0xed2   : > { %v2760_v56 = vadd.f32 %v2759_v55, %v4101_v29  ;;  %v3126_v29 = vld [vmem:[%s4318_s10 + $0x30] sm:$0xff] }
 0xed3   : > { %v3626_v2 = vpack.c.bf16 %v3127_v1, %v3126_v29 }
 0xed4   : > { %v2765_v57 = vsel %vm2753_vm6, %v2760_v56, 0.0 }
 0xed5   : > { %2766 = vadd.xlane.f32.xlu0 %v2765_v57  ;;  %3627 = vmatpush3.bf16.msra.mxu0 %v3626_v2 }
 0xf62   : > { %v2767_v20 = vpop.xlane.xlu0 %2766 }
 0xf63   : > { %v2768_v58 = vmul.f32 0.03125, %v2767_v20 }
 0xf65   : > { %v2769_v59 = vsub.f32 %v2760_v56, %v2768_v58  ;;  %v3141_v56 = vld [vmem:[%s4323_s15 + $0x1] sm:$0x1] }
 0xf67   : > { %v2770_v60 = vmul.f32 %v2769_v59, %v2769_v59 }
 0xf69   : > { %v2771_v61 = vsel %vm2753_vm6, %v2770_v60, 0.0 }
 0xf6a   : > { %2772 = vadd.xlane.f32.xlu1 %v2771_v61 }
 0xff7   : > { %v2773_v3 = vpop.xlane.xlu1 %2772 }
 0xff8   : > { %v2774_v4 = vmul.f32 0.03125, %v2773_v3 }
 0xffa   : > { %v2775_v5 = vadd.f32 1e-12, %v2774_v4 }
 0xffc   : > { %3675 = vrsqrt.f32 %v2775_v5 }
0x1006   : > { %v3676_v6 = vpop.eup %3675 }
0x1007   : > { %v2777_v8 = vmul.f32 %v3676_v6, %v2769_v59 }
0x1009   : > { %v2778_v10 = vmul.f32 %v3122_v7, %v2777_v8 }
0x100b   : > { %v2779_v11 = vadd.f32 %v3123_v9, %v2778_v10 }
0x100d   : > { %3499 = vmatmul.mubr.msk.f32.vlgmr.msra.gmra.mrb[28].mxu0 %vm532_vm0, %v2779_v11 }
0x10e0   : > { %v2856_v27 = vpop.f32.mrb[28].mxu0 }
0x10e1   : > { %v2857_v28 = vadd.f32 %v3128_v26, %v2856_v27  ;;  %v3500_v30 = vpop.f32.mrb[29].mxu0 }
0x10e3   : > { %v2861_v18 = vmul.f32 0.044715, %v2857_v28  ;;  %v2860_v37 = vmul.f32 0.5, %v2857_v28 }
0x10e5   : > { %v2862_v31 = vmul.f32 %v2861_v18, %v2857_v28 }
0x10e7   : > { %v2863_v32 = vmul.f32 %v2862_v31, %v2857_v28 }
0x10e9   : > { %v2864_v33 = vadd.f32 %v2863_v32, %v2857_v28 }
0x10eb   : > { %v2865_v34 = vmul.f32 0.7978846, %v2864_v33 }
0x10ed   : > { %3677 = vtanh.f32 %v2865_v34 }
0x10f7   : > { %v3678_v35 = vpop.eup %3677 }
0x10f8   : > { %v2867_v38 = vadd.f32 1.0, %v3678_v35 }
0x10fa   : > { %v2868_v39 = vmul.f32 %v2867_v38, %v2860_v37 }
0x10fc   : > { %3518 = vmatmul.mubr.msk.f32.vlgmr.msra.gmra.mrb[24].mxu1 %vm1682_vm4, %v2868_v39 }
0x11cf   : > { %v2949_v40 = vpop.f32.mrb[24].mxu1 }
0x11d0   : > { %v2950_v41 = vadd.f32 %v3138_v12, %v2949_v40  ;;  %v3519_v42 = vpop.f32.mrb[25].mxu1 }
0x11d2   : > { %v2953_v43 = vadd.f32 %v2950_v41, %v2779_v11 }
0x11d4   : > { %v2958_v44 = vsel %vm2753_vm6, %v2953_v43, 0.0 }
0x11d5   : > { %2959 = vadd.xlane.f32.xlu0 %v2958_v44 }
0x1262   : > { %v2960_v45 = vpop.xlane.xlu0 %2959 }
0x1263   : > { %v2961_v46 = vmul.f32 0.03125, %v2960_v45 }
0x1265   : > { %v2962_v47 = vsub.f32 %v2953_v43, %v2961_v46 }
0x1267   : > { %v2963_v48 = vmul.f32 %v2962_v47, %v2962_v47 }
0x1269   : > { %v2964_v49 = vsel %vm2753_vm6, %v2963_v48, 0.0 }
0x126a   : > { %2965 = vadd.xlane.f32.xlu1 %v2964_v49 }
0x12f7   : > { %v2966_v50 = vpop.xlane.xlu1 %2965 }
0x12f8   : > { %v2967_v51 = vmul.f32 0.03125, %v2966_v50 }
0x12fa   : > { %v2968_v52 = vadd.f32 1e-12, %v2967_v51 }
0x12fc   : > { %3679 = vrsqrt.f32 %v2968_v52 }
0x1306   : > { %v3680_v53 = vpop.eup %3679 }
0x1307   : > { %v2970_v55 = vmul.f32 %v3680_v53, %v2962_v47 }
0x1309   : > { %v2971_v57 = vmul.f32 %v3140_v54, %v2970_v55 }
0x130b   : > { %v2972_v20 = vadd.f32 %v3141_v56, %v2971_v57 }
0x130d   : > { %2973 = vst.msk [vmem:[%s528_s28] sm:$0x1] %vm2753_vm6, %v2972_v20 }
0x130e PF: > { %s26_s21 = sadd.s32 1, %s3687_s21  }
0x130f   : > { %p23_p4 = scmp.ge.s32.totalorder %s26_s21, 4  }
0x1311   :  { %25 = sbr.rel (!%p23_p4) target bundleno = 2 (0x2), region = 129 }

// kernel: humanitarian_net_forward.3
= control target key start
LH: loop header
LB: loop body
LE: loop exit
PB: predicated region body
PF: predicated region fallthrough
CT: control target
= control target key end

     0   :  { %vm120_vm0 = vcmask 261120   ;;  %s8422_s0 = inlined_call_operand.vmem [shape: f32[512,32], index: 0, kind: input, shape index: {}]   ;;  %s8423_s1 = inlined_call_operand.vmem [shape: f32[2,32], index: 1, kind: input, shape index: {}]   ;;  %s8424_s2 = inlined_call_operand.vmem [shape: f32[32,16], index: 2, kind: input, shape index: {}]   ;;  %s8425_s3 = inlined_call_operand.vmem [shape: f32[1,16], index: 3, kind: input, shape index: {}]   ;;  %s8426_s4 = inlined_call_operand.vmem [shape: f32[144,16], index: 4, kind: input, shape index: {}]   ;;  %s8427_s5 = inlined_call_operand.vmem [shape: f32[1,16], index: 5, kind: input, shape index: {}]   ;;  %s8428_s6 = inlined_call_operand.vmem [shape: f32[144,16], index: 6, kind: input, shape index: {}]   ;;  %s8429_s7 = inlined_call_operand.vmem [shape: f32[1,16], index: 7, kind: input, shape index: {}]   ;;  %s8430_s8 = inlined_call_operand.vmem [shape: f32[32,64], index: 8, kind: input, shape index: {}]   ;;  %s8431_s9 = inlined_call_operand.vmem [shape: f32[16,64], index: 9, kind: input, shape index: {}]   ;;  %s8432_s10 = inlined_call_operand.vmem [shape: f32[1,64], index: 10, kind: input, shape index: {}]   ;;  %s8433_s11 = inlined_call_operand.vmem [shape: f32[64,128], index: 11, kind: input, shape index: {}]   ;;  %s8434_s12 = inlined_call_operand.vmem [shape: f32[1,128], index: 12, kind: input, shape index: {}]   ;;  %s8435_s13 = inlined_call_operand.hbm [shape: f32[2,128], index: 13, kind: output, shape index: {}]  }
   0x1   :  { %v109_v0 = vld [vmem:[%s8424_s2] sm:$0xff]  ;;  %v110_v1 = vld [vmem:[%s8424_s2 + $0x8] sm:$0xff]  ;;  %v111_v2 = vld [vmem:[%s8424_s2 + $0x10] sm:$0xff] }
   0x2   :  { %v6117_v3 = vpack.c.bf16 %v110_v1, %v109_v0  ;;  %v112_v4 = vld [vmem:[%s8424_s2 + $0x18] sm:$0xff]  ;;  %v45_v5 = vld [vmem:[%s8422_s0] sm:$0xff]  ;;  %v46_v8 = vld [vmem:[%s8422_s0 + $0x8] sm:$0xff] }
   0x3   :  { %v6121_v6 = vpack.c.bf16 %v112_v4, %v111_v2  ;;  %5480 = vmatprep.mubr.msk.f32.mxu0 %vm120_vm0, %v45_v5  ;;  %v85_v7 = vld [vmem:[%s8422_s0 + $0x140] sm:$0xff]  ;;  %v86_v9 = vld [vmem:[%s8422_s0 + $0x148] sm:$0xff]  ;;  %v47_v10 = vld [vmem:[%s8422_s0 + $0x10] sm:$0xff] }
   0x4   :  { %6118 = vmatprep.subr.bf16.mxu0 %v6117_v3  ;;  %6218 = vmatprep.subr.bf16.mxu1 %v6117_v3  ;;  %v87_v11 = vld [vmem:[%s8422_s0 + $0x150] sm:$0xff]  ;;  %v48_v12 = vld [vmem:[%s8422_s0 + $0x18] sm:$0xff]  ;;  %v49_v14 = vld [vmem:[%s8422_s0 + $0x20] sm:$0xff] }
   0x5   :  { %6120 = vmatpush3.bf16.msra.mxu0 %v6117_v3  ;;  %6220 = vmatpush3.bf16.msra.mxu1 %v6117_v3  ;;  %v88_v13 = vld [vmem:[%s8422_s0 + $0x158] sm:$0xff]  ;;  %v89_v15 = vld [vmem:[%s8422_s0 + $0x160] sm:$0xff]  ;;  %v50_v16 = vld [vmem:[%s8422_s0 + $0x28] sm:$0xff] }
   0x6   :  { %6122 = vmatprep.subr.bf16.mxu0 %v6121_v6  ;;  %6219 = vmatprep.subr.bf16.mxu1 %v6121_v6  ;;  %v90_v17 = vld [vmem:[%s8422_s0 + $0x168] sm:$0xff]  ;;  %v51_v18 = vld [vmem:[%s8422_s0 + $0x30] sm:$0xff]  ;;  %v52_v20 = vld [vmem:[%s8422_s0 + $0x38] sm:$0xff] }
   0x7   :  { %5540 = vmatprep.mubr.msk.f32.mxu1 %vm120_vm0, %v85_v7  ;;  %v91_v19 = vld [vmem:[%s8422_s0 + $0x170] sm:$0xff]  ;;  %v92_v21 = vld [vmem:[%s8422_s0 + $0x178] sm:$0xff]  ;;  %v53_v22 = vld [vmem:[%s8422_s0 + $0x40] sm:$0xff] }
   0x8   :  { %v93_v23 = vld [vmem:[%s8422_s0 + $0x180] sm:$0xff] }
   0x9   :  { %6124 = vmatpush3.bf16.msra.mxu0 %v6121_v6  ;;  %6221 = vmatpush3.bf16.msra.mxu1 %v6121_v6 }
   0xc   :  { %5481 = vmatmul.mubr.msk.f32.vlgmr.msra.gmra.mrb[0].mxu0 %vm120_vm0, %v46_v8  ;;  %5541 = vmatmul.mubr.msk.f32.vlgmr.msra.gmra.mrb[0].mxu1 %vm120_vm0, %v86_v9 }
   0xd   :  { %5483 = vmatprep.mubr.msk.f32.mxu0 %vm120_vm0, %v47_v10  ;;  %5543 = vmatprep.mubr.msk.f32.mxu1 %vm120_vm0, %v87_v11 }
  0x10   :  { %5484 = vmatmul.mubr.msk.f32.gmra.mrb[2].mxu0 %vm120_vm0, %v48_v12  ;;  %5544 = vmatmul.mubr.msk.f32.gmra.mrb[2].mxu1 %vm120_vm0, %v88_v13 }
  0x11   :  { %5486 = vmatprep.mubr.msk.f32.mxu0 %vm120_vm0, %v49_v14  ;;  %5546 = vmatprep.mubr.msk.f32.mxu1 %vm120_vm0, %v89_v15 }
  0x14   :  { %5487 = vmatmul.mubr.msk.f32.gmra.mrb[4].mxu0 %vm120_vm0, %v50_v16  ;;  %5547 = vmatmul.mubr.msk.f32.gmra.mrb[4].mxu1 %vm120_vm0, %v90_v17 }
  0x15   :  { %5489 = vmatprep.mubr.msk.f32.mxu0 %vm120_vm0, %v51_v18  ;;  %5549 = vmatprep.mubr.msk.f32.mxu1 %vm120_vm0, %v91_v19 }
  0x16   :  { %18 = vsyncpa [#allocation3], 0  ;;  %v54_v24 = vld [vmem:[%s8422_s0 + $0x48] sm:$0xff]  ;;  %v55_v26 = vld [vmem:[%s8422_s0 + $0x50] sm:$0xff]  ;;  %v8436_v9 = vmov 0.0   ;;  %vm969_vm1 = vcmask 130048  }
  0x17   :  { %v94_v25 = vld [vmem:[%s8422_s0 + $0x188] sm:$0xff]  ;;  %v95_v27 = vld [vmem:[%s8422_s0 + $0x190] sm:$0xff]  ;;  %v56_v28 = vld [vmem:[%s8422_s0 + $0x58] sm:$0xff]  ;;  %v6855_v10 = vrot.slane %v8436_v9, 1  ;;  %vm858_vm2 = vcmask 1040384   ;;  %vm922_vm3 = vcmask 1046528  }
  0x18   :  { %5490 = vmatmul.mubr.msk.f32.gmra.mrb[6].mxu0 %vm120_vm0, %v52_v20  ;;  %5550 = vmatmul.mubr.msk.f32.gmra.mrb[6].mxu1 %vm120_vm0, %v92_v21  ;;  %v96_v29 = vld [vmem:[%s8422_s0 + $0x198] sm:$0xff]  ;;  %v57_v30 = vld [vmem:[%s8422_s0 + $0x60] sm:$0xff]  ;;  %v58_v32 = vld [vmem:[%s8422_s0 + $0x68] sm:$0xff]  ;;  %vm1320_vm4 = vcmask 1045504   ;;  %vm6508_vm5 = vmmov 0   ;;  %vm4451_vm6 = vcmask 1041409  }
  0x19   :  { %5492 = vmatprep.mubr.msk.f32.mxu0 %vm120_vm0, %v53_v22  ;;  %5552 = vmatprep.mubr.msk.f32.mxu1 %vm120_vm0, %v93_v23  ;;  %v97_v31 = vld [vmem:[%s8422_s0 + $0x1a0] sm:$0xff]  ;;  %v98_v33 = vld [vmem:[%s8422_s0 + $0x1a8] sm:$0xff]  ;;  %v59_v34 = vld [vmem:[%s8422_s0 + $0x70] sm:$0xff]  ;;  %vm4622_vm7 = vcmask 523264   ;;  %s6509_s15 = smov [#allocation2]  }
  0x1a   :  { %v99_v35 = vld [vmem:[%s8422_s0 + $0x1b0] sm:$0xff]  ;;  %v60_v36 = vld [vmem:[%s8422_s0 + $0x78] sm:$0xff]  ;;  %v61_v38 = vld [vmem:[%s8422_s0 + $0x80] sm:$0xff]  ;;  %s4703_s16 = sshll.u32 %s6509_s15, 4  ;;  %s4704_s16 = int_to_ptr.vmem [resolvable:$true] %s4703_s16 }
  0x1b   :  { %v100_v37 = vld [vmem:[%s8422_s0 + $0x1b8] sm:$0xff]  ;;  %v101_v39 = vld [vmem:[%s8422_s0 + $0x1c0] sm:$0xff]  ;;  %v62_v40 = vld [vmem:[%s8422_s0 + $0x88] sm:$0xff]  ;;  %s6482_s17 = scalar_lea.vmem %s4704_s16, 32  ;;  %p6487_p1 = scmp.lt.s32.totalorder %s4704_s16, %s4704_s16 }
  0x1c   :  { %5493 = vmatmul.mubr.msk.f32.gmra.mrb[8].mxu0 %vm120_vm0, %v54_v24  ;;  %5553 = vmatmul.mubr.msk.f32.gmra.mrb[8].mxu1 %vm120_vm0, %v94_v25  ;;  %v102_v41 = vld [vmem:[%s8422_s0 + $0x1c8] sm:$0xff]  ;;  %v63_v42 = vld [vmem:[%s8422_s0 + $0x90] sm:$0xff]  ;;  %v64_v44 = vld [vmem:[%s8422_s0 + $0x98] sm:$0xff]  ;;  %p6483_p0 = scmp.ne.s32.totalorder %s4704_s16, %s6482_s17  ;;  %p6488_p2 = scmp.lt.s32.totalorder %s6482_s17, %s6482_s17 }
  0x1d   :  { %5495 = vmatprep.mubr.msk.f32.mxu0 %vm120_vm0, %v55_v26  ;;  %5555 = vmatprep.mubr.msk.f32.mxu1 %vm120_vm0, %v95_v27  ;;  %v103_v43 = vld [vmem:[%s8422_s0 + $0x1d0] sm:$0xff]  ;;  %v104_v45 = vld [vmem:[%s8422_s0 + $0x1d8] sm:$0xff]  ;;  %v65_v46 = vld [vmem:[%s8422_s0 + $0xa0] sm:$0xff] }
  0x1e   :  { %v105_v47 = vld [vmem:[%s8422_s0 + $0x1e0] sm:$0xff]  ;;  %v66_v48 = vld [vmem:[%s8422_s0 + $0xa8] sm:$0xff]  ;;  %v67_v50 = vld [vmem:[%s8422_s0 + $0xb0] sm:$0xff]  ;;  %p6489_p3 = por %p6488_p2, %p6487_p1 }
  0x1f   :  { %v106_v49 = vld [vmem:[%s8422_s0 + $0x1e8] sm:$0xff]  ;;  %v107_v51 = vld [vmem:[%s8422_s0 + $0x1f0] sm:$0xff]  ;;  %v68_v52 = vld [vmem:[%s8422_s0 + $0xb8] sm:$0xff] }
  0x20   :  { %5496 = vmatmul.mubr.msk.f32.gmra.mrb[10].mxu0 %vm120_vm0, %v56_v28  ;;  %5556 = vmatmul.mubr.msk.f32.gmra.mrb[10].mxu1 %vm120_vm0, %v96_v29  ;;  %v108_v53 = vld [vmem:[%s8422_s0 + $0x1f8] sm:$0xff]  ;;  %v69_v54 = vld [vmem:[%s8422_s0 + $0xc0] sm:$0xff]  ;;  %v70_v55 = vld [vmem:[%s8422_s0 + $0xc8] sm:$0xff]  ;;  %p6490_p4 = pnand %p6489_p3, %p6483_p0 }
  0x21   :  { %5498 = vmatprep.mubr.msk.f32.mxu0 %vm120_vm0, %v57_v30  ;;  %5558 = vmatprep.mubr.msk.f32.mxu1 %vm120_vm0, %v97_v31  ;;  %v71_v56 = vld [vmem:[%s8422_s0 + $0xd0] sm:$0xff]  ;;  %v72_v57 = vld [vmem:[%s8422_s0 + $0xd8] sm:$0xff]  ;;  %v73_v58 = vld [vmem:[%s8422_s0 + $0xe0] sm:$0xff] }
  0x22   :  { %v74_v59 = vld [vmem:[%s8422_s0 + $0xe8] sm:$0xff]  ;;  %v75_v60 = vld [vmem:[%s8422_s0 + $0xf0] sm:$0xff]  ;;  %v76_v61 = vld [vmem:[%s8422_s0 + $0xf8] sm:$0xff] }
  0x23   :  { %v77_v62 = vld [vmem:[%s8422_s0 + $0x100] sm:$0xff]  ;;  %v78_v63 = vld [vmem:[%s8422_s0 + $0x108] sm:$0xff]  ;;  %v79_v0 = vld [vmem:[%s8422_s0 + $0x110] sm:$0xff] }
  0x24   :  { %5499 = vmatmul.mubr.msk.f32.gmra.mrb[12].mxu0 %vm120_vm0, %v58_v32  ;;  %5559 = vmatmul.mubr.msk.f32.gmra.mrb[12].mxu1 %vm120_vm0, %v98_v33  ;;  %v80_v1 = vld [vmem:[%s8422_s0 + $0x118] sm:$0xff]  ;;  %v81_v2 = vld [vmem:[%s8422_s0 + $0x120] sm:$0xff]  ;;  %v82_v3 = vld [vmem:[%s8422_s0 + $0x128] sm:$0xff] }
  0x25   :  { %5501 = vmatprep.mubr.msk.f32.mxu0 %vm120_vm0, %v59_v34  ;;  %5561 = vmatprep.mubr.msk.f32.mxu1 %vm120_vm0, %v99_v35  ;;  %v83_v4 = vld [vmem:[%s8422_s0 + $0x130] sm:$0xff]  ;;  %v84_v5 = vld [vmem:[%s8422_s0 + $0x138] sm:$0xff]  ;;  %v891_v11 = vld [vmem:[%s8426_s4] sm:$0xff] }
  0x26   :  { %v967_v6 = vld [vmem:[%s8426_s4 + $0x10] sm:$0xff]  ;;  %v968_v7 = vld [vmem:[%s8426_s4 + $0x18] sm:$0xff]  ;;  %v892_v12 = vld [vmem:[%s8426_s4 + $0x8] sm:$0xff] }
  0x27   :  { %v6125_v8 = vpack.c.bf16 %v968_v7, %v967_v6  ;;  %v6867_v13 = vpack.c.bf16 %v892_v12, %v891_v11 }
  0x28   :  { %5502 = vmatmul.mubr.msk.f32.gmra.mrb[14].mxu0 %vm120_vm0, %v60_v36  ;;  %5562 = vmatmul.mubr.msk.f32.gmra.mrb[14].mxu1 %vm120_vm0, %v100_v37 }
  0x29   :  { %5504 = vmatprep.mubr.msk.f32.mxu0 %vm120_vm0, %v61_v38  ;;  %5564 = vmatprep.mubr.msk.f32.mxu1 %vm120_vm0, %v101_v39  ;;  %v6897_v38 = vld [vmem:[%s8425_s3] ss:$0 sm:$0xff] }
  0x2a   :  { %6126 = vmatprep.subr.bf16.mxu1 %v6125_v8 }
  0x2b   :  { %6128 = vmatpush3.bf16.msra.mxu1 %v6125_v8 }
  0x2c   :  { %5505 = vmatmul.mubr.msk.f32.gmra.mrb[16].mxu0 %vm120_vm0, %v62_v40  ;;  %5565 = vmatmul.mubr.msk.f32.gmra.mrb[16].mxu1 %vm120_vm0, %v102_v41 }
  0x2d   :  { %5507 = vmatprep.mubr.msk.f32.mxu0 %vm120_vm0, %v63_v42  ;;  %5567 = vmatprep.mubr.msk.f32.mxu1 %vm120_vm0, %v103_v43 }
  0x2e   :  { %6130 = vmatprep.subr.bf16.mxu1 %v6867_v13 }
  0x30   :  { %5508 = vmatmul.mubr.msk.f32.gmra.mrb[18].mxu0 %vm120_vm0, %v64_v44  ;;  %5568 = vmatmul.mubr.msk.f32.gmra.mrb[18].mxu1 %vm120_vm0, %v104_v45 }
  0x31   :  { %5510 = vmatprep.mubr.msk.f32.mxu0 %vm120_vm0, %v65_v46  ;;  %5570 = vmatprep.mubr.msk.f32.mxu1 %vm120_vm0, %v105_v47 }
  0x34   :  { %5511 = vmatmul.mubr.msk.f32.gmra.mrb[20].mxu0 %vm120_vm0, %v66_v48  ;;  %5571 = vmatmul.mubr.msk.f32.gmra.mrb[20].mxu1 %vm120_vm0, %v106_v49 }
  0x35   :  { %5513 = vmatprep.mubr.msk.f32.mxu0 %vm120_vm0, %v67_v50  ;;  %5573 = vmatprep.mubr.msk.f32.mxu1 %vm120_vm0, %v107_v51 }
  0x38   :  { %5514 = vmatmul.mubr.msk.f32.gmra.mrb[22].mxu0 %vm120_vm0, %v68_v52  ;;  %5574 = vmatmul.mubr.msk.f32.gmra.mrb[22].mxu1 %vm120_vm0, %v108_v53 }
  0x39   :  { %5516 = vmatprep.mubr.msk.f32.mxu0 %vm120_vm0, %v69_v54  ;;  %5580 = vmatprep.mubr.msk.f32.mxu1 %vm969_vm1, %v6855_v10 }
  0x3c   :  { %5517 = vmatmul.mubr.msk.f32.gmra.mrb[24].mxu0 %vm120_vm0, %v70_v55 }
  0x3d   :  { %5519 = vmatprep.mubr.msk.f32.mxu0 %vm120_vm0, %v71_v56 }
  0x40   :  { %5520 = vmatmul.mubr.msk.f32.gmra.mrb[26].mxu0 %vm120_vm0, %v72_v57 }
  0x41   :  { %5522 = vmatprep.mubr.msk.f32.mxu0 %vm120_vm0, %v73_v58 }
  0x44   :  { %5523 = vmatmul.mubr.msk.f32.gmra.mrb[28].mxu0 %vm120_vm0, %v74_v59 }
  0x45   :  { %5525 = vmatprep.mubr.msk.f32.mxu0 %vm120_vm0, %v75_v60 }
  0x48   :  { %5526 = vmatmul.mubr.msk.f32.gmra.mrb[30].mxu0 %vm120_vm0, %v76_v61 }
  0x49   :  { %5528 = vmatprep.mubr.msk.f32.mxu0 %vm120_vm0, %v77_v62 }
  0x4c   :  { %5529 = vmatmul.mubr.msk.f32.gmra.mrb[32].mxu0 %vm120_vm0, %v78_v63 }
  0x4d   :  { %5531 = vmatprep.mubr.msk.f32.mxu0 %vm120_vm0, %v79_v0 }
  0x50   :  { %5532 = vmatmul.mubr.msk.f32.gmra.mrb[34].mxu0 %vm120_vm0, %v80_v1 }
  0x51   :  { %5534 = vmatprep.mubr.msk.f32.mxu0 %vm120_vm0, %v81_v2 }
  0x54   :  { %5535 = vmatmul.mubr.msk.f32.gmra.mrb[36].mxu0 %vm120_vm0, %v82_v3 }
  0x55   :  { %5537 = vmatprep.mubr.msk.f32.mxu0 %vm120_vm0, %v83_v4 }
  0x58   :  { %5538 = vmatmul.mubr.msk.f32.gmra.mrb[38].mxu0 %vm120_vm0, %v84_v5 }
  0x59   :  { %5832 = vmatprep.mubr.msk.f32.mxu0 %vm969_vm1, %v6855_v10 }
  0xdf   :  { %v5482_v14 = vpop.f32.mrb[0].mxu0  ;;  %v5542_v15 = vpop.f32.mrb[0].mxu1 }
  0xe0   :  { %v379_v16 = vpop.f32.mrb[1].mxu0  ;;  %v579_v17 = vpop.f32.mrb[1].mxu1  ;;  %v385_v43 = vadd.f32 %v5482_v14, %v6897_v38  ;;  %v585_v44 = vadd.f32 %v5542_v15, %v6897_v38 }
  0xe1   :  { %v380_v45 = vadd.f32 %v6897_v38, %v379_v16  ;;  %v580_v47 = vadd.f32 %v6897_v38, %v579_v17 }
  0xe2   :  { %v699_v55 = vmax.f32 %v385_v43, 0.0  ;;  %v739_v56 = vmax.f32 %v585_v44, 0.0 }
  0xe3   :  { %v5485_v18 = vpop.f32.mrb[2].mxu0  ;;  %v5545_v19 = vpop.f32.mrb[2].mxu1  ;;  %v698_v57 = vmax.f32 %v380_v45, 0.0  ;;  %v738_v60 = vmax.f32 %v580_v47, 0.0 }
  0xe4   :  { %v389_v20 = vpop.f32.mrb[3].mxu0  ;;  %v589_v21 = vpop.f32.mrb[3].mxu1  ;;  %v395_v49 = vadd.f32 %v5485_v18, %v6897_v38  ;;  %v595_v51 = vadd.f32 %v5545_v19, %v6897_v38 }
  0xe5   :  { %v390_v53 = vadd.f32 %v6897_v38, %v389_v20  ;;  %v590_v54 = vadd.f32 %v6897_v38, %v589_v21 }
  0xe6   :  { %v701_v63 = vmax.f32 %v395_v49, 0.0  ;;  %v741_v2 = vmax.f32 %v595_v51, 0.0 }
  0xe7   :  { %v5488_v22 = vpop.f32.mrb[4].mxu0  ;;  %v5548_v23 = vpop.f32.mrb[4].mxu1  ;;  %v700_v5 = vmax.f32 %v390_v53, 0.0  ;;  %v740_v7 = vmax.f32 %v590_v54, 0.0 }
  0xe8   :  { %v399_v24 = vpop.f32.mrb[5].mxu0  ;;  %v599_v25 = vpop.f32.mrb[5].mxu1  ;;  %v6924_v58 = vadd.f32 %v5488_v22, %v6897_v38  ;;  %v6927_v61 = vadd.f32 %v5548_v23, %v6897_v38 }
  0xe9   :  { %v400_v11 = vadd.f32 %v6897_v38, %v399_v24  ;;  %v600_v14 = vadd.f32 %v6897_v38, %v599_v25 }
  0xea   :  { %v703_v16 = vmax.f32 %v6924_v58, 0.0  ;;  %v743_v18 = vmax.f32 %v6927_v61, 0.0 }
  0xeb   :  { %v6870_v26 = vpop.f32.mrb[6].mxu0  ;;  %v6872_v27 = vpop.f32.mrb[6].mxu1  ;;  %v702_v53 = vmax.f32 %v400_v11, 0.0 }
  0xec   :  { %v6874_v28 = vpop.f32.mrb[7].mxu0  ;;  %v6876_v29 = vpop.f32.mrb[7].mxu1 }
  0xed   :  { %v610_v61 = vadd.f32 %v6897_v38, %v6876_v29 }
  0xef   :  { %v6878_v30 = vpop.f32.mrb[8].mxu0  ;;  %v6880_v31 = vpop.f32.mrb[8].mxu1 }
  0xf0   :  { %v6882_v32 = vpop.f32.mrb[9].mxu0  ;;  %v6884_v33 = vpop.f32.mrb[9].mxu1 }
  0xf3   :  { %v6886_v34 = vpop.f32.mrb[10].mxu0  ;;  %v6888_v35 = vpop.f32.mrb[10].mxu1 }
  0xf4   :  { %v6890_v36 = vpop.f32.mrb[11].mxu0  ;;  %v6892_v37 = vpop.f32.mrb[11].mxu1 }
  0xf7   :  { %v6899_v39 = vpop.f32.mrb[12].mxu0  ;;  %v6901_v40 = vpop.f32.mrb[12].mxu1 }
  0xf8   :  { %v6903_v41 = vpop.f32.mrb[13].mxu0  ;;  %v6905_v42 = vpop.f32.mrb[13].mxu1 }
  0xfb   :  { %v6910_v46 = vpop.f32.mrb[14].mxu0  ;;  %v6913_v48 = vpop.f32.mrb[14].mxu1 }
  0xfc   :  { %v6916_v50 = vpop.f32.mrb[15].mxu0  ;;  %v6919_v52 = vpop.f32.mrb[15].mxu1 }
  0xff   :  { %v5506_v59 = vpop.f32.mrb[16].mxu0  ;;  %v5566_v62 = vpop.f32.mrb[16].mxu1 }
 0x100   :  { %v465_v0 = vadd.f32 %v5506_v59, %v6897_v38  ;;  %v459_v1 = vpop.f32.mrb[17].mxu0  ;;  %v665_v3 = vadd.f32 %v5566_v62, %v6897_v38  ;;  %v659_v4 = vpop.f32.mrb[17].mxu1 }
 0x101   :  { %v460_v6 = vadd.f32 %v6897_v38, %v459_v1  ;;  %v660_v8 = vadd.f32 %v6897_v38, %v659_v4 }
 0x102   :  { %v715_v12 = vmax.f32 %v465_v0, 0.0  ;;  %v755_v15 = vmax.f32 %v665_v3, 0.0 }
 0x103   :  { %v714_v17 = vmax.f32 %v460_v6, 0.0  ;;  %v5509_v19 = vpop.f32.mrb[18].mxu0  ;;  %v754_v20 = vmax.f32 %v660_v8, 0.0  ;;  %v5569_v21 = vpop.f32.mrb[18].mxu1 }
 0x104   :  { %v6937_v22 = vmax.f32 %v699_v55, %v715_v12  ;;  %v475_v23 = vadd.f32 %v5509_v19, %v6897_v38  ;;  %v469_v43 = vpop.f32.mrb[19].mxu0  ;;  %v6940_v44 = vmax.f32 %v739_v56, %v755_v15  ;;  %v675_v24 = vadd.f32 %v5569_v21, %v6897_v38  ;;  %v669_v45 = vpop.f32.mrb[19].mxu1 }
 0x105   :  { %v6943_v25 = vmax.f32 %v698_v57, %v714_v17  ;;  %v470_v47 = vadd.f32 %v6897_v38, %v469_v43  ;;  %v6946_v49 = vmax.f32 %v738_v60, %v754_v20  ;;  %v670_v51 = vadd.f32 %v6897_v38, %v669_v45 }
 0x106   :  { %v717_v54 = vmax.f32 %v475_v23, 0.0  ;;  %v742_v55 = vmax.f32 %v600_v14, 0.0  ;;  %v757_v58 = vmax.f32 %v675_v24, 0.0  ;;  %v615_v56 = vadd.f32 %v6872_v27, %v6897_v38 }
 0x107   :  { %v716_v59 = vmax.f32 %v470_v47, 0.0  ;;  %v5512_v62 = vpop.f32.mrb[20].mxu0  ;;  %v756_v57 = vmax.f32 %v670_v51, 0.0  ;;  %v5572_v0 = vpop.f32.mrb[20].mxu1  ;;  %v410_v14 = vadd.f32 %v6897_v38, %v6874_v28  ;;  %v744_v19 = vmax.f32 %v610_v61, 0.0 }
 0x108   :  { %v6953_v1 = vmax.f32 %v701_v63, %v717_v54  ;;  %v485_v60 = vadd.f32 %v5512_v62, %v6897_v38  ;;  %v479_v3 = vpop.f32.mrb[21].mxu0  ;;  %v6956_v4 = vmax.f32 %v741_v2, %v757_v58  ;;  %v685_v6 = vadd.f32 %v5572_v0, %v6897_v38  ;;  %v679_v8 = vpop.f32.mrb[21].mxu1 }
 0x109   :  { %v6959_v11 = vmax.f32 %v700_v5, %v716_v59  ;;  %v480_v27 = vadd.f32 %v6897_v38, %v479_v3  ;;  %v6962_v12 = vmax.f32 %v740_v7, %v756_v57  ;;  %v680_v29 = vadd.f32 %v6897_v38, %v679_v8 }
 0x10a   :  { %v415_v63 = vadd.f32 %v6870_v26, %v6897_v38  ;;  %v719_v15 = vmax.f32 %v485_v60, 0.0  ;;  %v759_v2 = vmax.f32 %v685_v6, 0.0  ;;  %v745_v17 = vmax.f32 %v615_v56, 0.0 }
 0x10b   :  { %v718_v20 = vmax.f32 %v480_v27, 0.0  ;;  %v5515_v21 = vpop.f32.mrb[22].mxu0  ;;  %v758_v5 = vmax.f32 %v680_v29, 0.0  ;;  %v5575_v23 = vpop.f32.mrb[22].mxu1  ;;  %v704_v62 = vmax.f32 %v410_v14, 0.0 }
 0x10c   :  { %v6969_v43 = vmax.f32 %v703_v16, %v719_v15  ;;  %v495_v7 = vadd.f32 %v5515_v21, %v6897_v38  ;;  %v489_v24 = vpop.f32.mrb[23].mxu0  ;;  %v6972_v45 = vmax.f32 %v743_v18, %v759_v2  ;;  %v695_v26 = vadd.f32 %v5575_v23, %v6897_v38  ;;  %v689_v47 = vpop.f32.mrb[23].mxu1 }
 0x10d   :  { %v6975_v51 = vmax.f32 %v702_v53, %v718_v20  ;;  %v490_v28 = vadd.f32 %v6897_v38, %v489_v24  ;;  %v6978_v54 = vmax.f32 %v742_v55, %v758_v5  ;;  %v690_v58 = vadd.f32 %v6897_v38, %v689_v47 }
 0x10e   :  { %v705_v59 = vmax.f32 %v415_v63, 0.0  ;;  %v425_v16 = vadd.f32 %v6878_v30, %v6897_v38  ;;  %v721_v56 = vmax.f32 %v495_v7, 0.0  ;;  %v761_v61 = vmax.f32 %v695_v26, 0.0 }
 0x10f   :  { %v420_v18 = vadd.f32 %v6897_v38, %v6882_v32  ;;  %v720_v57 = vmax.f32 %v490_v28, 0.0  ;;  %v5518_v0 = vpop.f32.mrb[24].mxu0  ;;  %v760_v53 = vmax.f32 %v690_v58, 0.0  ;;  %v435_v32 = vadd.f32 %v6886_v34, %v6897_v38 }
 0x110   :  { %v6985_v60 = vmax.f32 %v705_v59, %v721_v56  ;;  %v505_v55 = vadd.f32 %v5518_v0, %v6897_v38  ;;  %v499_v3 = vpop.f32.mrb[25].mxu0  ;;  %v6988_v6 = vmax.f32 %v745_v17, %v761_v61  ;;  %v707_v29 = vmax.f32 %v425_v16, 0.0 }
 0x111   :  { %v6990_v8 = vmax.f32 %v704_v62, %v720_v57  ;;  %v500_v30 = vadd.f32 %v6897_v38, %v499_v3  ;;  %v6993_v27 = vmax.f32 %v744_v19, %v760_v53  ;;  %v706_v14 = vmax.f32 %v420_v18, 0.0 }
 0x112   :  { %v723_v63 = vmax.f32 %v505_v55, 0.0  ;;  %v430_v15 = vadd.f32 %v6897_v38, %v6890_v36  ;;  %v709_v19 = vmax.f32 %v435_v32, 0.0  ;;  %v445_v24 = vadd.f32 %v6899_v39, %v6897_v38 }
 0x113   :  { %v722_v2 = vmax.f32 %v500_v30, 0.0  ;;  %v5521_v20 = vpop.f32.mrb[26].mxu0  ;;  %v440_v36 = vadd.f32 %v6897_v38, %v6903_v41  ;;  %v625_v30 = vadd.f32 %v6880_v31, %v6897_v38 }
 0x114   :  { %v771_v21 = vmax.f32 %v707_v29, %v723_v63  ;;  %v515_v17 = vadd.f32 %v5521_v20, %v6897_v38  ;;  %v509_v5 = vpop.f32.mrb[27].mxu0  ;;  %v708_v47 = vmax.f32 %v430_v15, 0.0  ;;  %v711_v18 = vmax.f32 %v445_v24, 0.0 }
 0x115   :  { %v770_v23 = vmax.f32 %v706_v14, %v722_v2  ;;  %v510_v7 = vadd.f32 %v6897_v38, %v509_v5  ;;  %v710_v0 = vmax.f32 %v440_v36, 0.0  ;;  %v635_v5 = vadd.f32 %v6888_v35, %v6897_v38 }
 0x116   :  { %v7004_v34 = vmax.f32 %v771_v21, %v6940_v44  ;;  %v725_v26 = vmax.f32 %v515_v17, 0.0  ;;  %v455_v44 = vadd.f32 %v6910_v46, %v6897_v38  ;;  %v747_v17 = vmax.f32 %v625_v30, 0.0 }
 0x117   :  { %v7009_v28 = vmax.f32 %v770_v23, %v6946_v49  ;;  %v724_v58 = vmax.f32 %v510_v7, 0.0  ;;  %v5524_v59 = vpop.f32.mrb[28].mxu0  ;;  %v450_v49 = vadd.f32 %v6897_v38, %v6916_v50  ;;  %v640_v35 = vadd.f32 %v6897_v38, %v6905_v42 }
 0x118   :  { %8449 = vst [vmem:[#allocation5_spill] sm:$0xff] %v7004_v34  ;;  %v773_v16 = vmax.f32 %v709_v19, %v725_v26  ;;  %v525_v56 = vadd.f32 %v5524_v59, %v6897_v38  ;;  %v519_v61 = vpop.f32.mrb[29].mxu0  ;;  %v713_v15 = vmax.f32 %v455_v44, 0.0  ;;  %v650_v42 = vadd.f32 %v6897_v38, %v6919_v52 }
 0x119   :  { %8450 = vst [vmem:[#allocation6_spill] sm:$0xff] %v7009_v28  ;;  %v772_v62 = vmax.f32 %v708_v47, %v724_v58  ;;  %v520_v39 = vadd.f32 %v6897_v38, %v519_v61  ;;  %v712_v2 = vmax.f32 %v450_v49, 0.0  ;;  %v7050_v58 = vadd.f32 %v6913_v48, %v6897_v38 }
 0x11a   :  { %v7016_v57 = vmax.f32 %v773_v16, %v6956_v4  ;;  %v727_v41 = vmax.f32 %v525_v56, 0.0  ;;  %v620_v4 = vadd.f32 %v6897_v38, %v6884_v33  ;;  %v749_v56 = vmax.f32 %v635_v5, 0.0 }
 0x11b   :  { %v7021_v53 = vmax.f32 %v772_v62, %v6962_v12  ;;  %v726_v55 = vmax.f32 %v520_v39, 0.0  ;;  %v5527_v3 = vpop.f32.mrb[30].mxu0 }
 0x11c   :  { %8451 = vst [vmem:[#allocation7_spill] sm:$0xff] %v7016_v57  ;;  %v775_v29 = vmax.f32 %v711_v18, %v727_v41  ;;  %v535_v32 = vadd.f32 %v5527_v3, %v6897_v38  ;;  %v529_v46 = vpop.f32.mrb[31].mxu0  ;;  %v746_v19 = vmax.f32 %v620_v4, 0.0  ;;  %v753_v3 = vmax.f32 %v7050_v58, 0.0 }
 0x11d   :  { %8452 = vst [vmem:[#allocation8_spill] sm:$0xff] %v7021_v53  ;;  %v774_v63 = vmax.f32 %v710_v0, %v726_v55  ;;  %v530_v14 = vadd.f32 %v6897_v38, %v529_v46  ;;  %v750_v55 = vmax.f32 %v640_v35, 0.0 }
 0x11e   :  { %v7030_v50 = vmax.f32 %v775_v29, %v6972_v45  ;;  %v729_v12 = vmax.f32 %v535_v32, 0.0  ;;  %v630_v45 = vadd.f32 %v6897_v38, %v6892_v37  ;;  %v752_v32 = vmax.f32 %v650_v42, 0.0 }
 0x11f   :  { %v7033_v20 = vmax.f32 %v774_v63, %v6978_v54  ;;  %v728_v31 = vmax.f32 %v530_v14, 0.0  ;;  %v5530_v21 = vpop.f32.mrb[32].mxu0  ;;  %v645_v54 = vadd.f32 %v6901_v40, %v6897_v38  ;;  %v1365_v40 = vld [vmem:[%s8426_s4 + $0x20] sm:$0xff]  ;;  %v835_v14 = vrot.slane %v7004_v34, 7 }
 0x120   :  { %8453 = vst [vmem:[#allocation9_spill] sm:$0xff] %v7030_v50  ;;  %v777_v23 = vmax.f32 %v713_v15, %v729_v12  ;;  %v545_v33 = vadd.f32 %v5530_v21, %v6897_v38  ;;  %v539_v7 = vpop.f32.mrb[33].mxu0 }
 0x121   :  { %8454 = vst [vmem:[#allocation10_spill] sm:$0xff] %v7033_v20  ;;  %v776_v24 = vmax.f32 %v712_v2, %v728_v31  ;;  %v540_v26 = vadd.f32 %v6897_v38, %v539_v7  ;;  %v751_v44 = vmax.f32 %v645_v54, 0.0 }
 0x122   :  { %v7044_v47 = vmax.f32 %v777_v23, %v6988_v6  ;;  %v731_v36 = vmax.f32 %v545_v33, 0.0  ;;  %v1366_v6 = vld [vmem:[%s8426_s4 + $0x28] sm:$0xff] }
 0x123   :  { %v7053_v59 = vmax.f32 %v776_v24, %v6993_v27  ;;  %v730_v37 = vmax.f32 %v540_v26, 0.0  ;;  %v5533_v16 = vpop.f32.mrb[34].mxu0  ;;  %v748_v27 = vmax.f32 %v630_v45, 0.0  ;;  %v7068_v49 = vpack.c.bf16 %v1366_v6, %v1365_v40 }
 0x124   :  { %8455 = vst [vmem:[#allocation11_spill] sm:$0xff] %v7044_v47  ;;  %v779_v61 = vmax.f32 %v731_v36, %v747_v17  ;;  %v555_v48 = vadd.f32 %v5533_v16, %v6897_v38  ;;  %v549_v62 = vpop.f32.mrb[35].mxu0 }
 0x125   :  { %8456 = vst [vmem:[#allocation12_spill] sm:$0xff] %v7053_v59  ;;  %v778_v39 = vmax.f32 %v730_v37, %v746_v19  ;;  %v550_v18 = vadd.f32 %v6897_v38, %v549_v62 }
 0x126   :  { %v7066_v41 = vmax.f32 %v6937_v22, %v779_v61  ;;  %v733_v0 = vmax.f32 %v555_v48, 0.0 }
 0x127   :  { %v7072_v52 = vmax.f32 %v6943_v25, %v778_v39  ;;  %v732_v30 = vmax.f32 %v550_v18, 0.0  ;;  %v5536_v29 = vpop.f32.mrb[36].mxu0  ;;  %v834_v25 = vrot.slane %v7009_v28, 7 }
 0x128   :  { %v827_v46 = vrot.slane %v7066_v41, 7  ;;  %v781_v4 = vmax.f32 %v733_v0, %v749_v56  ;;  %v565_v63 = vadd.f32 %v5536_v29, %v6897_v38  ;;  %v559_v22 = vpop.f32.mrb[37].mxu0 }
 0x129   :  { %v826_v15 = vrot.slane %v7072_v52, 7  ;;  %v780_v12 = vmax.f32 %v732_v30, %v748_v27  ;;  %v560_v2 = vadd.f32 %v6897_v38, %v559_v22 }
 0x12a   :  { %v7081_v31 = vsel %vm858_vm2, 0.0, %v827_v46  ;;  %v7084_v21 = vmax.f32 %v6953_v1, %v781_v4  ;;  %v735_v17 = vmax.f32 %v565_v63, 0.0  ;;  %v7098_v1 = vsel %vm858_vm2, %v827_v46, 0.0 }
 0x12b   :  { %v7087_v5 = vsel %vm858_vm2, 0.0, %v826_v15  ;;  %v7090_v23 = vsel %vm858_vm2, %v826_v15, 0.0  ;;  %v7093_v33 = vmax.f32 %v6959_v11, %v780_v12  ;;  %v734_v7 = vmax.f32 %v560_v2, 0.0  ;;  %v5539_v19 = vpop.f32.mrb[38].mxu0 }
 0x12c   :  { %v926_v45 = vrot.slane %v7090_v23, 1  ;;  %v829_v24 = vrot.slane %v7084_v21, 7  ;;  %v783_v26 = vmax.f32 %v735_v17, %v751_v44  ;;  %v569_v54 = vpop.f32.mrb[39].mxu0  ;;  %v575_v58 = vadd.f32 %v5539_v19, %v6897_v38 }
 0x12d   :  { %v828_v36 = vrot.slane %v7093_v33, 7  ;;  %v782_v35 = vmax.f32 %v734_v7, %v750_v55  ;;  %v570_v37 = vadd.f32 %v6897_v38, %v569_v54  ;;  %v925_v40 = vrot.slane %v7087_v5, 1 }
 0x12e   :  { %v7104_v11 = vsel %vm858_vm2, 0.0, %v829_v24  ;;  %v7107_v16 = vmax.f32 %v6969_v43, %v783_v26  ;;  %v928_v6 = vrot.slane %v7081_v31, 1  ;;  %v737_v61 = vmax.f32 %v575_v58, 0.0 }
 0x12f   :  { %v7112_v56 = vsel %vm858_vm2, 0.0, %v828_v36  ;;  %v7115_v42 = vmax.f32 %v6975_v51, %v782_v35  ;;  %v736_v48 = vmax.f32 %v570_v37, 0.0  ;;  %v7119_v62 = vsel %vm922_vm3, %v925_v40, %v926_v45 }
 0x130   :  { %v831_v38 = vrot.slane %v7107_v16, 7  ;;  %v929_v43 = vrot.slane %v7098_v1, 1  ;;  %v7123_v27 = vsel %vm858_vm2, %v828_v36, 0.0  ;;  %v785_v18 = vmax.f32 %v737_v61, %v753_v3  ;;  %5581 = vmatmul.mubr.msk.f32.vlgmr.msra.gmra.mrb[24].mxu1 %vm969_vm1, %v7119_v62 }
 0x131   :  { %8457 = vst [vmem:[#allocation13_spill] sm:$0xff] %v7115_v42  ;;  %v830_v39 = vrot.slane %v7115_v42, 7  ;;  %v784_v44 = vmax.f32 %v736_v48, %v752_v32  ;;  %v931_v51 = vrot.slane %v7112_v56, 1  ;;  %6132 = vmatpush3.bf16.msra.mxu1 %v6867_v13  ;;  %v932_v30 = vrot.slane %v7123_v27, 1 }
 0x132   :  { %v7130_v0 = vsel %vm858_vm2, 0.0, %v831_v38  ;;  %v7134_v55 = vsel %vm922_vm3, %v928_v6, %v929_v43  ;;  %v7138_v29 = vsel %vm858_vm2, %v829_v24, 0.0  ;;  %v7144_v32 = vmax.f32 %v6985_v60, %v785_v18  ;;  %6134 = vmatprep.subr.bf16.mxu1 %v7068_v49 }
 0x133   :  { %v7141_v3 = vsel %vm858_vm2, 0.0, %v830_v39  ;;  %v7147_v46 = vmax.f32 %v6990_v8, %v784_v44  ;;  %5583 = vmatprep.mubr.msk.f32.mxu1 %vm969_vm1, %v7134_v55  ;;  %v934_v13 = vrot.slane %v7104_v11, 1  ;;  %v7154_v4 = vsel %vm922_vm3, %v931_v51, %v932_v30 }
 0x134   :  { %8458 = vst [vmem:[#allocation14_spill] sm:$0xff] %v7144_v32  ;;  %v935_v63 = vrot.slane %v7138_v29, 1  ;;  %v7158_v22 = vsel %vm858_vm2, %v830_v39, 0.0  ;;  %v937_v60 = vrot.slane %v7141_v3, 1  ;;  %5584 = vmatmul.mubr.msk.f32.gmra.mrb[26].mxu1 %vm969_vm1, %v7154_v4  ;;  %v7166_v12 = vsel %vm858_vm2, %v831_v38, 0.0 }
 0x135   :  { %8459 = vst [vmem:[#allocation15_spill] sm:$0xff] %v7147_v46  ;;  %v832_v8 = vrot.slane %v7147_v46, 7  ;;  %v938_v15 = vrot.slane %v7158_v22, 1  ;;  %v940_v2 = vrot.slane %v7130_v0, 1  ;;  %v941_v7 = vrot.slane %v7166_v12, 1 }
 0x136   :  { %v7170_v17 = vsel %vm922_vm3, %v934_v13, %v935_v63  ;;  %v7187_v26 = vsel %vm858_vm2, 0.0, %v834_v25  ;;  %v7194_v35 = vsel %vm858_vm2, %v834_v25, 0.0  ;;  %v7199_v58 = vsel %vm858_vm2, 0.0, %v835_v14 }
 0x137   :  { %v7174_v19 = vsel %vm858_vm2, 0.0, %v832_v8  ;;  %5586 = vmatprep.mubr.msk.f32.mxu1 %vm969_vm1, %v7170_v17  ;;  %v7179_v45 = vsel %vm922_vm3, %v937_v60, %v938_v15  ;;  %v7182_v24 = vsel %vm858_vm2, %v832_v8, 0.0  ;;  %v836_v37 = vrot.slane %v7021_v53, 7 }
 0x138   :  { %v943_v54 = vrot.slane %v7174_v19, 1  ;;  %v944_v36 = vrot.slane %v7182_v24, 1  ;;  %5587 = vmatmul.mubr.msk.f32.gmra.mrb[28].mxu1 %vm969_vm1, %v7179_v45  ;;  %v7205_v40 = vsel %vm922_vm3, %v940_v2, %v941_v7  ;;  %v7210_v6 = vsel %vm858_vm2, %v835_v14, 0.0 }
 0x139   :  { %v837_v25 = vrot.slane %v7016_v57, 7  ;;  %5589 = vmatprep.mubr.msk.f32.mxu1 %vm969_vm1, %v7205_v40  ;;  %v946_v48 = vrot.slane %v7187_v26, 1  ;;  %v947_v38 = vrot.slane %v7194_v35, 1  ;;  %v949_v43 = vrot.slane %v7199_v58, 1 }
 0x13a   :  { %v7216_v61 = vsel %vm922_vm3, %v943_v54, %v944_v36  ;;  %v950_v39 = vrot.slane %v7210_v6, 1  ;;  %v7223_v18 = vsel %vm858_vm2, 0.0, %v836_v37  ;;  %v838_v14 = vrot.slane %v7033_v20, 7 }
 0x13b   :  { %v7229_v44 = vsel %vm858_vm2, %v836_v37, 0.0  ;;  %v7232_v51 = vsel %vm858_vm2, 0.0, %v837_v25  ;;  %v839_v30 = vrot.slane %v7030_v50, 7  ;;  %v7238_v13 = vsel %vm858_vm2, %v837_v25, 0.0 }
 0x13c   :  { %5590 = vmatmul.mubr.msk.f32.gmra.mrb[30].mxu1 %vm969_vm1, %v7216_v61  ;;  %v7241_v63 = vsel %vm922_vm3, %v946_v48, %v947_v38  ;;  %v840_v60 = vrot.slane %v7053_v59, 7  ;;  %v7245_v8 = vsel %vm922_vm3, %v949_v43, %v950_v39  ;;  %v952_v15 = vrot.slane %v7223_v18, 1 }
 0x13d   :  { %5592 = vmatprep.mubr.msk.f32.mxu1 %vm969_vm1, %v6855_v10  ;;  %v953_v2 = vrot.slane %v7229_v44, 1  ;;  %v7250_v7 = vsel %vm858_vm2, 0.0, %v838_v14  ;;  %v955_v54 = vrot.slane %v7232_v51, 1  ;;  %v956_v36 = vrot.slane %v7238_v13, 1 }
 0x13e   :  { %v7257_v37 = vsel %vm858_vm2, %v838_v14, 0.0  ;;  %v7260_v25 = vsel %vm858_vm2, 0.0, %v839_v30  ;;  %v7265_v48 = vsel %vm858_vm2, %v839_v30, 0.0  ;;  %v7268_v38 = vsel %vm858_vm2, 0.0, %v840_v60 }
 0x13f   :  { %v7271_v43 = vsel %vm922_vm3, %v952_v15, %v953_v2  ;;  %v958_v39 = vrot.slane %v7250_v7, 1  ;;  %v959_v14 = vrot.slane %v7257_v37, 1  ;;  %v7278_v9 = vsel %vm922_vm3, %v955_v54, %v956_v36  ;;  %v1558_v36 = vld [vmem:[%s8426_s4 + $0x30] sm:$0xff] }
 0x140   :  { %5593 = vmatmul.mubr.msk.f32.gmra.mrb[32].mxu1 %vm969_vm1, %v7241_v63  ;;  %v961_v59 = vrot.slane %v7260_v25, 1  ;;  %v962_v30 = vrot.slane %v7265_v48, 1  ;;  %v7283_v20 = vsel %vm858_vm2, %v840_v60, 0.0  ;;  %v964_v2 = vrot.slane %v7268_v38, 1 }
 0x141   :  { %5595 = vmatprep.mubr.msk.f32.mxu1 %vm969_vm1, %v7245_v8  ;;  %v7288_v15 = vsel %vm922_vm3, %v958_v39, %v959_v14  ;;  %v965_v50 = vrot.slane %v7283_v20, 1  ;;  %v1559_v39 = vld [vmem:[%s8426_s4 + $0x38] sm:$0xff]  ;;  %v8460_v14 = vmov 0.0   ;;  %v1327_v53 = vrot.slane %v7098_v1, 2 }
 0x142   :  { %v7295_v54 = vsel %vm922_vm3, %v961_v59, %v962_v30  ;;  %v6137_v59 = vpack.c.bf16 %v1559_v39, %v1558_v36  ;;  %v1323_v30 = vrot.slane %v7087_v5, 2  ;;  %v1736_v36 = vld [vmem:[%s8426_s4 + $0x48] sm:$0xff]  ;;  %v1326_v39 = vrot.slane %v7081_v31, 2 }
 0x143   :  { %v7300_v60 = vsel %vm922_vm3, %v964_v2, %v965_v50  ;;  %v7340_v50 = vrot.slane %v8460_v14, 2  ;;  %v1735_v2 = vld [vmem:[%s8426_s4 + $0x40] sm:$0xff]  ;;  %v1329_v28 = vrot.slane %v7112_v56, 2  ;;  %v1330_v34 = vrot.slane %v7123_v27, 2 }
 0x144   :  { %5596 = vmatmul.mubr.msk.f32.gmra.mrb[34].mxu1 %vm969_vm1, %v7271_v43  ;;  %v7364_v46 = vsel %vm1320_vm4, %v1326_v39, %v1327_v53  ;;  %v1332_v1 = vrot.slane %v7104_v11, 2  ;;  %v1333_v42 = vrot.slane %v7138_v29, 2  ;;  %v1335_v27 = vrot.slane %v7141_v3, 2 }
 0x145   :  { %5598 = vmatprep.mubr.msk.f32.mxu1 %vm969_vm1, %v7278_v9  ;;  %v1338_v29 = vrot.slane %v7130_v0, 2  ;;  %v1348_v39 = vrot.slane %v7210_v6, 2  ;;  %v1354_v6 = vrot.slane %v7238_v13, 2  ;;  %v1360_v13 = vrot.slane %v7265_v48, 2 }
 0x146   :  { %v7378_v53 = vsel %vm1320_vm4, %v1332_v1, %v1333_v42 }
 0x148   :  { %5599 = vmatmul.mubr.msk.f32.gmra.mrb[36].mxu1 %vm969_vm1, %v7288_v15 }
 0x149   :  { %5601 = vmatprep.mubr.msk.f32.mxu1 %vm969_vm1, %v7295_v54 }
 0x14c   :  { %5602 = vmatmul.mubr.msk.f32.gmra.mrb[38].mxu1 %vm969_vm1, %v7300_v60 }
 0x14d   :  { %5608 = vmatprep.mubr.f32.mxu1 %v8460_v14 }
 0x150   :  { %5609 = vmatmul.mubr.msk.f32.vlgmr.msra.gmra.mrb[24].mxu1 %vm969_vm1, %v7087_v5 }
 0x151   :  { %6136 = vmatpush3.bf16.msra.mxu1 %v7068_v49  ;;  %5611 = vmatprep.mubr.msk.f32.mxu1 %vm969_vm1, %v7081_v31  ;;  %v1324_v49 = vrot.slane %v7090_v23, 2  ;;  %v6141_v23 = vpack.c.bf16 %v1736_v36, %v1735_v2  ;;  %v1344_v2 = vrot.slane %v7187_v26, 2  ;;  %v1345_v36 = vrot.slane %v7194_v35, 2 }
 0x152   :  { %6138 = vmatprep.subr.bf16.mxu1 %v6137_v59 }
 0x153   :  { %v7357_v57 = vsel %vm1320_vm4, %v1323_v30, %v1324_v49  ;;  %v7371_v49 = vsel %vm1320_vm4, %v1329_v28, %v1330_v34  ;;  %v1336_v30 = vrot.slane %v7158_v22, 2  ;;  %v1341_v28 = vrot.slane %v7174_v19, 2 }
 0x154   :  { %5612 = vmatmul.mubr.msk.f32.gmra.mrb[26].mxu1 %vm969_vm1, %v7112_v56  ;;  %v1342_v22 = vrot.slane %v7182_v24, 2  ;;  %v1347_v24 = vrot.slane %v7199_v58, 2  ;;  %v7408_v1 = vsel %vm1320_vm4, %v1344_v2, %v1345_v36  ;;  %v1359_v2 = vrot.slane %v7260_v25, 2 }
 0x155   :  { %5614 = vmatprep.mubr.msk.f32.mxu1 %vm969_vm1, %v7104_v11  ;;  %v7385_v34 = vsel %vm1320_vm4, %v1335_v27, %v1336_v30  ;;  %v1350_v27 = vrot.slane %v7223_v18, 2  ;;  %v1351_v30 = vrot.slane %v7229_v44, 2  ;;  %v1357_v44 = vrot.slane %v7257_v37, 2 }
 0x156   :  { %v7415_v35 = vsel %vm1320_vm4, %v1347_v24, %v1348_v39  ;;  %v1362_v24 = vrot.slane %v7268_v38, 2  ;;  %v1363_v37 = vrot.slane %v7283_v20, 2  ;;  %v7443_v39 = vsel %vm1320_vm4, %v1359_v2, %v1360_v13  ;;  %v1909_v20 = vld [vmem:[%s8426_s4 + $0x58] sm:$0xff] }
 0x158   :  { %5615 = vmatmul.mubr.msk.f32.gmra.mrb[28].mxu1 %vm969_vm1, %v7141_v3  ;;  %v7448_v48 = vsel %vm1320_vm4, %v1362_v24, %v1363_v37 }
 0x159   :  { %5617 = vmatprep.mubr.msk.f32.mxu1 %vm969_vm1, %v7130_v0 }
 0x15c   :  { %5618 = vmatmul.mubr.msk.f32.gmra.mrb[30].mxu1 %vm969_vm1, %v7174_v19 }
 0x15d   :  { %5620 = vmatprep.mubr.f32.mxu1 %v8460_v14 }
 0x160   :  { %5621 = vmatmul.mubr.msk.f32.gmra.mrb[32].mxu1 %vm969_vm1, %v7187_v26 }
 0x161   :  { %5623 = vmatprep.mubr.msk.f32.mxu1 %vm969_vm1, %v7199_v58 }
 0x164   :  { %5624 = vmatmul.mubr.msk.f32.gmra.mrb[34].mxu1 %vm969_vm1, %v7223_v18 }
 0x165   :  { %5626 = vmatprep.mubr.msk.f32.mxu1 %vm969_vm1, %v7232_v51 }
 0x168   :  { %5627 = vmatmul.mubr.msk.f32.gmra.mrb[36].mxu1 %vm969_vm1, %v7250_v7 }
 0x169   :  { %5629 = vmatprep.mubr.msk.f32.mxu1 %vm969_vm1, %v7260_v25 }
 0x16c   :  { %5630 = vmatmul.mubr.msk.f32.gmra.mrb[38].mxu1 %vm969_vm1, %v7268_v38 }
 0x16d   :  { %5636 = vmatprep.mubr.msk.f32.mxu1 %vm969_vm1, %v7340_v50 }
 0x170   :  { %5637 = vmatmul.mubr.msk.f32.vlgmr.msra.gmra.mrb[24].mxu1 %vm969_vm1, %v7357_v57 }
 0x171   :  { %6140 = vmatpush3.bf16.msra.mxu1 %v6137_v59  ;;  %5639 = vmatprep.mubr.msk.f32.mxu1 %vm969_vm1, %v7364_v46  ;;  %v1339_v59 = vrot.slane %v7166_v12, 2  ;;  %v7397_v12 = vsel %vm1320_vm4, %v1341_v28, %v1342_v22  ;;  %v1356_v28 = vrot.slane %v7250_v7, 2 }
 0x172   :  { %6142 = vmatprep.subr.bf16.mxu1 %v6141_v23 }
 0x173   :  { %v7392_v42 = vsel %vm1320_vm4, %v1338_v29, %v1339_v59  ;;  %v1353_v29 = vrot.slane %v7232_v51, 2  ;;  %v7422_v59 = vsel %vm1320_vm4, %v1350_v27, %v1351_v30  ;;  %v7436_v36 = vsel %vm1320_vm4, %v1356_v28, %v1357_v44  ;;  %v1908_v27 = vld [vmem:[%s8426_s4 + $0x50] sm:$0xff]  ;;  %v2076_v28 = vld [vmem:[%s8426_s4 + $0x68] sm:$0xff] }
 0x174   :  { %5640 = vmatmul.mubr.msk.f32.gmra.mrb[26].mxu1 %vm969_vm1, %v7371_v49  ;;  %v6145_v30 = vpack.c.bf16 %v1909_v20, %v1908_v27 }
 0x175   :  { %5642 = vmatprep.mubr.msk.f32.mxu1 %vm969_vm1, %v7378_v53  ;;  %v7429_v22 = vsel %vm1320_vm4, %v1353_v29, %v1354_v6  ;;  %v833_v29 = vrot.slane %v7144_v32, 7  ;;  %v2075_v6 = vld [vmem:[%s8426_s4 + $0x60] sm:$0xff] }
 0x176   :  { %v6149_v44 = vpack.c.bf16 %v2076_v28, %v2075_v6  ;;  %v2756_v6 = vld [vmem:[%s8428_s6 + $0x18] sm:$0xff] }
 0x177   :  { %v882_v2 = vsel %vm858_vm2, %v833_v29, 0.0 }
 0x178   :  { %5643 = vmatmul.mubr.msk.f32.gmra.mrb[28].mxu1 %vm969_vm1, %v7385_v34 }
 0x179   :  { %5645 = vmatprep.mubr.msk.f32.mxu1 %vm969_vm1, %v7392_v42 }
 0x17c   :  { %5646 = vmatmul.mubr.msk.f32.gmra.mrb[30].mxu1 %vm969_vm1, %v7397_v12 }
 0x17d   :  { %5648 = vmatprep.mubr.msk.f32.mxu1 %vm969_vm1, %v7340_v50 }
 0x180   :  { %5649 = vmatmul.mubr.msk.f32.gmra.mrb[32].mxu1 %vm969_vm1, %v7408_v1 }
 0x181   :  { %5651 = vmatprep.mubr.msk.f32.mxu1 %vm969_vm1, %v7415_v35 }
 0x184   :  { %5652 = vmatmul.mubr.msk.f32.gmra.mrb[34].mxu1 %vm969_vm1, %v7422_v59 }
 0x185   :  { %5654 = vmatprep.mubr.msk.f32.mxu1 %vm969_vm1, %v7429_v22 }
 0x188   :  { %5655 = vmatmul.mubr.msk.f32.gmra.mrb[36].mxu1 %vm969_vm1, %v7436_v36 }
 0x189   :  { %5657 = vmatprep.mubr.msk.f32.mxu1 %vm969_vm1, %v7443_v39 }
 0x18c   :  { %5658 = vmatmul.mubr.msk.f32.gmra.mrb[38].mxu1 %vm969_vm1, %v7448_v48 }
 0x18d   :  { %5664 = vmatprep.mubr.msk.f32.mxu1 %vm969_vm1, %v7087_v5  ;;  %v7474_v5 = vsel %vm858_vm2, 0.0, %v833_v29  ;;  %v2239_v29 = vld [vmem:[%s8426_s4 + $0x78] sm:$0xff] }
 0x18e   :  { %v1729_v13 = vrot.slane %v7474_v5, 1 }
 0x190   :  { %5665 = vmatmul.mubr.msk.f32.vlgmr.msra.gmra.mrb[24].mxu1 %vm969_vm1, %v7081_v31 }
 0x191   :  { %6144 = vmatpush3.bf16.msra.mxu1 %v6141_v23  ;;  %5667 = vmatprep.mubr.msk.f32.mxu1 %vm969_vm1, %v7112_v56  ;;  %v841_v23 = vrot.slane %v7044_v47, 7 }
 0x192   :  { %6146 = vmatprep.subr.bf16.mxu1 %v6145_v30 }
 0x193   :  { %v890_v37 = vsel %vm858_vm2, %v841_v23, 0.0 }
 0x194   :  { %5668 = vmatmul.mubr.msk.f32.gmra.mrb[26].mxu1 %vm969_vm1, %v7104_v11  ;;  %v1733_v20 = vrot.slane %v890_v37, 1 }
 0x195   :  { %5670 = vmatprep.mubr.msk.f32.mxu1 %vm969_vm1, %v7141_v3 }
 0x198   :  { %5671 = vmatmul.mubr.msk.f32.gmra.mrb[28].mxu1 %vm969_vm1, %v7130_v0 }
 0x199   :  { %5673 = vmatprep.mubr.msk.f32.mxu1 %vm969_vm1, %v7174_v19 }
 0x19c   :  { %5674 = vmatmul.mubr.msk.f32.gmra.mrb[30].mxu1 %vm969_vm1, %v7474_v5 }
 0x19d   :  { %5676 = vmatprep.mubr.msk.f32.mxu1 %vm969_vm1, %v7187_v26  ;;  %v7494_v26 = vsel %vm858_vm2, 0.0, %v841_v23  ;;  %v2755_v23 = vld [vmem:[%s8428_s6 + $0x10] sm:$0xff] }
 0x19e   :  { %v1732_v27 = vrot.slane %v7494_v26, 1  ;;  %v6161_v28 = vpack.c.bf16 %v2756_v6, %v2755_v23 }
 0x1a0   :  { %5677 = vmatmul.mubr.msk.f32.gmra.mrb[32].mxu1 %vm969_vm1, %v7199_v58  ;;  %6162 = vmatprep.subr.bf16.mxu0 %v6161_v28 }
 0x1a1   :  { %5679 = vmatprep.mubr.msk.f32.mxu1 %vm969_vm1, %v7223_v18  ;;  %6164 = vmatpush3.bf16.msra.mxu0 %v6161_v28 }
 0x1a4   :  { %5680 = vmatmul.mubr.msk.f32.gmra.mrb[34].mxu1 %vm969_vm1, %v7232_v51 }
 0x1a5   :  { %5682 = vmatprep.mubr.msk.f32.mxu1 %vm969_vm1, %v7250_v7 }
 0x1a8   :  { %5683 = vmatmul.mubr.msk.f32.gmra.mrb[36].mxu1 %vm969_vm1, %v7260_v25 }
 0x1a9   :  { %5685 = vmatprep.mubr.msk.f32.mxu1 %vm969_vm1, %v7268_v38 }
 0x1ac   :  { %5686 = vmatmul.mubr.msk.f32.gmra.mrb[38].mxu1 %vm969_vm1, %v7494_v26 }
 0x1ad   :  { %5692 = vmatprep.mubr.msk.f32.mxu1 %vm969_vm1, %v7119_v62  ;;  %v1730_v62 = vrot.slane %v882_v2, 1 }
 0x1af   :  { %v7521_v24 = vsel %vm922_vm3, %v1729_v13, %v1730_v62  ;;  %v1903_v62 = vrot.slane %v882_v2, 2  ;;  %v1905_v2 = vrot.slane %v7494_v26, 2 }
 0x1b0   :  { %5693 = vmatmul.mubr.msk.f32.vlgmr.msra.gmra.mrb[24].mxu1 %vm969_vm1, %v7134_v55 }
 0x1b1   :  { %6148 = vmatpush3.bf16.msra.mxu1 %v6145_v30  ;;  %5695 = vmatprep.mubr.msk.f32.mxu1 %vm969_vm1, %v7154_v4  ;;  %v2238_v30 = vld [vmem:[%s8426_s4 + $0x70] sm:$0xff] }
 0x1b2   :  { %6150 = vmatprep.subr.bf16.mxu1 %v6149_v44  ;;  %v6153_v13 = vpack.c.bf16 %v2239_v29, %v2238_v30  ;;  %v2402_v30 = vld [vmem:[%s8426_s4 + $0x88] sm:$0xff] }
 0x1b4   :  { %5696 = vmatmul.mubr.msk.f32.gmra.mrb[26].mxu1 %vm969_vm1, %v7170_v17 }
 0x1b5   :  { %5698 = vmatprep.mubr.msk.f32.mxu1 %vm969_vm1, %v7179_v45 }
 0x1b8   :  { %5699 = vmatmul.mubr.msk.f32.gmra.mrb[28].mxu1 %vm969_vm1, %v7205_v40 }
 0x1b9   :  { %5701 = vmatprep.mubr.msk.f32.mxu1 %vm969_vm1, %v7216_v61 }
 0x1bc   :  { %5702 = vmatmul.mubr.msk.f32.gmra.mrb[30].mxu1 %vm969_vm1, %v7521_v24 }
 0x1bd   :  { %5704 = vmatprep.mubr.msk.f32.mxu1 %vm969_vm1, %v7241_v63  ;;  %v7542_v63 = vsel %vm922_vm3, %v1732_v27, %v1733_v20  ;;  %v1906_v27 = vrot.slane %v890_v37, 2  ;;  %v2401_v20 = vld [vmem:[%s8426_s4 + $0x80] sm:$0xff] }
 0x1be   :  { %v6157_v37 = vpack.c.bf16 %v2402_v30, %v2401_v20 }
 0x1c0   :  { %5705 = vmatmul.mubr.msk.f32.gmra.mrb[32].mxu1 %vm969_vm1, %v7245_v8 }
 0x1c1   :  { %5707 = vmatprep.mubr.msk.f32.mxu1 %vm969_vm1, %v7271_v43 }
 0x1c4   :  { %5708 = vmatmul.mubr.msk.f32.gmra.mrb[34].mxu1 %vm969_vm1, %v7278_v9 }
 0x1c5   :  { %5710 = vmatprep.mubr.msk.f32.mxu1 %vm969_vm1, %v7288_v15 }
 0x1c8   :  { %5711 = vmatmul.mubr.msk.f32.gmra.mrb[36].mxu1 %vm969_vm1, %v7295_v54 }
 0x1c9   :  { %5713 = vmatprep.mubr.msk.f32.mxu1 %vm969_vm1, %v7300_v60 }
 0x1cc   :  { %5714 = vmatmul.mubr.msk.f32.gmra.mrb[38].mxu1 %vm969_vm1, %v7542_v63 }
 0x1cd   :  { %5720 = vmatprep.mubr.msk.f32.mxu1 %vm969_vm1, %v7357_v57  ;;  %v1902_v57 = vrot.slane %v7474_v5, 2 }
 0x1d0   :  { %5721 = vmatmul.mubr.msk.f32.vlgmr.msra.gmra.mrb[24].mxu1 %vm969_vm1, %v7364_v46 }
 0x1d1   :  { %6152 = vmatpush3.bf16.msra.mxu1 %v6149_v44  ;;  %5723 = vmatprep.mubr.msk.f32.mxu1 %vm969_vm1, %v7371_v49  ;;  %v1904_v44 = vsel %vm1320_vm4, %v1902_v57, %v1903_v62 }
 0x1d2   :  { %6154 = vmatprep.subr.bf16.mxu1 %v6153_v13 }
 0x1d4   :  { %5724 = vmatmul.mubr.msk.f32.gmra.mrb[26].mxu1 %vm969_vm1, %v7378_v53 }
 0x1d5   :  { %5726 = vmatprep.mubr.msk.f32.mxu1 %vm969_vm1, %v7385_v34 }
 0x1d8   :  { %5727 = vmatmul.mubr.msk.f32.gmra.mrb[28].mxu1 %vm969_vm1, %v7392_v42 }
 0x1d9   :  { %5729 = vmatprep.mubr.msk.f32.mxu1 %vm969_vm1, %v7397_v12 }
 0x1dc   :  { %5730 = vmatmul.mubr.msk.f32.gmra.mrb[30].mxu1 %vm969_vm1, %v1904_v44 }
 0x1dd   :  { %5732 = vmatprep.mubr.msk.f32.mxu1 %vm969_vm1, %v7408_v1  ;;  %v1907_v1 = vsel %vm1320_vm4, %v1905_v2, %v1906_v27 }
 0x1e0   :  { %5733 = vmatmul.mubr.msk.f32.gmra.mrb[32].mxu1 %vm969_vm1, %v7415_v35 }
 0x1e1   :  { %5735 = vmatprep.mubr.msk.f32.mxu1 %vm969_vm1, %v7422_v59 }
 0x1e4   :  { %5736 = vmatmul.mubr.msk.f32.gmra.mrb[34].mxu1 %vm969_vm1, %v7429_v22 }
 0x1e5   :  { %5738 = vmatprep.mubr.msk.f32.mxu1 %vm969_vm1, %v7436_v36 }
 0x1e8   :  { %5739 = vmatmul.mubr.msk.f32.gmra.mrb[36].mxu1 %vm969_vm1, %v7443_v39 }
 0x1e9   :  { %5741 = vmatprep.mubr.msk.f32.mxu1 %vm969_vm1, %v7448_v48 }
 0x1ec   :  { %5742 = vmatmul.mubr.msk.f32.gmra.mrb[38].mxu1 %vm969_vm1, %v1907_v1 }
 0x1ed   :  { %5748 = vmatprep.mubr.msk.f32.mxu1 %vm969_vm1, %v7081_v31  ;;  %v2684_v31 = vld [vmem:[%s8428_s6 + $0x8] sm:$0xff] }
 0x1f0   :  { %5749 = vmatmul.mubr.msk.f32.vlgmr.msra.gmra.mrb[24].mxu1 %vm969_vm1, %v7112_v56  ;;  %v7699_v56 = vld [vmem:[%s8427_s5] ss:$0 sm:$0xff] }
 0x1f1   :  { %6156 = vmatpush3.bf16.msra.mxu1 %v6153_v13  ;;  %5751 = vmatprep.mubr.msk.f32.mxu1 %vm969_vm1, %v7104_v11 }
 0x1f2   :  { %6158 = vmatprep.subr.bf16.mxu1 %v6157_v37 }
 0x1f4   :  { %5752 = vmatmul.mubr.msk.f32.gmra.mrb[26].mxu1 %vm969_vm1, %v7141_v3 }
 0x1f5   :  { %5754 = vmatprep.mubr.msk.f32.mxu1 %vm969_vm1, %v7130_v0 }
 0x1f8   :  { %5755 = vmatmul.mubr.msk.f32.gmra.mrb[28].mxu1 %vm969_vm1, %v7174_v19 }
 0x1f9   :  { %5757 = vmatprep.mubr.msk.f32.mxu1 %vm969_vm1, %v7474_v5 }
 0x1fc   :  { %5758 = vmatmul.mubr.f32.gmra.mrb[30].mxu1 %v8460_v14 }
 0x1fd   :  { %5760 = vmatprep.mubr.msk.f32.mxu1 %vm969_vm1, %v7199_v58 }
 0x200   :  { %5761 = vmatmul.mubr.msk.f32.gmra.mrb[32].mxu1 %vm969_vm1, %v7223_v18 }
 0x201   :  { %5763 = vmatprep.mubr.msk.f32.mxu1 %vm969_vm1, %v7232_v51 }
 0x204   :  { %5764 = vmatmul.mubr.msk.f32.gmra.mrb[34].mxu1 %vm969_vm1, %v7250_v7  ;;  %v3146_v7 = vld [vmem:[%s8428_s6 + $0x28] sm:$0xff] }
 0x205   :  { %5766 = vmatprep.mubr.msk.f32.mxu1 %vm969_vm1, %v7260_v25 }
 0x208   :  { %5767 = vmatmul.mubr.msk.f32.gmra.mrb[36].mxu1 %vm969_vm1, %v7268_v38 }
 0x209   :  { %5769 = vmatprep.mubr.msk.f32.mxu1 %vm969_vm1, %v7494_v26 }
 0x20c   :  { %5770 = vmatmul.mubr.f32.gmra.mrb[38].mxu1 %v8460_v14 }
 0x20d   :  { %5776 = vmatprep.mubr.msk.f32.mxu1 %vm969_vm1, %v7134_v55 }
 0x210   :  { %5777 = vmatmul.mubr.msk.f32.vlgmr.msra.gmra.mrb[24].mxu1 %vm969_vm1, %v7154_v4 }
 0x211   :  { %6160 = vmatpush3.bf16.msra.mxu1 %v6157_v37  ;;  %5779 = vmatprep.mubr.msk.f32.mxu1 %vm969_vm1, %v7170_v17 }
 0x214   :  { %5780 = vmatmul.mubr.msk.f32.gmra.mrb[26].mxu1 %vm969_vm1, %v7179_v45 }
 0x215   :  { %5782 = vmatprep.mubr.msk.f32.mxu1 %vm969_vm1, %v7205_v40 }
 0x218   :  { %5783 = vmatmul.mubr.msk.f32.gmra.mrb[28].mxu1 %vm969_vm1, %v7216_v61 }
 0x219   :  { %5785 = vmatprep.mubr.msk.f32.mxu1 %vm969_vm1, %v7521_v24 }
 0x21c   :  { %5786 = vmatmul.mubr.msk.f32.gmra.mrb[30].mxu1 %vm969_vm1, %v6855_v10 }
 0x21d   :  { %5788 = vmatprep.mubr.msk.f32.mxu1 %vm969_vm1, %v7245_v8  ;;  %v3145_v8 = vld [vmem:[%s8428_s6 + $0x20] sm:$0xff] }
 0x220   :  { %5789 = vmatmul.mubr.msk.f32.gmra.mrb[32].mxu1 %vm969_vm1, %v7271_v43 }
 0x221   :  { %5791 = vmatprep.mubr.msk.f32.mxu1 %vm969_vm1, %v7278_v9  ;;  %v2683_v9 = vld [vmem:[%s8428_s6] sm:$0xff] }
 0x222   :  { %v6165_v11 = vpack.c.bf16 %v2684_v31, %v2683_v9 }
 0x224   :  { %5792 = vmatmul.mubr.msk.f32.gmra.mrb[34].mxu1 %vm969_vm1, %v7288_v15  ;;  %6166 = vmatprep.subr.bf16.mxu0 %v6165_v11 }
 0x225   :  { %5794 = vmatprep.mubr.msk.f32.mxu1 %vm969_vm1, %v7295_v54 }
 0x228   :  { %5795 = vmatmul.mubr.msk.f32.gmra.mrb[36].mxu1 %vm969_vm1, %v7300_v60 }
 0x229   :  { %5797 = vmatprep.mubr.msk.f32.mxu1 %vm969_vm1, %v7542_v63 }
 0x22c   :  { %5798 = vmatmul.mubr.msk.f32.gmra.mrb[38].mxu1 %vm969_vm1, %v6855_v10 }
 0x22d   :  { %5804 = vmatprep.mubr.msk.f32.mxu1 %vm969_vm1, %v7364_v46 }
 0x230   :  { %5805 = vmatmul.mubr.msk.f32.vlgmr.msra.gmra.mrb[24].mxu1 %vm969_vm1, %v7371_v49 }
 0x231   :  { %5807 = vmatprep.mubr.msk.f32.mxu1 %vm969_vm1, %v7378_v53 }
 0x234   :  { %5808 = vmatmul.mubr.msk.f32.gmra.mrb[26].mxu1 %vm969_vm1, %v7385_v34 }
 0x235   :  { %5810 = vmatprep.mubr.msk.f32.mxu1 %vm969_vm1, %v7392_v42 }
 0x238   :  { %5811 = vmatmul.mubr.msk.f32.gmra.mrb[28].mxu1 %vm969_vm1, %v7397_v12 }
 0x239   :  { %5813 = vmatprep.mubr.msk.f32.mxu1 %vm969_vm1, %v1904_v44 }
 0x23c   :  { %5814 = vmatmul.mubr.msk.f32.gmra.mrb[30].mxu1 %vm969_vm1, %v7340_v50 }
 0x23d   :  { %5816 = vmatprep.mubr.msk.f32.mxu1 %vm969_vm1, %v7415_v35  ;;  %v7727_v35 = vpack.c.bf16 %v3146_v7, %v3145_v8 }
 0x240   :  { %5817 = vmatmul.mubr.msk.f32.gmra.mrb[32].mxu1 %vm969_vm1, %v7422_v59 }
 0x241   :  { %5819 = vmatprep.mubr.msk.f32.mxu1 %vm969_vm1, %v7429_v22 }
 0x244   :  { %5820 = vmatmul.mubr.msk.f32.gmra.mrb[34].mxu1 %vm969_vm1, %v7436_v36 }
 0x245   :  { %5822 = vmatprep.mubr.msk.f32.mxu1 %vm969_vm1, %v7443_v39 }
 0x248   :  { %5823 = vmatmul.mubr.msk.f32.gmra.mrb[36].mxu1 %vm969_vm1, %v7448_v48 }
 0x249   :  { %5825 = vmatprep.mubr.msk.f32.mxu1 %vm969_vm1, %v1907_v1 }
 0x24c   :  { %5826 = vmatmul.mubr.msk.f32.gmra.mrb[38].mxu1 %vm969_vm1, %v7340_v50 }
 0x24d   :  { %6084 = vmatprep.mubr.msk.f32.mxu1 %vm6508_vm5, %v8460_v14 }
 0x303   :  { %v5806_v0 = vpop.f32.mrb[24].mxu1 }
 0x304   :  { %v2572_v55 = vadd.f32 %v5806_v0, %v7699_v56  ;;  %v2469_v3 = vpop.f32.mrb[25].mxu1 }
 0x305   :  { %v2571_v46 = vadd.f32 %v7699_v56, %v2469_v3 }
 0x306   :  { %v2588_v4 = vmax.f32 %v2572_v55, 0.0 }
 0x307   :  { %v2587_v17 = vmax.f32 %v2571_v46, 0.0  ;;  %v5809_v19 = vpop.f32.mrb[26].mxu1 }
 0x308   :  { %v2620_v45 = vrot.slane %v2588_v4, 7  ;;  %v2574_v58 = vadd.f32 %v5809_v19, %v7699_v56  ;;  %v2479_v40 = vpop.f32.mrb[27].mxu1 }
 0x309   :  { %v2619_v61 = vrot.slane %v2587_v17, 7  ;;  %v2573_v18 = vadd.f32 %v7699_v56, %v2479_v40 }
 0x30a   :  { %v2590_v51 = vmax.f32 %v2574_v58, 0.0  ;;  %v7718_v15 = vsel %vm858_vm2, 0.0, %v2620_v45  ;;  %v7721_v54 = vsel %vm858_vm2, %v2620_v45, 0.0 }
 0x30b   :  { %v7712_v25 = vsel %vm858_vm2, 0.0, %v2619_v61  ;;  %v7715_v38 = vsel %vm858_vm2, %v2619_v61, 0.0  ;;  %v5812_v43 = vpop.f32.mrb[28].mxu1  ;;  %v2589_v34 = vmax.f32 %v2573_v18, 0.0  ;;  %v2717_v36 = vrot.slane %v7721_v54, 1 }
 0x30c   :  { %v2713_v60 = vrot.slane %v7712_v25, 1  ;;  %v2714_v49 = vrot.slane %v7715_v38, 1  ;;  %v2489_v53 = vpop.f32.mrb[29].mxu1  ;;  %v2576_v42 = vadd.f32 %v5812_v43, %v7699_v56  ;;  %v2622_v59 = vrot.slane %v2590_v51, 7 }
 0x30d   :  { %v2575_v12 = vadd.f32 %v7699_v56, %v2489_v53  ;;  %v2621_v39 = vrot.slane %v2589_v34, 7  ;;  %v2716_v26 = vrot.slane %v7718_v15, 1 }
 0x30e   :  { %v7730_v22 = vsel %vm922_vm3, %v2713_v60, %v2714_v49  ;;  %v2592_v48 = vmax.f32 %v2576_v42, 0.0  ;;  %v7742_v28 = vsel %vm858_vm2, %v2622_v59, 0.0  ;;  %v7748_v62 = vsel %vm858_vm2, 0.0, %v2622_v59 }
 0x30f   :  { %v5815_v5 = vpop.f32.mrb[30].mxu1  ;;  %5833 = vmatmul.mubr.msk.f32.vlgmr.msra.gmra.mrb[40].mxu0 %vm969_vm1, %v7730_v22  ;;  %v2591_v24 = vmax.f32 %v2575_v12, 0.0  ;;  %v7745_v13 = vsel %vm858_vm2, %v2621_v39, 0.0  ;;  %v7751_v44 = vsel %vm858_vm2, 0.0, %v2621_v39  ;;  %v7754_v27 = vsel %vm922_vm3, %v2716_v26, %v2717_v36 }
 0x310   :  { %v7737_v63 = vadd.f32 %v5815_v5, %v7699_v56  ;;  %6168 = vmatpush3.bf16.msra.mxu0 %v6165_v11  ;;  %v2499_v29 = vpop.f32.mrb[31].mxu1  ;;  %v2624_v23 = vrot.slane %v2592_v48, 7  ;;  %5835 = vmatprep.mubr.msk.f32.mxu0 %vm969_vm1, %v7754_v27  ;;  %v2723_v9 = vrot.slane %v7742_v28, 1  ;;  %v2720_v31 = vrot.slane %v7745_v13, 1 }
 0x311   :  { %v2577_v6 = vadd.f32 %v7699_v56, %v2499_v29  ;;  %6170 = vmatprep.subr.bf16.mxu0 %v7727_v35  ;;  %v2623_v57 = vrot.slane %v2591_v24, 7  ;;  %v2719_v3 = vrot.slane %v7751_v44, 1  ;;  %v2722_v4 = vrot.slane %v7748_v62, 1 }
 0x312   :  { %v7767_v11 = vsel %vm858_vm2, %v2624_v23, 0.0  ;;  %v7774_v17 = vsel %vm858_vm2, 0.0, %v2624_v23  ;;  %v3113_v47 = vrot.slane %v7742_v28, 2  ;;  %v3112_v32 = vrot.slane %v7748_v62, 2 }
 0x313   :  { %v2593_v2 = vmax.f32 %v2577_v6, 0.0  ;;  %v5818_v1 = vpop.f32.mrb[32].mxu1  ;;  %v7757_v20 = vsel %vm858_vm2, 0.0, %v2623_v57  ;;  %v7760_v30 = vsel %vm858_vm2, %v2623_v57, 0.0  ;;  %v2729_v40 = vrot.slane %v7767_v11, 1 }
 0x314   :  { %v2509_v37 = vpop.f32.mrb[33].mxu1  ;;  %v2580_v55 = vadd.f32 %v5818_v1, %v7699_v56  ;;  %v2726_v19 = vrot.slane %v7760_v30, 1  ;;  %v2725_v58 = vrot.slane %v7757_v20, 1  ;;  %v7786_v7 = vsel %vm922_vm3, %v2719_v3, %v2720_v31 }
 0x315   :  { %v2625_v0 = vrot.slane %v2593_v2, 7  ;;  %v2579_v46 = vadd.f32 %v7699_v56, %v2509_v37  ;;  %5836 = vmatmul.mubr.msk.f32.gmra.mrb[42].mxu0 %vm969_vm1, %v7786_v7  ;;  %v7791_v60 = vsel %vm922_vm3, %v2722_v4, %v2723_v9  ;;  %v2728_v34 = vrot.slane %v7774_v17, 1 }
 0x316   :  { %v2596_v8 = vmax.f32 %v2580_v55, 0.0  ;;  %5838 = vmatprep.mubr.msk.f32.mxu0 %vm969_vm1, %v7791_v60  ;;  %v7800_v36 = vsel %vm922_vm3, %v2725_v58, %v2726_v19  ;;  %v3115_v28 = vrot.slane %v7757_v20, 2 }
 0x317   :  { %v5821_v45 = vpop.f32.mrb[34].mxu1  ;;  %v7780_v61 = vsel %vm858_vm2, %v2625_v0, 0.0  ;;  %v7783_v51 = vsel %vm858_vm2, 0.0, %v2625_v0  ;;  %v2595_v43 = vmax.f32 %v2579_v46, 0.0  ;;  %v7816_v2 = vsel %vm922_vm3, %v2728_v34, %v2729_v40 }
 0x318   :  { %v2519_v18 = vpop.f32.mrb[35].mxu1  ;;  %v2582_v49 = vadd.f32 %v5821_v45, %v7699_v56  ;;  %v2732_v42 = vrot.slane %v7780_v61, 1  ;;  %v2628_v12 = vrot.slane %v2596_v8, 7  ;;  %v2731_v24 = vrot.slane %v7783_v51, 1 }
 0x319   :  { %v2581_v53 = vadd.f32 %v7699_v56, %v2519_v18  ;;  %v2627_v59 = vrot.slane %v2595_v43, 7  ;;  %5839 = vmatmul.mubr.msk.f32.gmra.mrb[44].mxu0 %vm969_vm1, %v7800_v36 }
 0x31a   :  { %v2598_v48 = vmax.f32 %v2582_v49, 0.0  ;;  %v7811_v57 = vsel %vm858_vm2, %v2628_v12, 0.0  ;;  %5841 = vmatprep.mubr.msk.f32.mxu0 %vm969_vm1, %v7816_v2  ;;  %v7823_v3 = vsel %vm922_vm3, %v2731_v24, %v2732_v42  ;;  %v7830_v45 = vsel %vm858_vm2, 0.0, %v2628_v12 }
 0x31b   :  { %v5824_v39 = vpop.f32.mrb[36].mxu1  ;;  %v2597_v5 = vmax.f32 %v2581_v53, 0.0  ;;  %v7805_v23 = vsel %vm858_vm2, 0.0, %v2627_v59  ;;  %v7808_v6 = vsel %vm858_vm2, %v2627_v59, 0.0  ;;  %v2738_v18 = vrot.slane %v7811_v57, 1 }
 0x31c   :  { %v2584_v26 = vadd.f32 %v5824_v39, %v7699_v56  ;;  %v2529_v29 = vpop.f32.mrb[37].mxu1  ;;  %v2734_v1 = vrot.slane %v7805_v23, 1  ;;  %v2735_v37 = vrot.slane %v7808_v6, 1  ;;  %v2630_v9 = vrot.slane %v2598_v48, 7 }
 0x31d   :  { %v2629_v31 = vrot.slane %v2597_v5, 7  ;;  %v2583_v46 = vadd.f32 %v7699_v56, %v2529_v29  ;;  %5842 = vmatmul.mubr.msk.f32.gmra.mrb[46].mxu0 %vm969_vm1, %v7823_v3  ;;  %v2737_v59 = vrot.slane %v7830_v45, 1 }
 0x31e   :  { %v2600_v55 = vmax.f32 %v2584_v26, 0.0  ;;  %v7840_v8 = vsel %vm858_vm2, 0.0, %v2630_v9  ;;  %v7843_v43 = vsel %vm858_vm2, %v2630_v9, 0.0  ;;  %5844 = vmatprep.mubr.msk.f32.mxu0 %vm969_vm1, %v6855_v10  ;;  %v7851_v42 = vsel %vm922_vm3, %v2734_v1, %v2735_v37 }
 0x31f   :  { %v5827_v0 = vpop.f32.mrb[38].mxu1  ;;  %v7833_v58 = vsel %vm858_vm2, 0.0, %v2629_v31  ;;  %v7836_v40 = vsel %vm858_vm2, %v2629_v31, 0.0  ;;  %v2599_v34 = vmax.f32 %v2583_v46, 0.0  ;;  %v2744_v48 = vrot.slane %v7843_v43, 1 }
 0x320   :  { %v7827_v4 = vadd.f32 %v5827_v0, %v7699_v56  ;;  %v2539_v19 = vpop.f32.mrb[39].mxu1  ;;  %v2741_v49 = vrot.slane %v7836_v40, 1  ;;  %v2632_v53 = vrot.slane %v2600_v55, 7  ;;  %v2740_v39 = vrot.slane %v7833_v58, 1 }
 0x321   :  { %v2585_v12 = vadd.f32 %v7699_v56, %v2539_v19  ;;  %v2631_v5 = vrot.slane %v2599_v34, 7  ;;  %5845 = vmatmul.mubr.msk.f32.gmra.mrb[48].mxu0 %vm969_vm1, %v7851_v42  ;;  %v7863_v29 = vsel %vm922_vm3, %v2737_v59, %v2738_v18  ;;  %v2743_v1 = vrot.slane %v7840_v8, 1 }
 0x322   :  { %v7858_v26 = vsel %vm858_vm2, 0.0, %v2632_v53  ;;  %v7867_v56 = vsel %vm858_vm2, %v2632_v53, 0.0  ;;  %5847 = vmatprep.mubr.msk.f32.mxu0 %vm969_vm1, %v7863_v29  ;;  %v7878_v31 = vsel %vm922_vm3, %v2740_v39, %v2741_v49 }
 0x323   :  { %v2601_v24 = vmax.f32 %v2585_v12, 0.0  ;;  %v7870_v37 = vsel %vm858_vm2, 0.0, %v2631_v5  ;;  %v7873_v9 = vsel %vm858_vm2, %v2631_v5, 0.0  ;;  %v2750_v19 = vrot.slane %v7867_v56, 1 }
 0x324   :  { %v2747_v0 = vrot.slane %v7873_v9, 1  ;;  %v2746_v46 = vrot.slane %v7870_v37, 1  ;;  %v7886_v18 = vsel %vm922_vm3, %v2743_v1, %v2744_v48  ;;  %v2749_v53 = vrot.slane %v7858_v26, 1  ;;  %v3337_v1 = vld [vmem:[%s8428_s6 + $0x38] sm:$0xff] }
 0x325   :  { %v2633_v55 = vrot.slane %v2601_v24, 7  ;;  %5848 = vmatmul.mubr.msk.f32.gmra.mrb[50].mxu0 %vm969_vm1, %v7878_v31  ;;  %v3336_v24 = vld [vmem:[%s8428_s6 + $0x30] sm:$0xff] }
 0x326   :  { %5850 = vmatprep.mubr.msk.f32.mxu0 %vm969_vm1, %v7886_v18  ;;  %v7898_v12 = vsel %vm922_vm3, %v2746_v46, %v2747_v0  ;;  %v7905_v48 = vsel %vm922_vm3, %v2749_v53, %v2750_v19  ;;  %v6173_v0 = vpack.c.bf16 %v3337_v1, %v3336_v24  ;;  %v3513_v46 = vld [vmem:[%s8428_s6 + $0x40] sm:$0xff]  ;;  %v3514_v19 = vld [vmem:[%s8428_s6 + $0x48] sm:$0xff]  ;;  %v3107_v53 = vrot.slane %v7721_v54, 2 }
 0x327   :  { %v7890_v34 = vsel %vm858_vm2, 0.0, %v2633_v55  ;;  %v7893_v49 = vsel %vm858_vm2, %v2633_v55, 0.0  ;;  %v3104_v55 = vrot.slane %v7715_v38, 2  ;;  %v3110_v38 = vrot.slane %v7745_v13, 2 }
 0x328   :  { %v2753_v59 = vrot.slane %v7893_v49, 1  ;;  %v2752_v39 = vrot.slane %v7890_v34, 1  ;;  %v3109_v1 = vrot.slane %v7751_v44, 2  ;;  %v3116_v13 = vrot.slane %v7760_v30, 2 }
 0x329   :  { %5851 = vmatmul.mubr.msk.f32.gmra.mrb[52].mxu0 %vm969_vm1, %v7898_v12  ;;  %v3122_v30 = vrot.slane %v7780_v61, 2 }
 0x32a   :  { %5853 = vmatprep.mubr.msk.f32.mxu0 %vm969_vm1, %v7905_v48  ;;  %v7910_v5 = vsel %vm922_vm3, %v2752_v39, %v2753_v59  ;;  %v3106_v59 = vrot.slane %v7718_v15, 2  ;;  %v6177_v39 = vpack.c.bf16 %v3514_v19, %v3513_v46  ;;  %v7986_v46 = vsel %vm1320_vm4, %v3112_v32, %v3113_v47 }
 0x32b   :  { %v7993_v19 = vsel %vm1320_vm4, %v3115_v28, %v3116_v13  ;;  %v3124_v47 = vrot.slane %v7805_v23, 2  ;;  %v3125_v32 = vrot.slane %v7808_v6, 2  ;;  %v3130_v6 = vrot.slane %v7833_v58, 2 }
 0x32c   :  { %v7972_v54 = vsel %vm1320_vm4, %v3106_v59, %v3107_v53  ;;  %v3121_v53 = vrot.slane %v7783_v51, 2  ;;  %v3128_v59 = vrot.slane %v7811_v57, 2  ;;  %v3134_v28 = vrot.slane %v7843_v43, 2 }
 0x32d   :  { %5854 = vmatmul.mubr.msk.f32.gmra.mrb[54].mxu0 %vm969_vm1, %v7910_v5  ;;  %v8016_v13 = vsel %vm1320_vm4, %v3124_v47, %v3125_v32  ;;  %v3140_v43 = vrot.slane %v7867_v56, 2  ;;  %v3139_v47 = vrot.slane %v7858_v26, 2 }
 0x32e   :  { %5860 = vmatprep.mubr.f32.mxu0 %v8460_v14  ;;  %v8006_v61 = vsel %vm1320_vm4, %v3121_v53, %v3122_v30  ;;  %v3136_v30 = vrot.slane %v7870_v37, 2 }
 0x32f   :  { %v8050_v56 = vsel %vm1320_vm4, %v3139_v47, %v3140_v43 }
 0x331   :  { %5861 = vmatmul.mubr.msk.f32.vlgmr.msra.gmra.mrb[40].mxu0 %vm969_vm1, %v7712_v25 }
 0x332   :  { %6172 = vmatpush3.bf16.msra.mxu0 %v7727_v35  ;;  %5863 = vmatprep.mubr.msk.f32.mxu0 %vm969_vm1, %v7718_v15  ;;  %v3103_v35 = vrot.slane %v7712_v25, 2 }
 0x333   :  { %6174 = vmatprep.subr.bf16.mxu0 %v6173_v0 }
 0x334   :  { %v7965_v24 = vsel %vm1320_vm4, %v3103_v35, %v3104_v55  ;;  %v7979_v35 = vsel %vm1320_vm4, %v3109_v1, %v3110_v38  ;;  %v3119_v55 = vrot.slane %v7767_v11, 2  ;;  %v3127_v38 = vrot.slane %v7830_v45, 2 }
 0x335   :  { %5864 = vmatmul.mubr.msk.f32.gmra.mrb[42].mxu0 %vm969_vm1, %v7751_v44  ;;  %v3131_v1 = vrot.slane %v7836_v40, 2  ;;  %v3137_v40 = vrot.slane %v7873_v9, 2  ;;  %v3143_v9 = vrot.slane %v7893_v49, 2  ;;  %v3686_v49 = vld [vmem:[%s8428_s6 + $0x50] sm:$0xff] }
 0x336   :  { %5866 = vmatprep.mubr.msk.f32.mxu0 %vm969_vm1, %v7748_v62  ;;  %v8023_v57 = vsel %vm1320_vm4, %v3127_v38, %v3128_v59  ;;  %v3142_v59 = vrot.slane %v7890_v34, 2 }
 0x337   :  { %v8044_v32 = vsel %vm1320_vm4, %v3136_v30, %v3137_v40  ;;  %v3854_v40 = vld [vmem:[%s8428_s6 + $0x68] sm:$0xff] }
 0x338   :  { %v8055_v38 = vsel %vm1320_vm4, %v3142_v59, %v3143_v9 }
 0x339   :  { %5867 = vmatmul.mubr.msk.f32.gmra.mrb[44].mxu0 %vm969_vm1, %v7757_v20 }
 0x33a   :  { %5869 = vmatprep.mubr.msk.f32.mxu0 %vm969_vm1, %v7774_v17 }
 0x33d   :  { %5870 = vmatmul.mubr.msk.f32.gmra.mrb[46].mxu0 %vm969_vm1, %v7783_v51 }
 0x33e   :  { %5872 = vmatprep.mubr.f32.mxu0 %v8460_v14 }
 0x341   :  { %5873 = vmatmul.mubr.msk.f32.gmra.mrb[48].mxu0 %vm969_vm1, %v7805_v23 }
 0x342   :  { %5875 = vmatprep.mubr.msk.f32.mxu0 %vm969_vm1, %v7830_v45 }
 0x345   :  { %5876 = vmatmul.mubr.msk.f32.gmra.mrb[50].mxu0 %vm969_vm1, %v7833_v58 }
 0x346   :  { %5878 = vmatprep.mubr.msk.f32.mxu0 %vm969_vm1, %v7840_v8 }
 0x349   :  { %5879 = vmatmul.mubr.msk.f32.gmra.mrb[52].mxu0 %vm969_vm1, %v7870_v37 }
 0x34a   :  { %5881 = vmatprep.mubr.msk.f32.mxu0 %vm969_vm1, %v7858_v26 }
 0x34d   :  { %5882 = vmatmul.mubr.msk.f32.gmra.mrb[54].mxu0 %vm969_vm1, %v7890_v34 }
 0x34e   :  { %5888 = vmatprep.mubr.msk.f32.mxu0 %vm969_vm1, %v7340_v50 }
 0x351   :  { %5889 = vmatmul.mubr.msk.f32.vlgmr.msra.gmra.mrb[40].mxu0 %vm969_vm1, %v7965_v24 }
 0x352   :  { %6176 = vmatpush3.bf16.msra.mxu0 %v6173_v0  ;;  %5891 = vmatprep.mubr.msk.f32.mxu0 %vm969_vm1, %v7972_v54  ;;  %v3118_v0 = vrot.slane %v7774_v17, 2 }
 0x353   :  { %6178 = vmatprep.subr.bf16.mxu0 %v6177_v39 }
 0x354   :  { %v7999_v11 = vsel %vm1320_vm4, %v3118_v0, %v3119_v55  ;;  %v3133_v55 = vrot.slane %v7840_v8, 2  ;;  %v8030_v0 = vsel %vm1320_vm4, %v3130_v6, %v3131_v1  ;;  %v3687_v1 = vld [vmem:[%s8428_s6 + $0x58] sm:$0xff] }
 0x355   :  { %5892 = vmatmul.mubr.msk.f32.gmra.mrb[42].mxu0 %vm969_vm1, %v7979_v35  ;;  %v6181_v6 = vpack.c.bf16 %v3687_v1, %v3686_v49 }
 0x356   :  { %5894 = vmatprep.mubr.msk.f32.mxu0 %vm969_vm1, %v7986_v46  ;;  %v8037_v53 = vsel %vm1320_vm4, %v3133_v55, %v3134_v28  ;;  %v2594_v28 = vmax.f32 %v7737_v63, 0.0  ;;  %v2602_v63 = vmax.f32 %v7827_v4, 0.0  ;;  %v3853_v4 = vld [vmem:[%s8428_s6 + $0x60] sm:$0xff] }
 0x357   :  { %v6185_v30 = vpack.c.bf16 %v3854_v40, %v3853_v4 }
 0x358   :  { %v2626_v55 = vrot.slane %v2594_v28, 7  ;;  %v4017_v28 = vld [vmem:[%s8428_s6 + $0x78] sm:$0xff] }
 0x359   :  { %5895 = vmatmul.mubr.msk.f32.gmra.mrb[44].mxu0 %vm969_vm1, %v7993_v19 }
 0x35a   :  { %5897 = vmatprep.mubr.msk.f32.mxu0 %vm969_vm1, %v7999_v11  ;;  %v2674_v43 = vsel %vm858_vm2, %v2626_v55, 0.0 }
 0x35b   :  { %v3508_v47 = vrot.slane %v2674_v43, 1 }
 0x35d   :  { %5898 = vmatmul.mubr.msk.f32.gmra.mrb[46].mxu0 %vm969_vm1, %v8006_v61 }
 0x35e   :  { %5900 = vmatprep.mubr.msk.f32.mxu0 %vm969_vm1, %v7340_v50 }
 0x361   :  { %5901 = vmatmul.mubr.msk.f32.gmra.mrb[48].mxu0 %vm969_vm1, %v8016_v13 }
 0x362   :  { %5903 = vmatprep.mubr.msk.f32.mxu0 %vm969_vm1, %v8023_v57 }
 0x365   :  { %5904 = vmatmul.mubr.msk.f32.gmra.mrb[50].mxu0 %vm969_vm1, %v8030_v0 }
 0x366   :  { %5906 = vmatprep.mubr.msk.f32.mxu0 %vm969_vm1, %v8037_v53 }
 0x369   :  { %5907 = vmatmul.mubr.msk.f32.gmra.mrb[52].mxu0 %vm969_vm1, %v8044_v32 }
 0x36a   :  { %5909 = vmatprep.mubr.msk.f32.mxu0 %vm969_vm1, %v8050_v56 }
 0x36d   :  { %5910 = vmatmul.mubr.msk.f32.gmra.mrb[54].mxu0 %vm969_vm1, %v8055_v38 }
 0x36e   :  { %5916 = vmatprep.mubr.msk.f32.mxu0 %vm969_vm1, %v7712_v25  ;;  %v8081_v25 = vsel %vm858_vm2, 0.0, %v2626_v55 }
 0x371   :  { %5917 = vmatmul.mubr.msk.f32.vlgmr.msra.gmra.mrb[40].mxu0 %vm969_vm1, %v7718_v15 }
 0x372   :  { %6180 = vmatpush3.bf16.msra.mxu0 %v6177_v39  ;;  %5919 = vmatprep.mubr.msk.f32.mxu0 %vm969_vm1, %v7751_v44  ;;  %v2634_v39 = vrot.slane %v2602_v63, 7  ;;  %v3681_v63 = vrot.slane %v2674_v43, 2  ;;  %v4180_v43 = vld [vmem:[%s8428_s6 + $0x88] sm:$0xff] }
 0x373   :  { %6182 = vmatprep.subr.bf16.mxu0 %v6181_v6 }
 0x374   :  { %v2682_v59 = vsel %vm858_vm2, %v2634_v39, 0.0 }
 0x375   :  { %5920 = vmatmul.mubr.msk.f32.gmra.mrb[42].mxu0 %vm969_vm1, %v7748_v62  ;;  %v3511_v49 = vrot.slane %v2682_v59, 1  ;;  %v3684_v4 = vrot.slane %v2682_v59, 2 }
 0x376   :  { %5922 = vmatprep.mubr.msk.f32.mxu0 %vm969_vm1, %v7757_v20 }
 0x379   :  { %5923 = vmatmul.mubr.msk.f32.gmra.mrb[44].mxu0 %vm969_vm1, %v7774_v17 }
 0x37a   :  { %5925 = vmatprep.mubr.msk.f32.mxu0 %vm969_vm1, %v7783_v51 }
 0x37d   :  { %5926 = vmatmul.mubr.msk.f32.gmra.mrb[46].mxu0 %vm969_vm1, %v8081_v25 }
 0x37e   :  { %5928 = vmatprep.mubr.msk.f32.mxu0 %vm969_vm1, %v7805_v23  ;;  %v8101_v23 = vsel %vm858_vm2, 0.0, %v2634_v39  ;;  %v3680_v39 = vrot.slane %v8081_v25, 2 }
 0x37f   :  { %v3510_v1 = vrot.slane %v8101_v23, 1  ;;  %v3683_v40 = vrot.slane %v8101_v23, 2 }
 0x381   :  { %5929 = vmatmul.mubr.msk.f32.gmra.mrb[48].mxu0 %vm969_vm1, %v7830_v45 }
 0x382   :  { %5931 = vmatprep.mubr.msk.f32.mxu0 %vm969_vm1, %v7833_v58 }
 0x385   :  { %5932 = vmatmul.mubr.msk.f32.gmra.mrb[50].mxu0 %vm969_vm1, %v7840_v8 }
 0x386   :  { %5934 = vmatprep.mubr.msk.f32.mxu0 %vm969_vm1, %v7870_v37 }
 0x389   :  { %5935 = vmatmul.mubr.msk.f32.gmra.mrb[52].mxu0 %vm969_vm1, %v7858_v26 }
 0x38a   :  { %5937 = vmatprep.mubr.msk.f32.mxu0 %vm969_vm1, %v7890_v34 }
 0x38d   :  { %5938 = vmatmul.mubr.msk.f32.gmra.mrb[54].mxu0 %vm969_vm1, %v8101_v23 }
 0x38e   :  { %5944 = vmatprep.mubr.msk.f32.mxu0 %vm969_vm1, %v7730_v22  ;;  %v3507_v22 = vrot.slane %v8081_v25, 1 }
 0x390   :  { %v8128_v9 = vsel %vm922_vm3, %v3507_v22, %v3508_v47 }
 0x391   :  { %5945 = vmatmul.mubr.msk.f32.vlgmr.msra.gmra.mrb[40].mxu0 %vm969_vm1, %v7754_v27 }
 0x392   :  { %6184 = vmatpush3.bf16.msra.mxu0 %v6181_v6  ;;  %5947 = vmatprep.mubr.msk.f32.mxu0 %vm969_vm1, %v7786_v7  ;;  %v4016_v6 = vld [vmem:[%s8428_s6 + $0x70] sm:$0xff] }
 0x393   :  { %6186 = vmatprep.subr.bf16.mxu0 %v6185_v30  ;;  %v6189_v55 = vpack.c.bf16 %v4017_v28, %v4016_v6 }
 0x395   :  { %5948 = vmatmul.mubr.msk.f32.gmra.mrb[42].mxu0 %vm969_vm1, %v7791_v60 }
 0x396   :  { %5950 = vmatprep.mubr.msk.f32.mxu0 %vm969_vm1, %v7800_v36 }
 0x399   :  { %5951 = vmatmul.mubr.msk.f32.gmra.mrb[44].mxu0 %vm969_vm1, %v7816_v2 }
 0x39a   :  { %5953 = vmatprep.mubr.msk.f32.mxu0 %vm969_vm1, %v7823_v3 }
 0x39d   :  { %5954 = vmatmul.mubr.msk.f32.gmra.mrb[46].mxu0 %vm969_vm1, %v8128_v9 }
 0x39e   :  { %5956 = vmatprep.mubr.msk.f32.mxu0 %vm969_vm1, %v7851_v42  ;;  %v8149_v42 = vsel %vm922_vm3, %v3510_v1, %v3511_v49 }
 0x3a1   :  { %5957 = vmatmul.mubr.msk.f32.gmra.mrb[48].mxu0 %vm969_vm1, %v7863_v29 }
 0x3a2   :  { %5959 = vmatprep.mubr.msk.f32.mxu0 %vm969_vm1, %v7878_v31 }
 0x3a5   :  { %5960 = vmatmul.mubr.msk.f32.gmra.mrb[50].mxu0 %vm969_vm1, %v7886_v18 }
 0x3a6   :  { %5962 = vmatprep.mubr.msk.f32.mxu0 %vm969_vm1, %v7898_v12 }
 0x3a9   :  { %5963 = vmatmul.mubr.msk.f32.gmra.mrb[52].mxu0 %vm969_vm1, %v7905_v48 }
 0x3aa   :  { %5965 = vmatprep.mubr.msk.f32.mxu0 %vm969_vm1, %v7910_v5 }
 0x3ad   :  { %5966 = vmatmul.mubr.msk.f32.gmra.mrb[54].mxu0 %vm969_vm1, %v8149_v42 }
 0x3ae   :  { %5972 = vmatprep.mubr.msk.f32.mxu0 %vm969_vm1, %v7965_v24  ;;  %v3682_v24 = vsel %vm1320_vm4, %v3680_v39, %v3681_v63  ;;  %v8464_v39 = vld [vmem:[#allocation5_spill] sm:$0xff] }
 0x3b1   :  { %5973 = vmatmul.mubr.msk.f32.vlgmr.msra.gmra.mrb[40].mxu0 %vm969_vm1, %v7972_v54 }
 0x3b2   :  { %6188 = vmatpush3.bf16.msra.mxu0 %v6185_v30  ;;  %5975 = vmatprep.mubr.msk.f32.mxu0 %vm969_vm1, %v7979_v35  ;;  %v4179_v30 = vld [vmem:[%s8428_s6 + $0x80] sm:$0xff] }
 0x3b3   :  { %6190 = vmatprep.subr.bf16.mxu0 %v6189_v55  ;;  %v6193_v47 = vpack.c.bf16 %v4180_v43, %v4179_v30 }
 0x3b5   :  { %5976 = vmatmul.mubr.msk.f32.gmra.mrb[42].mxu0 %vm969_vm1, %v7986_v46 }
 0x3b6   :  { %5978 = vmatprep.mubr.msk.f32.mxu0 %vm969_vm1, %v7993_v19 }
 0x3b9   :  { %5979 = vmatmul.mubr.msk.f32.gmra.mrb[44].mxu0 %vm969_vm1, %v7999_v11 }
 0x3ba   :  { %5981 = vmatprep.mubr.msk.f32.mxu0 %vm969_vm1, %v8006_v61 }
 0x3bd   :  { %5982 = vmatmul.mubr.msk.f32.gmra.mrb[46].mxu0 %vm969_vm1, %v3682_v24 }
 0x3be   :  { %5984 = vmatprep.mubr.msk.f32.mxu0 %vm969_vm1, %v8016_v13  ;;  %v3685_v13 = vsel %vm1320_vm4, %v3683_v40, %v3684_v4  ;;  %v8465_v40 = vld [vmem:[#allocation6_spill] sm:$0xff] }
 0x3c1   :  { %5985 = vmatmul.mubr.msk.f32.gmra.mrb[48].mxu0 %vm969_vm1, %v8023_v57 }
 0x3c2   :  { %5987 = vmatprep.mubr.msk.f32.mxu0 %vm969_vm1, %v8030_v0 }
 0x3c5   :  { %5988 = vmatmul.mubr.msk.f32.gmra.mrb[50].mxu0 %vm969_vm1, %v8037_v53 }
 0x3c6   :  { %5990 = vmatprep.mubr.msk.f32.mxu0 %vm969_vm1, %v8044_v32 }
 0x3c9   :  { %5991 = vmatmul.mubr.msk.f32.gmra.mrb[52].mxu0 %vm969_vm1, %v8050_v56 }
 0x3ca   :  { %5993 = vmatprep.mubr.msk.f32.mxu0 %vm969_vm1, %v8055_v38 }
 0x3cd   :  { %5994 = vmatmul.mubr.msk.f32.gmra.mrb[54].mxu0 %vm969_vm1, %v3685_v13 }
 0x3ce   :  { %6000 = vmatprep.mubr.msk.f32.mxu0 %vm969_vm1, %v7718_v15  ;;  %v4448_v15 = vld [vmem:[%s8431_s9 + $0x8] sm:$0xff] }
 0x3d1   :  { %6001 = vmatmul.mubr.msk.f32.vlgmr.msra.gmra.mrb[40].mxu0 %vm969_vm1, %v7751_v44 }
 0x3d2   :  { %6192 = vmatpush3.bf16.msra.mxu0 %v6189_v55  ;;  %6003 = vmatprep.mubr.msk.f32.mxu0 %vm969_vm1, %v7748_v62  ;;  %v6507_v62 = vmov 0.0|0.0  }
 0x3d3   :  { %6194 = vmatprep.subr.bf16.mxu0 %v6193_v47  ;;  %6197 = vmatprep.subr.bf16.mxu1 %v6507_v62 }
 0x3d5   :  { %6004 = vmatmul.mubr.msk.f32.gmra.mrb[42].mxu0 %vm969_vm1, %v7757_v20 }
 0x3d6   :  { %6006 = vmatprep.mubr.msk.f32.mxu0 %vm969_vm1, %v7774_v17 }
 0x3d9   :  { %6007 = vmatmul.mubr.msk.f32.gmra.mrb[44].mxu0 %vm969_vm1, %v7783_v51 }
 0x3da   :  { %6009 = vmatprep.mubr.msk.f32.mxu0 %vm969_vm1, %v8081_v25 }
 0x3dd   :  { %6010 = vmatmul.mubr.f32.gmra.mrb[46].mxu0 %v8460_v14 }
 0x3de   :  { %6012 = vmatprep.mubr.msk.f32.mxu0 %vm969_vm1, %v7830_v45 }
 0x3e1   :  { %6013 = vmatmul.mubr.msk.f32.gmra.mrb[48].mxu0 %vm969_vm1, %v7833_v58 }
 0x3e2   :  { %6015 = vmatprep.mubr.msk.f32.mxu0 %vm969_vm1, %v7840_v8 }
 0x3e5   :  { %6016 = vmatmul.mubr.msk.f32.gmra.mrb[50].mxu0 %vm969_vm1, %v7870_v37 }
 0x3e6   :  { %6018 = vmatprep.mubr.msk.f32.mxu0 %vm969_vm1, %v7858_v26 }
 0x3e9   :  { %6019 = vmatmul.mubr.msk.f32.gmra.mrb[52].mxu0 %vm969_vm1, %v7890_v34 }
 0x3ea   :  { %6021 = vmatprep.mubr.msk.f32.mxu0 %vm969_vm1, %v8101_v23  ;;  %v8463_v23 = vld [vmem:[#allocation15_spill] sm:$0xff] }
 0x3ed   :  { %6022 = vmatmul.mubr.f32.gmra.mrb[54].mxu0 %v8460_v14 }
 0x3ee   :  { %6028 = vmatprep.mubr.msk.f32.mxu0 %vm969_vm1, %v7754_v27 }
 0x3f1   :  { %6029 = vmatmul.mubr.msk.f32.vlgmr.msra.gmra.mrb[40].mxu0 %vm969_vm1, %v7786_v7 }
 0x3f2   :  { %6196 = vmatpush3.bf16.msra.mxu0 %v6193_v47  ;;  %6031 = vmatprep.mubr.msk.f32.mxu0 %vm969_vm1, %v7791_v60 }
 0x3f5   :  { %6032 = vmatmul.mubr.msk.f32.gmra.mrb[42].mxu0 %vm969_vm1, %v7800_v36 }
 0x3f6   :  { %6034 = vmatprep.mubr.msk.f32.mxu0 %vm969_vm1, %v7816_v2 }
 0x3f9   :  { %6035 = vmatmul.mubr.msk.f32.gmra.mrb[44].mxu0 %vm969_vm1, %v7823_v3 }
 0x3fa   :  { %6037 = vmatprep.mubr.msk.f32.mxu0 %vm969_vm1, %v8128_v9 }
 0x3fd   :  { %6038 = vmatmul.mubr.msk.f32.gmra.mrb[46].mxu0 %vm969_vm1, %v6855_v10 }
 0x3fe   :  { %6040 = vmatprep.mubr.msk.f32.mxu0 %vm969_vm1, %v7863_v29 }
 0x401   :  { %6041 = vmatmul.mubr.msk.f32.gmra.mrb[48].mxu0 %vm969_vm1, %v7878_v31 }
 0x402   :  { %6043 = vmatprep.mubr.msk.f32.mxu0 %vm969_vm1, %v7886_v18 }
 0x405   :  { %6044 = vmatmul.mubr.msk.f32.gmra.mrb[50].mxu0 %vm969_vm1, %v7898_v12 }
 0x406   :  { %6046 = vmatprep.mubr.msk.f32.mxu0 %vm969_vm1, %v7905_v48 }
 0x409   :  { %6047 = vmatmul.mubr.msk.f32.gmra.mrb[52].mxu0 %vm969_vm1, %v7910_v5 }
 0x40a   :  { %6049 = vmatprep.mubr.msk.f32.mxu0 %vm969_vm1, %v8149_v42 }
 0x40d   :  { %6050 = vmatmul.mubr.msk.f32.gmra.mrb[54].mxu0 %vm969_vm1, %v6855_v10  ;;  %v4447_v10 = vld [vmem:[%s8431_s9] sm:$0xff] }
 0x40e   :  { %6056 = vmatprep.mubr.msk.f32.mxu0 %vm969_vm1, %v7972_v54  ;;  %v6198_v44 = vpack.c.bf16 %v4448_v15, %v4447_v10 }
 0x410   :  { %6199 = vmatpush3.bf16.msra.mxu1 %v6198_v44 }
 0x411   :  { %6057 = vmatmul.mubr.msk.f32.vlgmr.msra.gmra.mrb[40].mxu0 %vm969_vm1, %v7979_v35  ;;  %6200 = vmatprep.subr.bf16.mxu1 %v6507_v62 }
 0x412   :  { %6059 = vmatprep.mubr.msk.f32.mxu0 %vm969_vm1, %v7986_v46  ;;  %v8461_v46 = vld [vmem:[#allocation13_spill] sm:$0xff] }
 0x415   :  { %6060 = vmatmul.mubr.msk.f32.gmra.mrb[42].mxu0 %vm969_vm1, %v7993_v19 }
 0x416   :  { %6062 = vmatprep.mubr.msk.f32.mxu0 %vm969_vm1, %v7999_v11 }
 0x419   :  { %6063 = vmatmul.mubr.msk.f32.gmra.mrb[44].mxu0 %vm969_vm1, %v8006_v61 }
 0x41a   :  { %6065 = vmatprep.mubr.msk.f32.mxu0 %vm969_vm1, %v3682_v24 }
 0x41d   :  { %6066 = vmatmul.mubr.msk.f32.gmra.mrb[46].mxu0 %vm969_vm1, %v7340_v50 }
 0x41e   :  { %6068 = vmatprep.mubr.msk.f32.mxu0 %vm969_vm1, %v8023_v57 }
 0x421   :  { %6069 = vmatmul.mubr.msk.f32.gmra.mrb[48].mxu0 %vm969_vm1, %v8030_v0 }
 0x422   :  { %6071 = vmatprep.mubr.msk.f32.mxu0 %vm969_vm1, %v8037_v53 }
 0x425   :  { %6072 = vmatmul.mubr.msk.f32.gmra.mrb[50].mxu0 %vm969_vm1, %v8044_v32 }
 0x426   :  { %6074 = vmatprep.mubr.msk.f32.mxu0 %vm969_vm1, %v8050_v56 }
 0x429   :  { %6075 = vmatmul.mubr.msk.f32.gmra.mrb[52].mxu0 %vm969_vm1, %v8055_v38  ;;  %v8462_v38 = vld [vmem:[#allocation14_spill] sm:$0xff] }
 0x42a   :  { %6077 = vmatprep.mubr.msk.f32.mxu0 %vm969_vm1, %v3685_v13 }
 0x42d   :  { %6078 = vmatmul.mubr.msk.f32.gmra.mrb[54].mxu0 %vm969_vm1, %v7340_v50  ;;  %v8304_v50 = vld [vmem:[%s8429_s7] ss:$0 sm:$0xff] }
 0x4e4   :  { %v6058_v27 = vpop.f32.mrb[40].mxu0 }
 0x4e5   :  { %v4350_v20 = vadd.f32 %v6058_v27, %v8304_v50  ;;  %v4247_v17 = vpop.f32.mrb[41].mxu0 }
 0x4e6   :  { %v4349_v51 = vadd.f32 %v8304_v50, %v4247_v17 }
 0x4e7   :  { %v4366_v7 = vadd.f32 %v4350_v20, %v7066_v41 }
 0x4e8   :  { %v4365_v60 = vadd.f32 %v4349_v51, %v7072_v52  ;;  %v6061_v36 = vpop.f32.mrb[42].mxu0 }
 0x4e9   :  { %v4382_v2 = vmax.f32 %v4366_v7, 0.0  ;;  %v4352_v3 = vadd.f32 %v6061_v36, %v8304_v50  ;;  %v4257_v45 = vpop.f32.mrb[43].mxu0  ;;  %v8466_v7 = vld [vmem:[#allocation7_spill] sm:$0xff] }
 0x4ea   :  { %v4381_v58 = vmax.f32 %v4365_v60, 0.0  ;;  %v4351_v8 = vadd.f32 %v8304_v50, %v4257_v45 }
 0x4eb   :  { %v4398_v26 = vsel %vm969_vm1, %v4382_v2, 0.0  ;;  %v4368_v29 = vadd.f32 %v4352_v3, %v7084_v21  ;;  %v8467_v2 = vld [vmem:[#allocation8_spill] sm:$0xff] }
 0x4ec   :  { %v4397_v37 = vsel %vm969_vm1, %v4381_v58, 0.0  ;;  %v4367_v31 = vadd.f32 %v4351_v8, %v7093_v33  ;;  %v6064_v18 = vpop.f32.mrb[44].mxu0 }
 0x4ed   :  { %v4399_v41 = vadd.f32 %v4398_v26, %v4397_v37  ;;  %v4354_v52 = vadd.f32 %v6064_v18, %v8304_v50  ;;  %v4267_v34 = vpop.f32.mrb[45].mxu0  ;;  %v4384_v12 = vmax.f32 %v4368_v29, 0.0  ;;  %v8468_v18 = vld [vmem:[#allocation9_spill] sm:$0xff] }
 0x4ee   :  { %v4383_v48 = vmax.f32 %v4367_v31, 0.0  ;;  %v4353_v5 = vadd.f32 %v8304_v50, %v4267_v34  ;;  %v8469_v34 = vld [vmem:[#allocation10_spill] sm:$0xff] }
 0x4ef   :  { %v4370_v54 = vadd.f32 %v4354_v52, %v7107_v16  ;;  %v4402_v57 = vsel %vm969_vm1, %v4384_v12, 0.0 }
 0x4f0   :  { %v4400_v35 = vsel %vm969_vm1, %v4383_v48, 0.0  ;;  %v4369_v19 = vadd.f32 %v4353_v5, %v8461_v46  ;;  %v6067_v21 = vpop.f32.mrb[46].mxu0 }
 0x4f1   :  { %v4401_v11 = vadd.f32 %v4400_v35, %v4399_v41  ;;  %v4356_v61 = vadd.f32 %v6067_v21, %v8304_v50  ;;  %v4277_v33 = vpop.f32.mrb[47].mxu0  ;;  %v4386_v0 = vmax.f32 %v4370_v54, 0.0 }
 0x4f2   :  { %v4385_v53 = vmax.f32 %v4369_v19, 0.0  ;;  %v4355_v32 = vadd.f32 %v8304_v50, %v4277_v33 }
 0x4f3   :  { %v4403_v56 = vadd.f32 %v4402_v57, %v4401_v11  ;;  %v4372_v25 = vadd.f32 %v4356_v61, %v8462_v38  ;;  %v4406_v42 = vsel %vm969_vm1, %v4386_v0, 0.0  ;;  %v8470_v57 = vld [vmem:[#allocation11_spill] sm:$0xff] }
 0x4f4   :  { %v4404_v16 = vsel %vm969_vm1, %v4385_v53, 0.0  ;;  %v4371_v22 = vadd.f32 %v4355_v32, %v8463_v23  ;;  %v6070_v9 = vpop.f32.mrb[48].mxu0  ;;  %v8471_v32 = vld [vmem:[#allocation12_spill] sm:$0xff] }
 0x4f5   :  { %v4405_v59 = vadd.f32 %v4404_v16, %v4403_v56  ;;  %v4358_v49 = vadd.f32 %v6070_v9, %v8304_v50  ;;  %v4287_v1 = vpop.f32.mrb[49].mxu0  ;;  %v4388_v6 = vmax.f32 %v4372_v25, 0.0 }
 0x4f6   :  { %v4387_v28 = vmax.f32 %v4371_v22, 0.0  ;;  %v4357_v55 = vadd.f32 %v8304_v50, %v4287_v1 }
 0x4f7   :  { %v4407_v63 = vadd.f32 %v4406_v42, %v4405_v59  ;;  %v4374_v24 = vadd.f32 %v4358_v49, %v8464_v39  ;;  %v4410_v44 = vsel %vm969_vm1, %v4388_v6, 0.0 }
 0x4f8   :  { %v4408_v4 = vsel %vm969_vm1, %v4387_v28, 0.0  ;;  %v4373_v13 = vadd.f32 %v4357_v55, %v8465_v40  ;;  %v6073_v30 = vpop.f32.mrb[50].mxu0 }
 0x4f9   :  { %v4409_v43 = vadd.f32 %v4408_v4, %v4407_v63  ;;  %v4390_v47 = vmax.f32 %v4374_v24, 0.0  ;;  %v4360_v10 = vadd.f32 %v6073_v30, %v8304_v50  ;;  %v4297_v15 = vpop.f32.mrb[51].mxu0  ;;  %v4444_v30 = vld [vmem:[%s8430_s8 + $0x8] sm:$0xff] }
 0x4fa   :  { %v4389_v27 = vmax.f32 %v4373_v13, 0.0  ;;  %v4359_v20 = vadd.f32 %v8304_v50, %v4297_v15  ;;  %v4443_v13 = vld [vmem:[%s8430_s8] sm:$0xff] }
 0x4fb   :  { %v4411_v17 = vadd.f32 %v4410_v44, %v4409_v43  ;;  %v4419_v51 = vsel %vm969_vm1, %v4390_v47, 0.0  ;;  %v4376_v60 = vadd.f32 %v4360_v10, %v8466_v7  ;;  %v6201_v15 = vpack.c.bf16 %v4444_v30, %v4443_v13  ;;  %v4445_v44 = vld [vmem:[%s8430_s8 + $0x10] sm:$0xff]  ;;  %v4608_v7 = vld [vmem:[%s8433_s11 + $0x8] sm:$0xff] }
 0x4fc   :  { %v4418_v36 = vsel %vm969_vm1, %v4389_v27, 0.0  ;;  %v4375_v3 = vadd.f32 %v4359_v20, %v8467_v2  ;;  %v6076_v45 = vpop.f32.mrb[52].mxu0  ;;  %v4446_v27 = vld [vmem:[%s8430_s8 + $0x18] sm:$0xff]  ;;  %v4609_v2 = vld [vmem:[%s8433_s11 + $0x10] sm:$0xff] }
 0x4fd   :  { %v4420_v58 = vadd.f32 %v4419_v51, %v4418_v36  ;;  %v4362_v8 = vadd.f32 %v6076_v45, %v8304_v50  ;;  %v4307_v26 = vpop.f32.mrb[53].mxu0  ;;  %v4392_v29 = vmax.f32 %v4376_v60, 0.0  ;;  %v4412_v5 = vrot.slane %v4411_v17, 4  ;;  %v4607_v51 = vld [vmem:[%s8433_s11] sm:$0xff] }
 0x4fe   :  { %v4391_v37 = vmax.f32 %v4375_v3, 0.0  ;;  %v4361_v31 = vadd.f32 %v8304_v50, %v4307_v26  ;;  %v4442_v60 = vld [vmem:[%s8423_s1] sm:$0x3]  ;;  %v6207_v36 = vpack.c.bf16 %v4608_v7, %v4607_v51  ;;  %v4610_v3 = vld [vmem:[%s8433_s11 + $0x18] sm:$0xff] }
 0x4ff   :  { %v4378_v41 = vadd.f32 %v4362_v8, %v8468_v18  ;;  %v4423_v19 = vsel %vm969_vm1, %v4392_v29, 0.0  ;;  %v4413_v38 = vadd.f32 %v4412_v5, %v4411_v17  ;;  %v6204_v17 = vpack.c.bf16 %v4446_v27, %v4445_v44  ;;  %v4613_v8 = vld [vmem:[%s8433_s11 + $0x30] sm:$0xff]  ;;  %v4614_v29 = vld [vmem:[%s8433_s11 + $0x38] sm:$0xff] }
 0x500   :  { %v4421_v52 = vsel %vm969_vm1, %v4391_v37, 0.0  ;;  %v4377_v12 = vadd.f32 %v4361_v31, %v8469_v34  ;;  %v6079_v48 = vpop.f32.mrb[54].mxu0  ;;  %v6210_v45 = vpack.c.bf16 %v4610_v3, %v4609_v2  ;;  %v6216_v37 = vpack.c.bf16 %v4614_v29, %v4613_v8 }
 0x501   :  { %v4422_v54 = vadd.f32 %v4421_v52, %v4420_v58  ;;  %v4364_v35 = vadd.f32 %v6079_v48, %v8304_v50  ;;  %v4317_v46 = vpop.f32.mrb[55].mxu0  ;;  %v4394_v21 = vmax.f32 %v4378_v41, 0.0  ;;  %v4414_v49 = vrot.slane %v4413_v38, 2  ;;  %v4611_v58 = vld [vmem:[%s8433_s11 + $0x20] sm:$0xff] }
 0x502   :  { %v4393_v11 = vmax.f32 %v4377_v12, 0.0  ;;  %v4363_v61 = vadd.f32 %v8304_v50, %v4317_v46  ;;  %v5060_v52 = vld [vmem:[%s8432_s10] ss:$0 sm:$0xff] }
 0x503   :  { %v4424_v33 = vadd.f32 %v4423_v19, %v4422_v54  ;;  %v4380_v0 = vadd.f32 %v4364_v35, %v8470_v57  ;;  %v4427_v16 = vsel %vm969_vm1, %v4394_v21, 0.0  ;;  %v4415_v6 = vadd.f32 %v4414_v49, %v4413_v38  ;;  %v5061_v54 = vld [vmem:[%s8434_s12] ss:$0 sm:$0xff] }
 0x504   :  { %v4425_v53 = vsel %vm969_vm1, %v4393_v11, 0.0  ;;  %v4379_v56 = vadd.f32 %v4363_v61, %v8471_v32 }
 0x505   :  { %v4426_v25 = vadd.f32 %v4425_v53, %v4424_v33  ;;  %v4396_v23 = vmax.f32 %v4380_v0, 0.0  ;;  %v4416_v63 = vrot.slane %v4415_v6, 1 }
 0x506   :  { %v4395_v22 = vmax.f32 %v4379_v56, 0.0 }
 0x507   :  { %v4428_v9 = vadd.f32 %v4427_v16, %v4426_v25  ;;  %v4431_v50 = vsel %vm969_vm1, %v4396_v23, 0.0  ;;  %v4417_v40 = vadd.f32 %v4416_v63, %v4415_v6 }
 0x508   :  { %v4429_v59 = vsel %vm969_vm1, %v4395_v22, 0.0 }
 0x509   :  { %v4430_v1 = vadd.f32 %v4429_v59, %v4428_v9  ;;  %v4440_v47 = vmul.f32 0.015625, %v4417_v40 }
 0x50b   :  { %v4432_v42 = vadd.f32 %v4431_v50, %v4430_v1 }
 0x50d   :  { %v4433_v28 = vrot.slane %v4432_v42, 4 }
 0x50f   :  { %v4434_v55 = vadd.f32 %v4433_v28, %v4432_v42 }
 0x511   :  { %v4435_v39 = vrot.slane %v4434_v55, 2 }
 0x513   :  { %v4436_v24 = vadd.f32 %v4435_v39, %v4434_v55 }
 0x515   :  { %v4437_v4 = vrot.slane %v4436_v24, 1 }
 0x517   :  { %v4438_v43 = vadd.f32 %v4437_v4, %v4436_v24 }
 0x519   :  { %v4441_v10 = vmul.f32 0.015625, %v4438_v43 }
 0x51b   :  { %v4452_v20 = vsel %vm4451_vm6, %v4441_v10, %v4440_v47 }
 0x51c   :  { %6085 = vmatmul.mubr.msk.f32.vlgmr.msra.gmra.mrb[40].mxu1 %vm969_vm1, %v4452_v20 }
 0x51d   :  { %6202 = vmatpush3.bf16.msra.mxu1 %v6201_v15  ;;  %6095 = vmatprep.mubr.msk.f32.mxu1 %vm6508_vm5, %v8460_v14 }
 0x51e   :  { %6203 = vmatprep.subr.bf16.mxu1 %v6507_v62 }
 0x521   :  { %6205 = vmatpush3.bf16.msra.mxu1 %v6204_v17 }
 0x522   :  { %6206 = vmatprep.subr.bf16.mxu1 %v6507_v62 }
 0x524   :  { %6096 = vmatmul.mubr.msk.f32.vlgmr.msra.gmra.mrb[42].mxu1 %vm120_vm0, %v4442_v60 }
 0x525   :  { %6208 = vmatpush3.bf16.msra.mxu1 %v6207_v36  ;;  %6114 = vmatprep.mubr.msk.f32.mxu1 %vm6508_vm5, %v8460_v14  ;;  %v4612_v14 = vld [vmem:[%s8433_s11 + $0x28] sm:$0xff] }
 0x526   :  { %6209 = vmatprep.subr.bf16.mxu1 %v6507_v62  ;;  %v6213_v26 = vpack.c.bf16 %v4612_v14, %v4611_v58 }
 0x529   :  { %6211 = vmatpush3.bf16.msra.mxu1 %v6210_v45 }
 0x52a   :  { %6212 = vmatprep.subr.bf16.mxu1 %v6507_v62 }
 0x52d   :  { %6214 = vmatpush3.bf16.msra.mxu1 %v6213_v26 }
 0x52e   :  { %6215 = vmatprep.subr.bf16.mxu1 %v6507_v62 }
 0x531   :  { %6217 = vmatpush3.bf16.msra.mxu1 %v6216_v37 }
 0x5ef   :  { %v4521_v31 = vpop.f32.mrb[40].mxu1 }
 0x5f0   :  { %v6086_v18 = vpop.f32.mrb[41].mxu1 }
 0x5f7   :  { %v4594_v41 = vpop.f32.mrb[42].mxu1 }
 0x5f8   :  { %v4595_v34 = vadd.f32 %v4594_v41, %v4521_v31  ;;  %v6097_v12 = vpop.f32.mrb[43].mxu1 }
 0x5fa   :  { %v4605_v48 = vadd.f32 %v5060_v52, %v4595_v34 }
 0x5fc   :  { %v4606_v5 = vmax.f32 %v4605_v48, 0.0 }
 0x5fe   :  { %6115 = vmatmul.mubr.msk.f32.vlgmr.msra.gmra.mrb[44].mxu1 %vm4622_vm7, %v4606_v5 }
 0x6d1   :  { %v4692_v62 = vpop.f32.mrb[44].mxu1 }
 0x6d2   :  { %v4693_v35 = vadd.f32 %v5061_v54, %v4692_v62  ;;  %v6116_v46 = vpop.f32.mrb[45].mxu1 }
 0x6d4   :  { %4696 = vst [vmem:[#allocation2] sm:$0x3] %v4693_v35 }
 0x6d5   :  { %6493 = shalt.err (!%p6490_p4)
}
 0x6d6   :  { %s6494_s19 = scalar_lea.hbm %s8435_s13, 32 }
 0x6d7   :  { %p6495_p5 = scmp.ne.s32.totalorder %s8435_s13, %s6494_s19  ;;  %p6498_p6 = scmp.lt.u32.totalorder %s6494_s19, %s8435_s13 }
 0x6d9   :  { %p6500_p7 = pnand %p6498_p6, %p6495_p5 }
 0x6db   :  { %6503 = shalt.err (!%p6500_p7)
}
 0x6dc   :  { %4706 = dma.vmem_to_hbm [thread:$0]  %s4704_s16, 32, %s8435_s13, [#allocation3]  }
 0x6dd   :  { %6504 = dma.done.wait [#allocation3], 32  }
 0x6de   :  { %6505 = vsyncadd [#allocation3], 4294967264 }
 0x6df   :  { %4710 = vsyncpa [#allocation3], 1 }

</bundles_post_ra>
